<compile_context>
chip_gen: v7x
topology: tpu7x:2x2x1
jax: 0.10.0
libtpu: 0.0.40
codegen_flags: <defaults>
</compile_context>

<pallas_src>
import numpy as np
import jax
import jax.numpy as jnp
from jax import lax
from jax.experimental import pallas as pl
from jax.experimental.pallas import tpu as pltpu

# ---------------- model config (social_stgcnn defaults, small graph) -----------------
N_STGCNN = 1
N_TXPCNN = 2
INPUT_FEAT = 2
OUTPUT_FEAT = 5
SEQ_LEN = 8
PRED_SEQ_LEN = 12
KERNEL_SIZE = 3
V_NODES = 6
GRU_HIDDEN = 16

T, V = SEQ_LEN, V_NODES
TV = T * V                                    # 48
H, W = OUTPUT_FEAT, V_NODES                   # 5, 6  spatial grid of the 3x3 convs
HW = H * W                                    # 30
D_IN = INPUT_FEAT * TV                        # 96   st_gcn input row length
D_ST = OUTPUT_FEAT * TV                       # 240  st_gcn activation (valid lanes)
D_SP = PRED_SEQ_LEN * HW                      # 360  spatial-stage row length (= padded width)
D_ROB = 64                                    # padded robot-encoding row length
ROWPAD = 8                                    # activations carried as (8, N) slabs

# MXU operand dtype for the folded weight matrices (f32 accumulation everywhere,
# elementwise math stays f32).  jnp.float32 gives bit-closer parity; bf16 halves the
# weight DMA bytes and the MXU pass count on v6e/v7x.
MAT_DTYPE = jnp.bfloat16


# ======================= static 3x3 shift matrices (numpy, host) =====================

def _conv3x3_shift_matrices_np(h, w):
    """S[k] (HW, HW) with S[k][src, dst] = 1 for tap k = dh*3+dw of a pad-1 3x3 conv."""
    hw = h * w
    s = np.zeros((9, hw, hw), np.float32)
    for dh in range(3):
        for dw in range(3):
            k = dh * 3 + dw
            for y in range(h):
                for x in range(w):
                    yy, xx = y + dh - 1, x + dw - 1
                    if 0 <= yy < h and 0 <= xx < w:
                        s[k, yy * w + xx, y * w + x] = 1.0
    return s


# ================================ Pallas kernel =======================================

def _fused_forward_kernel(v_ref, ma_ref, gb_ref, rob_ref, gmats_ref, bigm_ref,
                          smats_ref, rows_ref, alpha_ref, o_ref):
    """Whole social_stgcnn forward (post-GRU) on flat (8, N) VMEM slabs.

    v_ref   (8, 96)  f32   flattened (c,t,v) graph sequence, row 0 = data
    ma_ref  (96, 96) bf16  block-diagonal adjacency operator (runtime, from `a`)
    gb_ref  (1, 360) f32   gcn-conv bias row (runtime: bias * adjacency column sums)
    rob_ref (16, 64) f32   rows 0 / 8 = past / future robot encodings
    gmats_ref (2, 96, 360) bf16  [residual 1x1 conv+BN, gcn 1x1 conv+BN1]
    bigm_ref  (6, 360, 360) bf16 [temporal conv+BN2, tpcnn0(v-part), tpcnn1,
                                  tpcnn_output, conv1(final-part), conv2]
    smats_ref (2, 64, 360) bf16  [tpcnn0(past-robot part), conv1(future-robot part)]
    rows_ref  (8, 360) f32       folded bias / BN-shift rows
    alpha_ref (8,)    f32 SMEM   PReLU alphas
    o_ref   (8, 360) f32   row 0 = flat output [co=12][h=5][w=6]
    """

    def mm(x, m):
        return jnp.dot(x.astype(MAT_DTYPE), m, preferred_element_type=jnp.float32)

    def prelu(x, a):
        return jnp.where(x >= 0.0, x, a * x)

    def row(i):
        return rows_ref[i:i + 1, :]

    x = v_ref[...]                                           # (8, 96) f32

    # ---- st_gcn[0]: residual 1x1 conv+BN; gcn 1x1 conv -> adjacency -> BN1 -> PReLU --
    res = mm(x, gmats_ref[0]) + row(0)                       # (8, 360) [lanes < 240 valid]
    xa = mm(x, ma_ref[...])                                  # adjacency (commuted with 1x1 conv)
    g = prelu(mm(xa, gmats_ref[1]) + gb_ref[...], alpha_ref[0])
    # ---- temporal (3,1) conv + BN2, residual add, PReLU ----
    vo = prelu(mm(g, bigm_ref[0]) + row(1) + res, alpha_ref[1])

    # ---- torch view/cat boundary 1 + tpcnn0 + PReLU (relayout folded into matrices) --
    past = rob_ref[0:ROWPAD, :]
    h0 = prelu(mm(vo, bigm_ref[1]) + mm(past, smats_ref[0]) + row(2), alpha_ref[2])
    # ---- tpcnn1 + PReLU ----
    h1 = prelu(mm(h0, bigm_ref[2]) + row(3), alpha_ref[3])
    # ---- tpcnn_output (no activation) ----
    fin = mm(h1, bigm_ref[3]) + row(4)
    # ---- torch view/cat boundary 2 + conv1 + PReLU ----
    fut = rob_ref[ROWPAD:2 * ROWPAD, :]
    c1 = prelu(mm(fin, bigm_ref[4]) + mm(fut, smats_ref[1]) + row(5), alpha_ref[4])
    # ---- conv2 ----
    o_ref[...] = mm(c1, bigm_ref[5]) + row(6)


def _fused_call(v_in, ma, gb_row, robot_rows, prep):
    vmem = pl.BlockSpec(memory_space=pltpu.MemorySpace.VMEM)
    smem = pl.BlockSpec(memory_space=pltpu.MemorySpace.SMEM)
    return pl.pallas_call(
        _fused_forward_kernel,
        out_shape=jax.ShapeDtypeStruct((ROWPAD, D_SP), jnp.float32),
        in_specs=[vmem] * 8 + [smem],
        out_specs=vmem,
    )(v_in, ma, gb_row, robot_rows,
      prep['gmats'], prep['bigm'], prep['smats'], prep['rows'], prep['alphas'])


# ============================ biGRU (plain JAX glue) ==================================
# Faithful to the reference's batch_first mismatch: nn.GRU (batch_first=False) sees
# (seq=1, batch=20, input=2), so the "recurrence" is a single step per direction.

def _gru_direction(x_seq, W_ih, W_hh, b_ih, b_hh):
    B = x_seq.shape[1]
    Hh = W_hh.shape[1]
    h0 = jnp.zeros((B, Hh), jnp.float32)

    def step(h, x_t):
        gi = x_t @ W_ih.T + b_ih
        gh = h @ W_hh.T + b_hh
        i_r, i_z, i_n = jnp.split(gi, 3, axis=1)
        h_r, h_z, h_n = jnp.split(gh, 3, axis=1)
        r = jax.nn.sigmoid(i_r + h_r)
        z = jax.nn.sigmoid(i_z + h_z)
        n = jnp.tanh(i_n + r * h_n)
        return (1.0 - z) * n + z * h, None

    h_fin, _ = lax.scan(step, h0, x_seq)
    return h_fin


def bigru_forward(robot_traj, p):
    x = jnp.transpose(robot_traj, (0, 2, 1)).astype(jnp.float32)   # GRU's (seq, batch, in)
    h_f = _gru_direction(x, p['W_ih_f'], p['W_hh_f'], p['b_ih_f'], p['b_hh_f'])
    h_b = _gru_direction(x[::-1], p['W_ih_b'], p['W_hh_b'], p['b_ih_b'], p['b_hh_b'])
    h = jnp.concatenate([h_f, h_b], axis=1)[None]                  # (1, 20, 2H)
    return h @ p['fc_w'].T + p['fc_b']                             # (1, 20, OUTPUT_FEAT)


# ================================ parameters ==========================================

def init_params(key):
    keys = iter(jax.random.split(key, 64))

    def nrm(shape, scale=0.1):
        return (scale * jax.random.normal(next(keys), shape)).astype(jnp.float32)

    def alpha():
        return (0.25 + 0.01 * jax.random.normal(next(keys), ())).astype(jnp.float32)

    def bn(c):
        return dict(gamma=1.0 + nrm((c,)), beta=nrm((c,)), mean=nrm((c,)),
                    var=jax.random.uniform(next(keys), (c,), jnp.float32, 0.5, 1.5))

    bigru = dict(
        W_ih_f=nrm((3 * GRU_HIDDEN, INPUT_FEAT)), W_hh_f=nrm((3 * GRU_HIDDEN, GRU_HIDDEN)),
        b_ih_f=nrm((3 * GRU_HIDDEN,)), b_hh_f=nrm((3 * GRU_HIDDEN,)),
        W_ih_b=nrm((3 * GRU_HIDDEN, INPUT_FEAT)), W_hh_b=nrm((3 * GRU_HIDDEN, GRU_HIDDEN)),
        b_ih_b=nrm((3 * GRU_HIDDEN,)), b_hh_b=nrm((3 * GRU_HIDDEN,)),
        fc_w=nrm((OUTPUT_FEAT, 2 * GRU_HIDDEN)), fc_b=nrm((OUTPUT_FEAT,)),
    )

    stgcn0 = dict(
        gcn_w=nrm((OUTPUT_FEAT, INPUT_FEAT, 1, 1)), gcn_b=nrm((OUTPUT_FEAT,)),
        bn1=bn(OUTPUT_FEAT),
        tcn_alpha=alpha(),
        tcn_w=nrm((OUTPUT_FEAT, OUTPUT_FEAT, KERNEL_SIZE, 1)), tcn_b=nrm((OUTPUT_FEAT,)),
        bn2=bn(OUTPUT_FEAT),
        out_alpha=alpha(),
        res_w=nrm((OUTPUT_FEAT, INPUT_FEAT, 1, 1)), res_b=nrm((OUTPUT_FEAT,)),
        res_bn=bn(OUTPUT_FEAT),
    )

    return dict(
        bigru=bigru, stgcn0=stgcn0,
        tpcnn0_w=nrm((PRED_SEQ_LEN, 2 * SEQ_LEN, 3, 3)), tpcnn0_b=nrm((PRED_SEQ_LEN,)),
        prelu0=alpha(),
        tpcnn1_w=nrm((PRED_SEQ_LEN, PRED_SEQ_LEN, 3, 3)), tpcnn1_b=nrm((PRED_SEQ_LEN,)),
        prelu1=alpha(),
        tpout_w=nrm((PRED_SEQ_LEN, PRED_SEQ_LEN, 3, 3)), tpout_b=nrm((PRED_SEQ_LEN,)),
        conv1_w=nrm((PRED_SEQ_LEN, 2 * PRED_SEQ_LEN, 3, 3)), conv1_b=nrm((PRED_SEQ_LEN,)),
        prelu_head=alpha(),
        conv2_w=nrm((PRED_SEQ_LEN, PRED_SEQ_LEN, 3, 3)), conv2_b=nrm((PRED_SEQ_LEN,)),
    )


def prepare_params(params):
    """One-time host-side weight folding: every conv becomes a (K, 360) matrix on the
    flattened activation; BN folding, conv biases, the torch .view/cat relayouts and
    the robot-encoding broadcasts are folded into those matrices / bias rows.  Packed
    into 3 bf16 matrix bundles + 1 f32 row bundle + 1 SMEM alpha vector."""
    assert N_STGCNN == 1 and N_TXPCNN == 2, "folded prep written for the default config"
    f32 = np.float32
    g = lambda x: np.asarray(jax.device_get(x)).astype(f32)

    st = params['stgcn0']

    def bn_fold(d):
        s = g(d['gamma']) / np.sqrt(g(d['var']) + 1e-5)
        return s, g(d['beta']) - g(d['mean']) * s

    bn1_s, bn1_m = bn_fold(st['bn1'])
    bn2_s, bn2_m = bn_fold(st['bn2'])
    bnr_s, bnr_m = bn_fold(st['res_bn'])

    Wg = g(st['gcn_w'])[:, :, 0, 0]            # (5, 2)
    Wr = g(st['res_w'])[:, :, 0, 0]            # (5, 2)
    Wt = g(st['tcn_w'])[:, :, :, 0]            # (5, 5, 3)

    # ---- st_gcn 1x1 convs (+ folded BN) as (96, 360) matrices ------------------------
    eye_tv = np.eye(TV, dtype=f32)
    Mres = np.zeros((D_IN, D_SP), f32)
    Mg = np.zeros((D_IN, D_SP), f32)
    for ci in range(INPUT_FEAT):
        for c in range(OUTPUT_FEAT):
            Mres[ci * TV:(ci + 1) * TV, c * TV:(c + 1) * TV] = (Wr[c, ci] * bnr_s[c]) * eye_tv
            Mg[ci * TV:(ci + 1) * TV, c * TV:(c + 1) * TV] = (Wg[c, ci] * bn1_s[c]) * eye_tv

    # ---- temporal (3,1) conv (+ folded BN2) as a (360, 360) matrix -------------------
    Mt = np.zeros((D_SP, D_SP), f32)
    eye_v = np.eye(V, dtype=f32)
    for kh in range(3):
        # tap kh reads the input at time t + kh - 1 (zero padded)
        tm = np.kron(np.eye(T, k=1 - kh, dtype=f32), eye_v)
        for cp in range(OUTPUT_FEAT):
            for c in range(OUTPUT_FEAT):
                Mt[c * TV:(c + 1) * TV, cp * TV:(cp + 1) * TV] += (Wt[cp, c, kh] * bn2_s[cp]) * tm

    res_b_row = np.zeros(D_SP, f32)
    tb_row = np.zeros(D_SP, f32)
    res_b_row[:D_ST] = np.repeat(g(st['res_b']) * bnr_s + bnr_m, TV)
    tb_row[:D_ST] = np.repeat(g(st['tcn_b']) * bn2_s + bn2_m, TV)

    # ---- 3x3 convs as (Cin*30, 360) matrices ------------------------------------------
    S9 = _conv3x3_shift_matrices_np(H, W)

    def conv_mat(w, b):
        w, b = g(w), g(b)
        cout, cin = w.shape[0], w.shape[1]
        wk = w.reshape(cout, cin, 9)
        m = np.einsum('ock,ksd->csod', wk, S9).reshape(cin * HW, cout * HW)
        return m.astype(f32), np.repeat(b, HW).astype(f32)

    M0, b0 = conv_mat(params['tpcnn0_w'], params['tpcnn0_b'])     # (480, 360)
    M1, b1 = conv_mat(params['tpcnn1_w'], params['tpcnn1_b'])     # (360, 360)
    M2, b2 = conv_mat(params['tpout_w'], params['tpout_b'])       # (360, 360)
    Mc1, bc1 = conv_mat(params['conv1_w'], params['conv1_b'])     # (720, 360)
    Mc2, bc2 = conv_mat(params['conv2_w'], params['conv2_b'])     # (360, 360)

    # ---- boundary 1: cat((v, past), dim=2).view(1,16,5,6) folded into tpcnn0 ----------
    m_idx = np.arange(D_ST)
    fmap = (m_idx // TV) * (2 * TV) + (m_idx % TV)                # v rows -> combined rows
    M0v = np.zeros((D_SP, D_SP), f32)
    M0v[:D_ST] = M0[fmap]
    M0p = np.zeros((D_ROB, D_SP), f32)                            # past rows (broadcast over V)
    for n in range(OUTPUT_FEAT * T):
        base = (n // T) * (2 * TV) + (T + (n % T)) * V
        M0p[n] = M0[base:base + V].sum(axis=0)

    # ---- boundary 2: view/cat((final, fut), dim=2).view(1,24,5,6) folded into conv1 ---
    m_idx = np.arange(D_SP)
    mr, wr = m_idx // V, m_idx % V
    p_idx = (mr // PRED_SEQ_LEN) * (2 * PRED_SEQ_LEN) + (mr % PRED_SEQ_LEN)
    Mc1f = Mc1[p_idx * V + wr]                                    # (360, 360)
    Mc1r = np.zeros((D_ROB, D_SP), f32)
    for n in range(OUTPUT_FEAT * PRED_SEQ_LEN):
        pn = (n // PRED_SEQ_LEN) * (2 * PRED_SEQ_LEN) + PRED_SEQ_LEN + (n % PRED_SEQ_LEN)
        Mc1r[n] = Mc1[pn * V:(pn + 1) * V].sum(axis=0)

    # ---- pack ---------------------------------------------------------------------------
    gmats = jnp.asarray(np.stack([Mres, Mg]), MAT_DTYPE)                      # (2,  96, 360)
    bigm = jnp.asarray(np.stack([Mt, M0v, M1, M2, Mc1f, Mc2]), MAT_DTYPE)     # (6, 360, 360)
    smats = jnp.asarray(np.stack([M0p, Mc1r]), MAT_DTYPE)                     # (2,  64, 360)
    rows = jnp.asarray(np.stack([res_b_row, tb_row, b0, b1, b2, bc1, bc2,
                                 np.zeros(D_SP, f32)]), jnp.float32)          # (8, 360)
    alphas = jnp.asarray(np.array([g(st['tcn_alpha']), g(st['out_alpha']),
                                   g(params['prelu0']), g(params['prelu1']),
                                   g(params['prelu_head']), 0.0, 0.0, 0.0], dtype=f32))

    return dict(
        bigru=jax.tree_util.tree_map(lambda x: jnp.asarray(x, jnp.float32), params['bigru']),
        gcn_bias=jnp.asarray(g(st['gcn_b'])),
        bn1_scale=jnp.asarray(bn1_s), bn1_shift=jnp.asarray(bn1_m),
        gmats=gmats, bigm=bigm, smats=smats, rows=rows, alphas=alphas,
    )


# ================================= forward ============================================

def social_stgcnn_forward(v, a, robot_trajectory, prep):
    # v: (1, INPUT_FEAT, SEQ_LEN, V)   a: (SEQ_LEN, V, V)
    # robot_trajectory: (1, INPUT_FEAT, SEQ_LEN + PRED_SEQ_LEN)
    f32 = jnp.float32
    a_f = a.astype(f32)

    # ---- biGRU robot encodings (plain JAX; a single GRU step per direction) ----
    robot_enc = bigru_forward(robot_trajectory, prep['bigru'])        # (1, 20, 5)
    past_flat = robot_enc[0, :SEQ_LEN, :].reshape(-1)                 # (40,)  torch .view
    fut_flat = robot_enc[0, SEQ_LEN:, :].reshape(-1)                  # (60,)  torch .view
    robot_rows = jnp.zeros((2 * ROWPAD, D_ROB), f32)
    robot_rows = robot_rows.at[0, :past_flat.shape[0]].set(past_flat)
    robot_rows = robot_rows.at[ROWPAD, :fut_flat.shape[0]].set(fut_flat)

    # ---- runtime operands built from the adjacency ----
    # block-diagonal (over time, over input channels) adjacency operator on the flat
    # (c, t, v) lane axis
    a_bd = (jnp.eye(T, dtype=f32)[:, None, :, None] * a_f[:, :, None, :]).reshape(TV, TV)
    ma = (jnp.eye(INPUT_FEAT, dtype=f32)[:, None, :, None]
          * a_bd[None, :, None, :]).reshape(D_IN, D_IN).astype(MAT_DTYPE)
    # the gcn-conv bias picks up the adjacency column sums (conv -> einsum order in torch)
    colsum = a_f.sum(axis=1)                                          # (T, V)
    gb = (prep['gcn_bias'][:, None, None] * colsum[None]
          * prep['bn1_scale'][:, None, None] + prep['bn1_shift'][:, None, None])
    gb_row = jnp.zeros((1, D_SP), f32).at[0, :D_ST].set(gb.reshape(-1))

    # ---- flattened graph-sequence input, padded to an (8, 96) slab ----
    v_in = jnp.zeros((ROWPAD, D_IN), f32).at[0].set(v.astype(f32).reshape(D_IN))

    out8 = _fused_call(v_in, ma, gb_row, robot_rows, prep)            # (8, 360)
    out = out8[0].reshape(1, OUTPUT_FEAT, PRED_SEQ_LEN, V_NODES)      # final torch .view
    return out, a


# =================================== main =============================================

if __name__ == "__main__":
    key = jax.random.PRNGKey(0)
    kp, kv, ka, kr = jax.random.split(key, 4)
    params = init_params(kp)
    prep = prepare_params(params)

    v = jax.random.normal(kv, (1, INPUT_FEAT, SEQ_LEN, V_NODES), jnp.float32)
    a = jax.random.normal(ka, (SEQ_LEN, V_NODES, V_NODES), jnp.float32)
    robot_trajectory = jax.random.normal(
        kr, (1, INPUT_FEAT, SEQ_LEN + PRED_SEQ_LEN), jnp.float32)

    fwd = jax.jit(social_stgcnn_forward)
    out, a_out = fwd(v, a, robot_trajectory, prep)
    out = jax.block_until_ready(out)
    a_out = jax.block_until_ready(a_out)

    assert out.shape == (1, OUTPUT_FEAT, PRED_SEQ_LEN, V_NODES), out.shape
    assert a_out.shape == a.shape
    assert bool(jnp.all(jnp.isfinite(out)))
    print("KERNEL_OK")
</pallas_src>

<mosaic_0001>
module attributes {stable_mosaic.version = 11 : i64} {
  func.func @_fused_forward_kernel(%arg0: memref<8x96xf32, #tpu.memory_space<vmem>>, %arg1: memref<96x96xbf16, #tpu.memory_space<vmem>>, %arg2: memref<1x360xf32, #tpu.memory_space<vmem>>, %arg3: memref<16x64xf32, #tpu.memory_space<vmem>>, %arg4: memref<2x96x360xbf16, #tpu.memory_space<vmem>>, %arg5: memref<6x360x360xbf16, #tpu.memory_space<vmem>>, %arg6: memref<2x64x360xbf16, #tpu.memory_space<vmem>>, %arg7: memref<8x360xf32, #tpu.memory_space<vmem>>, %arg8: memref<8xf32, #tpu.memory_space<smem>>, %arg9: memref<8x360xf32, #tpu.memory_space<vmem>>) attributes {dimension_semantics = [], scalar_prefetch = 0 : i64, scratch_operands = 0 : i64, tpu.core_type = #tpu.core_type<tc>} {
    %c0 = arith.constant 0 : index
    %c0_0 = arith.constant 0 : index
    %0 = vector.load %arg0[%c0, %c0_0] : memref<8x96xf32, #tpu.memory_space<vmem>>, vector<8x96xf32>
    %c0_1 = arith.constant 0 : index
    %c0_2 = arith.constant 0 : index
    %c0_3 = arith.constant 0 : index
    %1 = vector.load %arg4[%c0_1, %c0_2, %c0_3] : memref<2x96x360xbf16, #tpu.memory_space<vmem>>, vector<1x96x360xbf16>
    %2 = vector.shape_cast %1 : vector<1x96x360xbf16> to vector<96x360xbf16>
    %3 = arith.truncf %0 : vector<8x96xf32> to vector<8x96xbf16>
    %cst = arith.constant dense<0.000000e+00> : vector<8x360xf32>
    %4 = tpu.matmul %3, %2, %cst {dimension_numbers = #tpu.dot_dimension_numbers<[1], [0], [0], [1], [0, 0, 1, 1], [], []>} : vector<8x96xbf16>, vector<96x360xbf16>, vector<8x360xf32> -> vector<8x360xf32>
    %c0_4 = arith.constant 0 : index
    %c0_5 = arith.constant 0 : index
    %5 = vector.load %arg7[%c0_4, %c0_5] : memref<8x360xf32, #tpu.memory_space<vmem>>, vector<1x360xf32>
    %6 = vector.broadcast %5 : vector<1x360xf32> to vector<8x360xf32>
    %7 = arith.addf %4, %6 : vector<8x360xf32>
    %c0_6 = arith.constant 0 : index
    %c0_7 = arith.constant 0 : index
    %8 = vector.load %arg1[%c0_6, %c0_7] : memref<96x96xbf16, #tpu.memory_space<vmem>>, vector<96x96xbf16>
    %9 = arith.truncf %0 : vector<8x96xf32> to vector<8x96xbf16>
    %cst_8 = arith.constant dense<0.000000e+00> : vector<8x96xf32>
    %10 = tpu.matmul %9, %8, %cst_8 {dimension_numbers = #tpu.dot_dimension_numbers<[1], [0], [0], [1], [0, 0, 1, 1], [], []>} : vector<8x96xbf16>, vector<96x96xbf16>, vector<8x96xf32> -> vector<8x96xf32>
    %c1 = arith.constant 1 : index
    %c0_9 = arith.constant 0 : index
    %c0_10 = arith.constant 0 : index
    %11 = vector.load %arg4[%c1, %c0_9, %c0_10] : memref<2x96x360xbf16, #tpu.memory_space<vmem>>, vector<1x96x360xbf16>
    %12 = vector.shape_cast %11 : vector<1x96x360xbf16> to vector<96x360xbf16>
    %13 = arith.truncf %10 : vector<8x96xf32> to vector<8x96xbf16>
    %cst_11 = arith.constant dense<0.000000e+00> : vector<8x360xf32>
    %14 = tpu.matmul %13, %12, %cst_11 {dimension_numbers = #tpu.dot_dimension_numbers<[1], [0], [0], [1], [0, 0, 1, 1], [], []>} : vector<8x96xbf16>, vector<96x360xbf16>, vector<8x360xf32> -> vector<8x360xf32>
    %c0_12 = arith.constant 0 : index
    %c0_13 = arith.constant 0 : index
    %15 = vector.load %arg2[%c0_12, %c0_13] : memref<1x360xf32, #tpu.memory_space<vmem>>, vector<1x360xf32>
    %16 = vector.broadcast %15 : vector<1x360xf32> to vector<8x360xf32>
    %17 = arith.addf %14, %16 : vector<8x360xf32>
    %c0_14 = arith.constant 0 : index
    %18 = memref.load %arg8[%c0_14] : memref<8xf32, #tpu.memory_space<smem>>
    %cst_15 = arith.constant 0.000000e+00 : f32
    %19 = vector.broadcast %cst_15 : f32 to vector<8x360xf32>
    %20 = arith.cmpf oge, %17, %19 : vector<8x360xf32>
    %21 = vector.broadcast %18 : f32 to vector<8x360xf32>
    %22 = arith.mulf %21, %17 : vector<8x360xf32>
    %23 = arith.select %20, %17, %22 : vector<8x360xi1>, vector<8x360xf32>
    %c0_16 = arith.constant 0 : index
    %c0_17 = arith.constant 0 : index
    %c0_18 = arith.constant 0 : index
    %24 = vector.load %arg5[%c0_16, %c0_17, %c0_18] : memref<6x360x360xbf16, #tpu.memory_space<vmem>>, vector<1x360x360xbf16>
    %25 = vector.shape_cast %24 : vector<1x360x360xbf16> to vector<360x360xbf16>
    %26 = arith.truncf %23 : vector<8x360xf32> to vector<8x360xbf16>
    %cst_19 = arith.constant dense<0.000000e+00> : vector<8x360xf32>
    %27 = tpu.matmul %26, %25, %cst_19 {dimension_numbers = #tpu.dot_dimension_numbers<[1], [0], [0], [1], [0, 0, 1, 1], [], []>} : vector<8x360xbf16>, vector<360x360xbf16>, vector<8x360xf32> -> vector<8x360xf32>
    %c1_20 = arith.constant 1 : index
    %c0_21 = arith.constant 0 : index
    %28 = vector.load %arg7[%c1_20, %c0_21] : memref<8x360xf32, #tpu.memory_space<vmem>>, vector<1x360xf32>
    %29 = vector.broadcast %28 : vector<1x360xf32> to vector<8x360xf32>
    %30 = arith.addf %27, %29 : vector<8x360xf32>
    %31 = arith.addf %30, %7 : vector<8x360xf32>
    %c1_22 = arith.constant 1 : index
    %32 = memref.load %arg8[%c1_22] : memref<8xf32, #tpu.memory_space<smem>>
    %cst_23 = arith.constant 0.000000e+00 : f32
    %33 = vector.broadcast %cst_23 : f32 to vector<8x360xf32>
    %34 = arith.cmpf oge, %31, %33 : vector<8x360xf32>
    %35 = vector.broadcast %32 : f32 to vector<8x360xf32>
    %36 = arith.mulf %35, %31 : vector<8x360xf32>
    %37 = arith.select %34, %31, %36 : vector<8x360xi1>, vector<8x360xf32>
    %c0_24 = arith.constant 0 : index
    %c0_25 = arith.constant 0 : index
    %38 = vector.load %arg3[%c0_24, %c0_25] : memref<16x64xf32, #tpu.memory_space<vmem>>, vector<8x64xf32>
    %c1_26 = arith.constant 1 : index
    %c0_27 = arith.constant 0 : index
    %c0_28 = arith.constant 0 : index
    %39 = vector.load %arg5[%c1_26, %c0_27, %c0_28] : memref<6x360x360xbf16, #tpu.memory_space<vmem>>, vector<1x360x360xbf16>
    %40 = vector.shape_cast %39 : vector<1x360x360xbf16> to vector<360x360xbf16>
    %41 = arith.truncf %37 : vector<8x360xf32> to vector<8x360xbf16>
    %cst_29 = arith.constant dense<0.000000e+00> : vector<8x360xf32>
    %42 = tpu.matmul %41, %40, %cst_29 {dimension_numbers = #tpu.dot_dimension_numbers<[1], [0], [0], [1], [0, 0, 1, 1], [], []>} : vector<8x360xbf16>, vector<360x360xbf16>, vector<8x360xf32> -> vector<8x360xf32>
    %c0_30 = arith.constant 0 : index
    %c0_31 = arith.constant 0 : index
    %c0_32 = arith.constant 0 : index
    %43 = vector.load %arg6[%c0_30, %c0_31, %c0_32] : memref<2x64x360xbf16, #tpu.memory_space<vmem>>, vector<1x64x360xbf16>
    %44 = vector.shape_cast %43 : vector<1x64x360xbf16> to vector<64x360xbf16>
    %45 = arith.truncf %38 : vector<8x64xf32> to vector<8x64xbf16>
    %cst_33 = arith.constant dense<0.000000e+00> : vector<8x360xf32>
    %46 = tpu.matmul %45, %44, %cst_33 {dimension_numbers = #tpu.dot_dimension_numbers<[1], [0], [0], [1], [0, 0, 1, 1], [], []>} : vector<8x64xbf16>, vector<64x360xbf16>, vector<8x360xf32> -> vector<8x360xf32>
    %47 = arith.addf %42, %46 : vector<8x360xf32>
    %c2 = arith.constant 2 : index
    %c0_34 = arith.constant 0 : index
    %48 = vector.load %arg7[%c2, %c0_34] : memref<8x360xf32, #tpu.memory_space<vmem>>, vector<1x360xf32>
    %49 = vector.broadcast %48 : vector<1x360xf32> to vector<8x360xf32>
    %50 = arith.addf %47, %49 : vector<8x360xf32>
    %c2_35 = arith.constant 2 : index
    %51 = memref.load %arg8[%c2_35] : memref<8xf32, #tpu.memory_space<smem>>
    %cst_36 = arith.constant 0.000000e+00 : f32
    %52 = vector.broadcast %cst_36 : f32 to vector<8x360xf32>
    %53 = arith.cmpf oge, %50, %52 : vector<8x360xf32>
    %54 = vector.broadcast %51 : f32 to vector<8x360xf32>
    %55 = arith.mulf %54, %50 : vector<8x360xf32>
    %56 = arith.select %53, %50, %55 : vector<8x360xi1>, vector<8x360xf32>
    %c2_37 = arith.constant 2 : index
    %c0_38 = arith.constant 0 : index
    %c0_39 = arith.constant 0 : index
    %57 = vector.load %arg5[%c2_37, %c0_38, %c0_39] : memref<6x360x360xbf16, #tpu.memory_space<vmem>>, vector<1x360x360xbf16>
    %58 = vector.shape_cast %57 : vector<1x360x360xbf16> to vector<360x360xbf16>
    %59 = arith.truncf %56 : vector<8x360xf32> to vector<8x360xbf16>
    %cst_40 = arith.constant dense<0.000000e+00> : vector<8x360xf32>
    %60 = tpu.matmul %59, %58, %cst_40 {dimension_numbers = #tpu.dot_dimension_numbers<[1], [0], [0], [1], [0, 0, 1, 1], [], []>} : vector<8x360xbf16>, vector<360x360xbf16>, vector<8x360xf32> -> vector<8x360xf32>
    %c3 = arith.constant 3 : index
    %c0_41 = arith.constant 0 : index
    %61 = vector.load %arg7[%c3, %c0_41] : memref<8x360xf32, #tpu.memory_space<vmem>>, vector<1x360xf32>
    %62 = vector.broadcast %61 : vector<1x360xf32> to vector<8x360xf32>
    %63 = arith.addf %60, %62 : vector<8x360xf32>
    %c3_42 = arith.constant 3 : index
    %64 = memref.load %arg8[%c3_42] : memref<8xf32, #tpu.memory_space<smem>>
    %cst_43 = arith.constant 0.000000e+00 : f32
    %65 = vector.broadcast %cst_43 : f32 to vector<8x360xf32>
    %66 = arith.cmpf oge, %63, %65 : vector<8x360xf32>
    %67 = vector.broadcast %64 : f32 to vector<8x360xf32>
    %68 = arith.mulf %67, %63 : vector<8x360xf32>
    %69 = arith.select %66, %63, %68 : vector<8x360xi1>, vector<8x360xf32>
    %c3_44 = arith.constant 3 : index
    %c0_45 = arith.constant 0 : index
    %c0_46 = arith.constant 0 : index
    %70 = vector.load %arg5[%c3_44, %c0_45, %c0_46] : memref<6x360x360xbf16, #tpu.memory_space<vmem>>, vector<1x360x360xbf16>
    %71 = vector.shape_cast %70 : vector<1x360x360xbf16> to vector<360x360xbf16>
    %72 = arith.truncf %69 : vector<8x360xf32> to vector<8x360xbf16>
    %cst_47 = arith.constant dense<0.000000e+00> : vector<8x360xf32>
    %73 = tpu.matmul %72, %71, %cst_47 {dimension_numbers = #tpu.dot_dimension_numbers<[1], [0], [0], [1], [0, 0, 1, 1], [], []>} : vector<8x360xbf16>, vector<360x360xbf16>, vector<8x360xf32> -> vector<8x360xf32>
    %c4 = arith.constant 4 : index
    %c0_48 = arith.constant 0 : index
    %74 = vector.load %arg7[%c4, %c0_48] : memref<8x360xf32, #tpu.memory_space<vmem>>, vector<1x360xf32>
    %75 = vector.broadcast %74 : vector<1x360xf32> to vector<8x360xf32>
    %76 = arith.addf %73, %75 : vector<8x360xf32>
    %c8 = arith.constant 8 : index
    %c0_49 = arith.constant 0 : index
    %77 = vector.load %arg3[%c8, %c0_49] : memref<16x64xf32, #tpu.memory_space<vmem>>, vector<8x64xf32>
    %c4_50 = arith.constant 4 : index
    %c0_51 = arith.constant 0 : index
    %c0_52 = arith.constant 0 : index
    %78 = vector.load %arg5[%c4_50, %c0_51, %c0_52] : memref<6x360x360xbf16, #tpu.memory_space<vmem>>, vector<1x360x360xbf16>
    %79 = vector.shape_cast %78 : vector<1x360x360xbf16> to vector<360x360xbf16>
    %80 = arith.truncf %76 : vector<8x360xf32> to vector<8x360xbf16>
    %cst_53 = arith.constant dense<0.000000e+00> : vector<8x360xf32>
    %81 = tpu.matmul %80, %79, %cst_53 {dimension_numbers = #tpu.dot_dimension_numbers<[1], [0], [0], [1], [0, 0, 1, 1], [], []>} : vector<8x360xbf16>, vector<360x360xbf16>, vector<8x360xf32> -> vector<8x360xf32>
    %c1_54 = arith.constant 1 : index
    %c0_55 = arith.constant 0 : index
    %c0_56 = arith.constant 0 : index
    %82 = vector.load %arg6[%c1_54, %c0_55, %c0_56] : memref<2x64x360xbf16, #tpu.memory_space<vmem>>, vector<1x64x360xbf16>
    %83 = vector.shape_cast %82 : vector<1x64x360xbf16> to vector<64x360xbf16>
    %84 = arith.truncf %77 : vector<8x64xf32> to vector<8x64xbf16>
    %cst_57 = arith.constant dense<0.000000e+00> : vector<8x360xf32>
    %85 = tpu.matmul %84, %83, %cst_57 {dimension_numbers = #tpu.dot_dimension_numbers<[1], [0], [0], [1], [0, 0, 1, 1], [], []>} : vector<8x64xbf16>, vector<64x360xbf16>, vector<8x360xf32> -> vector<8x360xf32>
    %86 = arith.addf %81, %85 : vector<8x360xf32>
    %c5 = arith.constant 5 : index
    %c0_58 = arith.constant 0 : index
    %87 = vector.load %arg7[%c5, %c0_58] : memref<8x360xf32, #tpu.memory_space<vmem>>, vector<1x360xf32>
    %88 = vector.broadcast %87 : vector<1x360xf32> to vector<8x360xf32>
    %89 = arith.addf %86, %88 : vector<8x360xf32>
    %c4_59 = arith.constant 4 : index
    %90 = memref.load %arg8[%c4_59] : memref<8xf32, #tpu.memory_space<smem>>
    %cst_60 = arith.constant 0.000000e+00 : f32
    %91 = vector.broadcast %cst_60 : f32 to vector<8x360xf32>
    %92 = arith.cmpf oge, %89, %91 : vector<8x360xf32>
    %93 = vector.broadcast %90 : f32 to vector<8x360xf32>
    %94 = arith.mulf %93, %89 : vector<8x360xf32>
    %95 = arith.select %92, %89, %94 : vector<8x360xi1>, vector<8x360xf32>
    %c5_61 = arith.constant 5 : index
    %c0_62 = arith.constant 0 : index
    %c0_63 = arith.constant 0 : index
    %96 = vector.load %arg5[%c5_61, %c0_62, %c0_63] : memref<6x360x360xbf16, #tpu.memory_space<vmem>>, vector<1x360x360xbf16>
    %97 = vector.shape_cast %96 : vector<1x360x360xbf16> to vector<360x360xbf16>
    %98 = arith.truncf %95 : vector<8x360xf32> to vector<8x360xbf16>
    %cst_64 = arith.constant dense<0.000000e+00> : vector<8x360xf32>
    %99 = tpu.matmul %98, %97, %cst_64 {dimension_numbers = #tpu.dot_dimension_numbers<[1], [0], [0], [1], [0, 0, 1, 1], [], []>} : vector<8x360xbf16>, vector<360x360xbf16>, vector<8x360xf32> -> vector<8x360xf32>
    %c6 = arith.constant 6 : index
    %c0_65 = arith.constant 0 : index
    %100 = vector.load %arg7[%c6, %c0_65] : memref<8x360xf32, #tpu.memory_space<vmem>>, vector<1x360xf32>
    %101 = vector.broadcast %100 : vector<1x360xf32> to vector<8x360xf32>
    %102 = arith.addf %99, %101 : vector<8x360xf32>
    %c0_66 = arith.constant 0 : index
    %c0_67 = arith.constant 0 : index
    %103 = vector.load %arg9[%c0_66, %c0_67] : memref<8x360xf32, #tpu.memory_space<vmem>>, vector<8x360xf32>
    tpu.vector_store %arg9[%c0_66, %c0_67], %102 {strides = array<i32>} : memref<8x360xf32, #tpu.memory_space<vmem>>, vector<8x360xf32>,
    return
  }
}

</mosaic_0001>

<bundles_post_ra>
// kernel: squeeze.9
= control target key start
LH: loop header
LB: loop body
LE: loop exit
PB: predicated region body
PF: predicated region fallthrough
CT: control target
= control target key end

     0   :  { %s536_s8 = smov 122   ;;  %s537_s9 = smov 124   ;;  %vm392_vm0 = vcmask 1014784   ;;  %vm405_vm1 = vcmask 1031168   ;;  %vm7_vm2 = vcmask 48128   ;;  %vm396_vm3 = vcmask 31744   ;;  %s851_s0 = inlined_call_operand.vmem [shape: f32[360], index: 0, kind: input, shape index: {}]   ;;  %s852_s1 = inlined_call_operand.vmem [shape: f32[1,5,12,6], index: 1, kind: output, shape index: {}]  }
   0x1   :  { %v4_v0 = vld [vmem:[%s851_s0] sm:$0xf]  ;;  %s535_s0 = smov 126   ;;  %s538_s10 = smov 120   ;;  %vm409_vm4 = vcmask 15360   ;;  %vm399_vm5 = vcmask 48160  }
   0x2   :  { %5 = vst [vmem:[#allocation0] sm:$0xf] %v4_v0  ;;  %s539_s11 = smov 118   ;;  %s540_s12 = smov 116   ;;  %vm412_vm6 = vcmask 48144  }
   0x3   :  { %s541_s13 = smov 114   ;;  %s542_s14 = smov 112  }
   0x4   :  { %s543_s15 = smov 110   ;;  %s544_s16 = smov 108  }
   0x5   :  { %s545_s17 = smov 106   ;;  %s546_s18 = smov 104  }
   0x6   :  { %s547_s19 = smov 102   ;;  %s548_s20 = smov 100  }
   0x7   :  { %s549_s21 = smov 98   ;;  %s550_s22 = smov 96  }
   0x8   :  { %s551_s23 = smov 94   ;;  %s552_s24 = smov 92  }
   0x9   :  { %v10_v1 = vld [vmem:[#allocation0 + $0x2] sm:$0x1]   ;;  %v23_v2 = vld [vmem:[#allocation0] sm:$0x1]   ;;  %v17_v3 = vld [vmem:[#allocation0 + $0x1] sm:$0x1]  }
   0xa   :  { %11 = vrot.lane.b32.xlu0 %v10_v1, %s535_s0  ;;  %24 = vrot.lane.b32.xlu1 %v23_v2, %s536_s8  ;;  %v30_v4 = vld [vmem:[#allocation0 + $0x2] sm:$0x1]   ;;  %v37_v5 = vld [vmem:[#allocation0 + $0x1] sm:$0x1]   ;;  %v43_v6 = vld [vmem:[#allocation0] sm:$0x1]  }
   0xb   :  { %v50_v7 = vld [vmem:[#allocation0 + $0x2] sm:$0x1]   ;;  %v57_v8 = vld [vmem:[#allocation0 + $0x1] sm:$0x1]   ;;  %v63_v9 = vld [vmem:[#allocation0] sm:$0x1]  }
   0xc   :  { %v70_v10 = vld [vmem:[#allocation0 + $0x2] sm:$0x1]   ;;  %v77_v11 = vld [vmem:[#allocation0 + $0x1] sm:$0x1]   ;;  %v83_v12 = vld [vmem:[#allocation0] sm:$0x1]  }
   0xd   :  { %v90_v13 = vld [vmem:[#allocation0 + $0x2] sm:$0x1]   ;;  %v97_v14 = vld [vmem:[#allocation0 + $0x1] sm:$0x1]   ;;  %v103_v15 = vld [vmem:[#allocation0] sm:$0x1]  }
   0xe   :  { %18 = vrot.lane.b32.xlu0 %v17_v3, %s537_s9  ;;  %31 = vrot.lane.b32.xlu1 %v30_v4, %s538_s10  ;;  %v110_v16 = vld [vmem:[#allocation0 + $0x2] sm:$0x1]   ;;  %v117_v17 = vld [vmem:[#allocation0 + $0x1] sm:$0x1]   ;;  %v123_v18 = vld [vmem:[#allocation0] sm:$0x1]  }
   0xf   :  { %v130_v19 = vld [vmem:[#allocation0 + $0x2] sm:$0x1]   ;;  %v137_v20 = vld [vmem:[#allocation0 + $0x1] sm:$0x1]   ;;  %s553_s25 = smov 90   ;;  %s554_s26 = smov 88  }
  0x10   :  { %v143_v21 = vld [vmem:[#allocation0] sm:$0x1]   ;;  %v150_v22 = vld [vmem:[#allocation0 + $0x2] sm:$0x1]   ;;  %s555_s27 = smov 86   ;;  %s556_s28 = smov 84  }
  0x11   :  { %v157_v23 = vld [vmem:[#allocation0 + $0x1] sm:$0x1]   ;;  %v163_v24 = vld [vmem:[#allocation0] sm:$0x1]   ;;  %s557_s29 = smov 82   ;;  %s558_s30 = smov 80  }
  0x12   :  { %38 = vrot.lane.b32.xlu0 %v37_v5, %s539_s11  ;;  %44 = vrot.lane.b32.xlu1 %v43_v6, %s540_s12  ;;  %v170_v25 = vld [vmem:[#allocation0 + $0x2] sm:$0x1]   ;;  %v177_v26 = vld [vmem:[#allocation0 + $0x1] sm:$0x1]   ;;  %s559_s2 = smov 78   ;;  %s560_s3 = smov 76  }
  0x13   :  { %v183_v27 = vld [vmem:[#allocation0] sm:$0x1]   ;;  %v190_v28 = vld [vmem:[#allocation0 + $0x2] sm:$0x1]   ;;  %s561_s4 = smov 74   ;;  %s562_s5 = smov 72  }
  0x14   :  { %v197_v29 = vld [vmem:[#allocation0 + $0x1] sm:$0x1]   ;;  %v203_v30 = vld [vmem:[#allocation0] sm:$0x1]   ;;  %v391_v32 = vld [vmem:[#allocation0 + $0x2] sm:$0x1]  }
  0x15   :  { %v389_v31 = vld [vmem:[#allocation0 + $0x1] sm:$0x1]   ;;  %v402_v33 = vld [vmem:[#allocation0] sm:$0x1]   ;;  %s563_s6 = smov 70   ;;  %s564_s7 = smov 68  }
  0x16   :  { %51 = vrot.lane.b32.xlu0 %v50_v7, %s541_s13  ;;  %58 = vrot.lane.b32.xlu1 %v57_v8, %s542_s14  ;;  %v404_v34 = vld [vmem:[#allocation0 + $0x1] sm:$0x1]   ;;  %v393_v35 = vsel %vm392_vm0, %v391_v32, %v389_v31  ;;  %s565_s0 = smov 4   ;;  %s566_s8 = smov 2   ;;  %v210_v37 = vld [vmem:[#allocation0 + $0x2] sm:$0x1]  }
  0x17   :  { %v406_v36 = vsel %vm405_vm1, %v404_v34, %v402_v33  ;;  %v217_v38 = vld [vmem:[#allocation0 + $0x1] sm:$0x1]   ;;  %s567_s9 = smov 66   ;;  %s568_s10 = smov 64   ;;  %v223_v39 = vld [vmem:[#allocation0] sm:$0x1]  }
  0x18   :  { %v230_v40 = vld [vmem:[#allocation0 + $0x2] sm:$0x1]   ;;  %s569_s11 = smov 62   ;;  %s570_s12 = smov 60   ;;  %v237_v41 = vld [vmem:[#allocation0 + $0x1] sm:$0x1]  }
  0x19   :  { %v243_v42 = vld [vmem:[#allocation0] sm:$0x1]   ;;  %s571_s13 = smov 58   ;;  %s572_s14 = smov 56   ;;  %v250_v43 = vld [vmem:[#allocation0 + $0x2] sm:$0x1]  }
  0x1a   :  { %64 = vrot.lane.b32.xlu0 %v63_v9, %s543_s15  ;;  %71 = vrot.lane.b32.xlu1 %v70_v10, %s544_s16  ;;  %v257_v44 = vld [vmem:[#allocation0 + $0x1] sm:$0x1]   ;;  %s573_s15 = smov 54   ;;  %s574_s16 = smov 52   ;;  %v263_v45 = vld [vmem:[#allocation0] sm:$0x1]  }
  0x1b   :  { %v270_v46 = vld [vmem:[#allocation0 + $0x2] sm:$0x1]   ;;  %v277_v47 = vld [vmem:[#allocation0 + $0x1] sm:$0x1]   ;;  %v283_v48 = vld [vmem:[#allocation0] sm:$0x1]  }
  0x1c   :  { %v290_v49 = vld [vmem:[#allocation0 + $0x2] sm:$0x1]   ;;  %v297_v50 = vld [vmem:[#allocation0 + $0x1] sm:$0x1]   ;;  %v303_v51 = vld [vmem:[#allocation0] sm:$0x1]  }
  0x1d   :  { %v310_v52 = vld [vmem:[#allocation0 + $0x2] sm:$0x1]   ;;  %v317_v53 = vld [vmem:[#allocation0 + $0x1] sm:$0x1]   ;;  %v323_v54 = vld [vmem:[#allocation0] sm:$0x1]  }
  0x1e   :  { %78 = vrot.lane.b32.xlu0 %v77_v11, %s545_s17  ;;  %84 = vrot.lane.b32.xlu1 %v83_v12, %s546_s18  ;;  %s575_s17 = smov 50   ;;  %s576_s18 = smov 48   ;;  %v330_v55 = vld [vmem:[#allocation0 + $0x2] sm:$0x1]   ;;  %v337_v56 = vld [vmem:[#allocation0 + $0x1] sm:$0x1]  }
  0x1f   :  { %v343_v57 = vld [vmem:[#allocation0] sm:$0x1]   ;;  %v350_v58 = vld [vmem:[#allocation0 + $0x1] sm:$0x1]  }
  0x20   :  { %v6_v59 = vld [vmem:[#allocation0] sm:$0x1]   ;;  %v363_v61 = vld [vmem:[#allocation0 + $0x1] sm:$0x1]  }
  0x21   :  { %8 = vst.msk [vmem:[%s852_s1] sm:$0x1] %vm7_vm2, %v6_v59   ;;  %v356_v60 = vld [vmem:[#allocation0] sm:$0x1]   ;;  %v376_v63 = vld [vmem:[#allocation0 + $0x1] sm:$0x1]  }
  0x22   :  { %91 = vrot.lane.b32.xlu0 %v90_v13, %s547_s19  ;;  %98 = vrot.lane.b32.xlu1 %v97_v14, %s548_s20  ;;  %s577_s19 = smov 46   ;;  %s578_s20 = smov 44   ;;  %v369_v62 = vld [vmem:[#allocation0] sm:$0x1]  }
  0x23   :  { %v382_v0 = vld [vmem:[#allocation0] sm:$0x1]  }
  0x26   :  { %104 = vrot.lane.b32.xlu0 %v103_v15, %s549_s21  ;;  %111 = vrot.lane.b32.xlu1 %v110_v16, %s550_s22  ;;  %s579_s21 = smov 42   ;;  %s580_s22 = smov 40  }
  0x2a   :  { %118 = vrot.lane.b32.xlu0 %v117_v17, %s551_s23  ;;  %124 = vrot.lane.b32.xlu1 %v123_v18, %s552_s24  ;;  %s581_s23 = smov 38   ;;  %s582_s24 = smov 36  }
  0x2e   :  { %131 = vrot.lane.b32.xlu0 %v130_v19, %s553_s25  ;;  %138 = vrot.lane.b32.xlu1 %v137_v20, %s554_s26  ;;  %s583_s25 = smov 34   ;;  %s584_s26 = smov 32  }
  0x32   :  { %144 = vrot.lane.b32.xlu0 %v143_v21, %s555_s27  ;;  %151 = vrot.lane.b32.xlu1 %v150_v22, %s556_s28  ;;  %s585_s27 = smov 30   ;;  %s586_s28 = smov 28  }
  0x36   :  { %158 = vrot.lane.b32.xlu0 %v157_v23, %s557_s29  ;;  %164 = vrot.lane.b32.xlu1 %v163_v24, %s558_s30 }
  0x3a   :  { %171 = vrot.lane.b32.xlu0 %v170_v25, %s559_s2  ;;  %178 = vrot.lane.b32.xlu1 %v177_v26, %s560_s3  ;;  %s587_s2 = smov 26   ;;  %s588_s3 = smov 22  }
  0x3e   :  { %184 = vrot.lane.b32.xlu0 %v183_v27, %s561_s4  ;;  %191 = vrot.lane.b32.xlu1 %v190_v28, %s562_s5  ;;  %s589_s4 = smov 20   ;;  %s590_s5 = smov 16  }
  0x42   :  { %198 = vrot.lane.b32.xlu0 %v197_v29, %s563_s6  ;;  %204 = vrot.lane.b32.xlu1 %v203_v30, %s564_s7  ;;  %s591_s6 = smov 14   ;;  %s592_s7 = smov 10  }
  0x46   :  { %394 = vrot.lane.b32.xlu0 %v393_v35, %s565_s0  ;;  %407 = vrot.lane.b32.xlu1 %v406_v36, %s566_s8 }
  0x4a   :  { %211 = vrot.lane.b32.xlu0 %v210_v37, %s567_s9  ;;  %218 = vrot.lane.b32.xlu1 %v217_v38, %s568_s10 }
  0x4e   :  { %224 = vrot.lane.b32.xlu0 %v223_v39, %s569_s11  ;;  %231 = vrot.lane.b32.xlu1 %v230_v40, %s570_s12  ;;  %s593_s11 = smov 8  }
  0x52   :  { %238 = vrot.lane.b32.xlu0 %v237_v41, %s571_s13  ;;  %244 = vrot.lane.b32.xlu1 %v243_v42, %s572_s14 }
  0x56   :  { %251 = vrot.lane.b32.xlu0 %v250_v43, %s573_s15  ;;  %258 = vrot.lane.b32.xlu1 %v257_v44, %s574_s16 }
  0x5a   :  { %264 = vrot.lane.b32.xlu0 %v263_v45, %s575_s17  ;;  %271 = vrot.lane.b32.xlu1 %v270_v46, %s576_s18 }
  0x5e   :  { %278 = vrot.lane.b32.xlu0 %v277_v47, %s577_s19  ;;  %284 = vrot.lane.b32.xlu1 %v283_v48, %s578_s20 }
  0x62   :  { %291 = vrot.lane.b32.xlu0 %v290_v49, %s579_s21  ;;  %298 = vrot.lane.b32.xlu1 %v297_v50, %s580_s22 }
  0x66   :  { %304 = vrot.lane.b32.xlu0 %v303_v51, %s581_s23  ;;  %311 = vrot.lane.b32.xlu1 %v310_v52, %s582_s24 }
  0x6a   :  { %318 = vrot.lane.b32.xlu0 %v317_v53, %s583_s25  ;;  %324 = vrot.lane.b32.xlu1 %v323_v54, %s584_s26 }
  0x6e   :  { %331 = vrot.lane.b32.xlu0 %v330_v55, %s585_s27  ;;  %338 = vrot.lane.b32.xlu1 %v337_v56, %s586_s28 }
  0x72   :  { %344 = vrot.lane.b32.xlu0 %v343_v57, %s587_s2  ;;  %351 = vrot.lane.b32.xlu1 %v350_v58, %s588_s3 }
  0x76   :  { %357 = vrot.lane.b32.xlu0 %v356_v60, %s589_s4  ;;  %364 = vrot.lane.b32.xlu1 %v363_v61, %s590_s5 }
  0x7a   :  { %370 = vrot.lane.b32.xlu0 %v369_v62, %s591_s6  ;;  %377 = vrot.lane.b32.xlu1 %v376_v63, %s592_s7 }
  0x7c   :  { %v12_v1 = vpop.permute.xlu0 %11   ;;  %v25_v2 = vpop.permute.xlu1 %24  }
  0x7d   :  { %415 = vst.msk [vmem:[%s852_s1 + $0x37] sm:$0x1] %vm7_vm2, %v12_v1   ;;  %417 = vst.msk [vmem:[%s852_s1 + $0x1] sm:$0x1] %vm7_vm2, %v25_v2  }
  0x7e   :  { %383 = vrot.lane.b32.xlu0 %v382_v0, %s593_s11 }
  0x80   :  { %v19_v3 = vpop.permute.xlu0 %18   ;;  %v32_v4 = vpop.permute.xlu1 %31  }
  0x81   :  { %416 = vst.msk [vmem:[%s852_s1 + $0x1a] sm:$0x1] %vm7_vm2, %v19_v3   ;;  %418 = vst.msk [vmem:[%s852_s1 + $0x38] sm:$0x1] %vm7_vm2, %v32_v4  }
  0x84   :  { %v39_v5 = vpop.permute.xlu0 %38   ;;  %v45_v6 = vpop.permute.xlu1 %44  }
  0x85   :  { %419 = vst.msk [vmem:[%s852_s1 + $0x1b] sm:$0x1] %vm7_vm2, %v39_v5   ;;  %420 = vst.msk [vmem:[%s852_s1 + $0x2] sm:$0x1] %vm7_vm2, %v45_v6  }
  0x88   :  { %v52_v7 = vpop.permute.xlu0 %51   ;;  %v59_v8 = vpop.permute.xlu1 %58  }
  0x89   :  { %421 = vst.msk [vmem:[%s852_s1 + $0x39] sm:$0x1] %vm7_vm2, %v52_v7   ;;  %422 = vst.msk [vmem:[%s852_s1 + $0x20] sm:$0x1] %vm7_vm2, %v59_v8  }
  0x8c   :  { %v65_v9 = vpop.permute.xlu0 %64   ;;  %v72_v10 = vpop.permute.xlu1 %71  }
  0x8d   :  { %423 = vst.msk [vmem:[%s852_s1 + $0x3] sm:$0x1] %vm7_vm2, %v65_v9   ;;  %424 = vst.msk [vmem:[%s852_s1 + $0x3a] sm:$0x1] %vm7_vm2, %v72_v10  }
  0x90   :  { %v79_v11 = vpop.permute.xlu0 %78   ;;  %v85_v12 = vpop.permute.xlu1 %84  }
  0x91   :  { %425 = vst.msk [vmem:[%s852_s1 + $0x21] sm:$0x1] %vm7_vm2, %v79_v11   ;;  %426 = vst.msk [vmem:[%s852_s1 + $0x4] sm:$0x1] %vm7_vm2, %v85_v12  }
  0x94   :  { %v92_v13 = vpop.permute.xlu0 %91   ;;  %v99_v14 = vpop.permute.xlu1 %98  }
  0x95   :  { %427 = vst.msk [vmem:[%s852_s1 + $0x3b] sm:$0x1] %vm7_vm2, %v92_v13   ;;  %428 = vst.msk [vmem:[%s852_s1 + $0x22] sm:$0x1] %vm7_vm2, %v99_v14  }
  0x98   :  { %v105_v15 = vpop.permute.xlu0 %104   ;;  %v112_v16 = vpop.permute.xlu1 %111  }
  0x99   :  { %429 = vst.msk [vmem:[%s852_s1 + $0x5] sm:$0x1] %vm7_vm2, %v105_v15   ;;  %430 = vst.msk [vmem:[%s852_s1 + $0x40] sm:$0x1] %vm7_vm2, %v112_v16  }
  0x9c   :  { %v119_v17 = vpop.permute.xlu0 %118   ;;  %v125_v18 = vpop.permute.xlu1 %124  }
  0x9d   :  { %431 = vst.msk [vmem:[%s852_s1 + $0x23] sm:$0x1] %vm7_vm2, %v119_v17   ;;  %432 = vst.msk [vmem:[%s852_s1 + $0x6] sm:$0x1] %vm7_vm2, %v125_v18  }
  0xa0   :  { %v132_v19 = vpop.permute.xlu0 %131   ;;  %v139_v20 = vpop.permute.xlu1 %138  }
  0xa1   :  { %433 = vst.msk [vmem:[%s852_s1 + $0x41] sm:$0x1] %vm7_vm2, %v132_v19   ;;  %434 = vst.msk [vmem:[%s852_s1 + $0x24] sm:$0x1] %vm7_vm2, %v139_v20  }
  0xa4   :  { %v145_v21 = vpop.permute.xlu0 %144   ;;  %v152_v22 = vpop.permute.xlu1 %151  }
  0xa5   :  { %435 = vst.msk [vmem:[%s852_s1 + $0x7] sm:$0x1] %vm7_vm2, %v145_v21   ;;  %436 = vst.msk [vmem:[%s852_s1 + $0x42] sm:$0x1] %vm7_vm2, %v152_v22  }
  0xa8   :  { %v159_v23 = vpop.permute.xlu0 %158   ;;  %v165_v24 = vpop.permute.xlu1 %164  }
  0xa9   :  { %437 = vst.msk [vmem:[%s852_s1 + $0x25] sm:$0x1] %vm7_vm2, %v159_v23   ;;  %438 = vst.msk [vmem:[%s852_s1 + $0x8] sm:$0x1] %vm7_vm2, %v165_v24  }
  0xac   :  { %v172_v25 = vpop.permute.xlu0 %171   ;;  %v179_v26 = vpop.permute.xlu1 %178  }
  0xad   :  { %439 = vst.msk [vmem:[%s852_s1 + $0x43] sm:$0x1] %vm7_vm2, %v172_v25   ;;  %440 = vst.msk [vmem:[%s852_s1 + $0x26] sm:$0x1] %vm7_vm2, %v179_v26  }
  0xb0   :  { %v185_v27 = vpop.permute.xlu0 %184   ;;  %v192_v28 = vpop.permute.xlu1 %191  }
  0xb1   :  { %441 = vst.msk [vmem:[%s852_s1 + $0x9] sm:$0x1] %vm7_vm2, %v185_v27   ;;  %442 = vst.msk [vmem:[%s852_s1 + $0x44] sm:$0x1] %vm7_vm2, %v192_v28  }
  0xb4   :  { %v199_v29 = vpop.permute.xlu0 %198   ;;  %v205_v30 = vpop.permute.xlu1 %204  }
  0xb5   :  { %443 = vst.msk [vmem:[%s852_s1 + $0x27] sm:$0x1] %vm7_vm2, %v199_v29   ;;  %444 = vst.msk [vmem:[%s852_s1 + $0xa] sm:$0x1] %vm7_vm2, %v205_v30  }
  0xb8   :  { %v395_v31 = vpop.permute.xlu0 %394   ;;  %v408_v32 = vpop.permute.xlu1 %407  }
  0xb9   :  { %472 = vst.msk [vmem:[%s852_s1 + $0x36] sm:$0x1] %vm396_vm3, %v395_v31  }
  0xba   :  { %474 = vst.msk [vmem:[%s852_s1 + $0x19] sm:$0x1] %vm409_vm4, %v408_v32  }
  0xbb   :  { %473 = vst.msk [vmem:[%s852_s1 + $0x36] sm:$0x1] %vm399_vm5, %v395_v31  }
  0xbc   :  { %475 = vst.msk [vmem:[%s852_s1 + $0x19] sm:$0x1] %vm412_vm6, %v408_v32   ;;  %v212_v33 = vpop.permute.xlu0 %211   ;;  %v219_v34 = vpop.permute.xlu1 %218  }
  0xbd   :  { %445 = vst.msk [vmem:[%s852_s1 + $0x45] sm:$0x1] %vm7_vm2, %v212_v33   ;;  %446 = vst.msk [vmem:[%s852_s1 + $0x28] sm:$0x1] %vm7_vm2, %v219_v34  }
  0xc0   :  { %v225_v35 = vpop.permute.xlu0 %224   ;;  %v232_v36 = vpop.permute.xlu1 %231  }
  0xc1   :  { %447 = vst.msk [vmem:[%s852_s1 + $0xb] sm:$0x1] %vm7_vm2, %v225_v35   ;;  %448 = vst.msk [vmem:[%s852_s1 + $0x46] sm:$0x1] %vm7_vm2, %v232_v36  }
  0xc4   :  { %v239_v37 = vpop.permute.xlu0 %238   ;;  %v245_v38 = vpop.permute.xlu1 %244  }
  0xc5   :  { %449 = vst.msk [vmem:[%s852_s1 + $0x29] sm:$0x1] %vm7_vm2, %v239_v37   ;;  %450 = vst.msk [vmem:[%s852_s1 + $0x10] sm:$0x1] %vm7_vm2, %v245_v38  }
  0xc8   :  { %v252_v39 = vpop.permute.xlu0 %251   ;;  %v259_v40 = vpop.permute.xlu1 %258  }
  0xc9   :  { %451 = vst.msk [vmem:[%s852_s1 + $0x47] sm:$0x1] %vm7_vm2, %v252_v39   ;;  %452 = vst.msk [vmem:[%s852_s1 + $0x2a] sm:$0x1] %vm7_vm2, %v259_v40  }
  0xcc   :  { %v265_v41 = vpop.permute.xlu0 %264   ;;  %v272_v42 = vpop.permute.xlu1 %271  }
  0xcd   :  { %453 = vst.msk [vmem:[%s852_s1 + $0x11] sm:$0x1] %vm7_vm2, %v265_v41   ;;  %454 = vst.msk [vmem:[%s852_s1 + $0x48] sm:$0x1] %vm7_vm2, %v272_v42  }
  0xd0   :  { %v279_v43 = vpop.permute.xlu0 %278   ;;  %v285_v44 = vpop.permute.xlu1 %284  }
  0xd1   :  { %455 = vst.msk [vmem:[%s852_s1 + $0x2b] sm:$0x1] %vm7_vm2, %v279_v43   ;;  %456 = vst.msk [vmem:[%s852_s1 + $0x12] sm:$0x1] %vm7_vm2, %v285_v44  }
  0xd4   :  { %v292_v45 = vpop.permute.xlu0 %291   ;;  %v299_v46 = vpop.permute.xlu1 %298  }
  0xd5   :  { %457 = vst.msk [vmem:[%s852_s1 + $0x49] sm:$0x1] %vm7_vm2, %v292_v45   ;;  %458 = vst.msk [vmem:[%s852_s1 + $0x30] sm:$0x1] %vm7_vm2, %v299_v46  }
  0xd8   :  { %v305_v47 = vpop.permute.xlu0 %304   ;;  %v312_v48 = vpop.permute.xlu1 %311  }
  0xd9   :  { %459 = vst.msk [vmem:[%s852_s1 + $0x13] sm:$0x1] %vm7_vm2, %v305_v47   ;;  %460 = vst.msk [vmem:[%s852_s1 + $0x4a] sm:$0x1] %vm7_vm2, %v312_v48  }
  0xdc   :  { %v319_v49 = vpop.permute.xlu0 %318   ;;  %v325_v50 = vpop.permute.xlu1 %324  }
  0xdd   :  { %461 = vst.msk [vmem:[%s852_s1 + $0x31] sm:$0x1] %vm7_vm2, %v319_v49   ;;  %462 = vst.msk [vmem:[%s852_s1 + $0x14] sm:$0x1] %vm7_vm2, %v325_v50  }
  0xe0   :  { %v332_v51 = vpop.permute.xlu0 %331   ;;  %v339_v52 = vpop.permute.xlu1 %338  }
  0xe1   :  { %463 = vst.msk [vmem:[%s852_s1 + $0x4b] sm:$0x1] %vm7_vm2, %v332_v51   ;;  %464 = vst.msk [vmem:[%s852_s1 + $0x32] sm:$0x1] %vm7_vm2, %v339_v52  }
  0xe4   :  { %v345_v53 = vpop.permute.xlu0 %344   ;;  %v352_v54 = vpop.permute.xlu1 %351  }
  0xe5   :  { %465 = vst.msk [vmem:[%s852_s1 + $0x15] sm:$0x1] %vm7_vm2, %v345_v53   ;;  %466 = vst.msk [vmem:[%s852_s1 + $0x33] sm:$0x1] %vm7_vm2, %v352_v54  }
  0xe8   :  { %v358_v55 = vpop.permute.xlu0 %357   ;;  %v365_v56 = vpop.permute.xlu1 %364  }
  0xe9   :  { %467 = vst.msk [vmem:[%s852_s1 + $0x16] sm:$0x1] %vm7_vm2, %v358_v55   ;;  %468 = vst.msk [vmem:[%s852_s1 + $0x34] sm:$0x1] %vm7_vm2, %v365_v56  }
  0xec   :  { %v371_v57 = vpop.permute.xlu0 %370   ;;  %v378_v58 = vpop.permute.xlu1 %377  }
  0xed   :  { %469 = vst.msk [vmem:[%s852_s1 + $0x17] sm:$0x1] %vm7_vm2, %v371_v57   ;;  %470 = vst.msk [vmem:[%s852_s1 + $0x35] sm:$0x1] %vm7_vm2, %v378_v58  }
  0xf0   :  { %v384_v59 = vpop.permute.xlu0 %383  }
  0xf1   :  { %471 = vst.msk [vmem:[%s852_s1 + $0x18] sm:$0x1] %vm7_vm2, %v384_v59  }

// kernel: social_stgcnn_forward.1
= control target key start
LH: loop header
LB: loop body
LE: loop exit
PB: predicated region body
PF: predicated region fallthrough
CT: control target
= control target key end

     0   :  { %14 = vsyncpa [#allocation3], 0  ;;  %s7023_s0 = inlined_call_operand.vmem [shape: f32[8,96], index: 0, kind: input, shape index: {}]   ;;  %s7024_s1 = inlined_call_operand.vmem [shape: bf16[96,96], index: 1, kind: input, shape index: {}]   ;;  %s7025_s2 = inlined_call_operand.vmem [shape: f32[1,360], index: 2, kind: input, shape index: {}]   ;;  %s7026_s3 = inlined_call_operand.vmem [shape: f32[16,64], index: 3, kind: input, shape index: {}]   ;;  %s7027_s4 = inlined_call_operand.hbm [shape: bf16[2,96,360], index: 4, kind: input, shape index: {}]   ;;  %s7028_s5 = inlined_call_operand.hbm [shape: bf16[6,360,360], index: 5, kind: input, shape index: {}]   ;;  %s7029_s6 = inlined_call_operand.hbm [shape: bf16[2,64,360], index: 6, kind: input, shape index: {}]   ;;  %s7030_s7 = inlined_call_operand.hbm [shape: f32[8,360], index: 7, kind: input, shape index: {}]   ;;  %s7031_s8 = inlined_call_operand.hbm [shape: f32[8], index: 8, kind: input, shape index: {}]   ;;  %s7032_s9 = inlined_call_operand.vmem [shape: f32[8,360], index: 9, kind: output, shape index: {}]  }
   0x1   :  { %15 = vsyncpa [#allocation6], 0 }
   0x2   :  { %16 = vsyncpa [#allocation9], 0 }
   0x3   :  { %17 = vsyncpa [#allocation4], 0  ;;  %s6604_s30 = smov [#allocation5]   ;;  %s6605_s11 = smov [#allocation2]  }
   0x4   :  { %s43_s10 = sshll.u32 %s6604_s30, 4  ;;  %s31_s12 = sshll.u32 %s6605_s11, 4  ;;  %s44_s10 = int_to_ptr.vmem [resolvable:$true] %s43_s10  ;;  %s6664_s12 = int_to_ptr.vmem [resolvable:$true] %s31_s12 }
   0x5   :  { %s6498_s15 = scalar_lea.hbm %s7028_s5, 51840 }
   0x6   :  { %p6499_p0 = scmp.ne.s32.totalorder %s7028_s5, %s6498_s15  ;;  %p6502_p1 = scmp.lt.u32.totalorder %s6498_s15, %s7028_s5 }
   0x8   :  { %p6504_p2 = pnand %p6502_p1, %p6499_p0 }
   0xa   :  { %6507 = shalt.err (!%p6504_p2)
}
   0xb   :  { %s6508_s20 = scalar_lea.vmem %s44_s10, 51840  ;;  %p6513_p4 = scmp.lt.s32.totalorder %s44_s10, %s44_s10 }
   0xc   :  { %p6509_p3 = scmp.ne.s32.totalorder %s44_s10, %s6508_s20  ;;  %p6514_p5 = scmp.lt.s32.totalorder %s6508_s20, %s6508_s20 }
   0xe   :  { %p6515_p6 = por %p6514_p5, %p6513_p4 }
  0x10   :  { %p6516_p7 = pnand %p6515_p6, %p6509_p3 }
  0x12   :  { %6519 = shalt.err (!%p6516_p7)
}
  0x13   :  { %s6606_s21 = smov 192   ;;  %s6607_s22 = smov 12  }
  0x14   :  { %49 = dma.hbm_to_vmem [thread:$0]  %s7028_s5, 51840, %s44_s10, [#allocation6], %s6606_s21, %s6606_s21, %s6607_s22  }
  0x15   :  { %s6520_s27 = scalar_lea.hbm %s7027_s4, 4608 }
  0x16   :  { %p6521_p8 = scmp.ne.s32.totalorder %s7027_s4, %s6520_s27  ;;  %p6524_p9 = scmp.lt.u32.totalorder %s6520_s27, %s7027_s4 }
  0x18   :  { %p6526_p10 = pnand %p6524_p9, %p6521_p8 }
  0x1a   :  { %6529 = shalt.err (!%p6526_p10)
}
  0x1b   :  { %s6530_s13 = scalar_lea.vmem %s6664_s12, 4608  ;;  %p6535_p12 = scmp.lt.s32.totalorder %s6664_s12, %s6664_s12 }
  0x1c   :  { %p6531_p11 = scmp.ne.s32.totalorder %s6664_s12, %s6530_s13  ;;  %p6536_p13 = scmp.lt.s32.totalorder %s6530_s13, %s6530_s13 }
  0x1e   :  { %p6537_p0 = por %p6536_p13, %p6535_p12 }
  0x20   :  { %p6538_p1 = pnand %p6537_p0, %p6531_p11 }
  0x22   :  { %6541 = shalt.err (!%p6538_p1)
}
  0x23   :  { %37 = dma.hbm_to_vmem [thread:$0]  %s7027_s4, 4608, %s6664_s12, [#allocation3], %s6606_s21, %s6606_s21, %s6607_s22  }
  0x24   :  { %s6608_s14 = smov [#allocation7]   ;;  %s6609_s16 = smov [#allocation8]  }
  0x25   :  { %s55_s15 = sshll.u32 %s6608_s14, 4  ;;  %s68_s17 = sshll.u32 %s6609_s16, 4  ;;  %s56_s15 = int_to_ptr.vmem [resolvable:$true] %s55_s15  ;;  %s69_s17 = int_to_ptr.vmem [resolvable:$true] %s68_s17 }
  0x26   :  { %s6542_s20 = scalar_lea.hbm %s7029_s6, 3072 }
  0x27   :  { %p6543_p2 = scmp.ne.s32.totalorder %s7029_s6, %s6542_s20  ;;  %p6546_p3 = scmp.lt.u32.totalorder %s6542_s20, %s7029_s6 }
  0x29   :  { %p6548_p4 = pnand %p6546_p3, %p6543_p2 }
  0x2b   :  { %6551 = shalt.err (!%p6548_p4)
}
  0x2c   :  { %s6552_s4 = scalar_lea.vmem %s56_s15, 3072  ;;  %p6557_p6 = scmp.lt.s32.totalorder %s56_s15, %s56_s15 }
  0x2d   :  { %p6553_p5 = scmp.ne.s32.totalorder %s56_s15, %s6552_s4  ;;  %p6558_p7 = scmp.lt.s32.totalorder %s6552_s4, %s6552_s4 }
  0x2f   :  { %p6559_p8 = por %p6558_p7, %p6557_p6 }
  0x31   :  { %p6560_p9 = pnand %p6559_p8, %p6553_p5 }
  0x33   :  { %6563 = shalt.err (!%p6560_p9)
}
  0x34   :  { %61 = dma.hbm_to_vmem [thread:$0]  %s7029_s6, 3072, %s56_s15, [#allocation6], %s6606_s21, %s6606_s21, %s6607_s22  }
  0x35   :  { %s6564_s30 = scalar_lea.hbm %s7030_s7, 384 }
  0x36   :  { %p6565_p10 = scmp.ne.s32.totalorder %s7030_s7, %s6564_s30  ;;  %p6568_p11 = scmp.lt.u32.totalorder %s6564_s30, %s7030_s7 }
  0x38   :  { %p6570_p12 = pnand %p6568_p11, %p6565_p10 }
  0x3a   :  { %6573 = shalt.err (!%p6570_p12)
}
  0x3b   :  { %s6574_s14 = scalar_lea.vmem %s69_s17, 384  ;;  %p6579_p0 = scmp.lt.s32.totalorder %s69_s17, %s69_s17 }
  0x3c   :  { %p6575_p13 = scmp.ne.s32.totalorder %s69_s17, %s6574_s14  ;;  %p6580_p1 = scmp.lt.s32.totalorder %s6574_s14, %s6574_s14 }
  0x3e   :  { %p6581_p2 = por %p6580_p1, %p6579_p0 }
  0x40   :  { %p6582_p3 = pnand %p6581_p2, %p6575_p13 }
  0x42   :  { %6585 = shalt.err (!%p6582_p3)
}
  0x43   :  { %71 = dma.hbm_to_vmem [thread:$0]  %s7030_s7, 384, %s69_s17, [#allocation9]  }
  0x44   :  { %s6586_s16 = scalar_lea.hbm %s7031_s8, 16 }
  0x45   :  { %p6587_p4 = scmp.ne.s32.totalorder %s7031_s8, %s6586_s16  ;;  %p6590_p5 = scmp.lt.u32.totalorder %s6586_s16, %s7031_s8 }
  0x47   :  { %p6592_p6 = pnand %p6590_p5, %p6587_p4 }
  0x49   :  { %6595 = shalt.err (!%p6592_p6)
}
  0x4a   :  { %s6610_s24 = smov [#allocation10]  }
  0x4b   :  { %79 = dma.hbm_to_smem %s7031_s8, 16, %s6610_s24, [#allocation4]  }
  0x4c   :  { %6596 = dma.done.wait [#allocation3], 4608  }
  0x4d   :  { %6597 = vsyncadd [#allocation3], 4294962688 }
  0x4e   :  { %6598 = dma.done.wait [#allocation6], 54912  }
  0x4f   :  { %6599 = vsyncadd [#allocation6], 4294912384 }
  0x50   :  { %6600 = dma.done.wait [#allocation9], 384  }
  0x51   :  { %6601 = vsyncadd [#allocation9], 4294966912 }
  0x52   :  { %6602 = dma.done.wait [#allocation4], 16  }
  0x53   :  { %6603 = vsyncadd [#allocation4], 4294967280 }
  0x54   :  { %95 = sfence }
  0x55   :  { %v5866_v0 = vld [vmem:[#allocation2 + $0x4] ss:$12 sps:$4 sm:$0xff]   ;;  %v5868_v1 = vld [vmem:[#allocation2] ss:$12 sps:$4 sm:$0xff]   ;;  %v6611_v2 = vmov 0   ;;  %v6612_v3 = vmov 0.0  }
  0x56   :  { %272 = vmatprep.mubr.bf16.mxu0 %v6611_v2  ;;  %5640 = vmatprep.subr.bf16.mxu1 %v6612_v3  ;;  %v5869_v4 = vld [vmem:[#allocation2 + $0x1c] ss:$12 sps:$4 sm:$0xff]   ;;  %vm6613_vm0 = vmmov 0   ;;  %v5871_v5 = vld [vmem:[#allocation2 + $0x18] ss:$12 sps:$4 sm:$0xff]   ;;  %vm236_vm1 = vcmask 785408  }
  0x57   :  { %240 = vmatprep.subr.bf16.mxu0 %v5866_v0  ;;  %5652 = vmatprep.mubr.msk.bf16.mxu1 %vm6613_vm0, %v6612_v3  ;;  %v5872_v6 = vld [vmem:[#allocation2 + $0x34] ss:$12 sps:$4 sm:$0xff]   ;;  %v5874_v7 = vld [vmem:[#allocation2 + $0x30] ss:$12 sps:$4 sm:$0xff]   ;;  %v5875_v8 = vld [vmem:[#allocation2 + $0x4c] ss:$12 sps:$4 sm:$0xff]  }
  0x58   :  { %241 = vmatpush1.bf16.msra.mxu0 %v5868_v1  ;;  %v5877_v9 = vld [vmem:[#allocation2 + $0x48] ss:$12 sps:$4 sm:$0xff]   ;;  %v5878_v10 = vld [vmem:[#allocation2 + $0x64] ss:$12 sps:$4 sm:$0xff]   ;;  %v5880_v11 = vld [vmem:[#allocation2 + $0x60] ss:$12 sps:$4 sm:$0xff]  }
  0x59   :  { %242 = vmatprep.subr.bf16.mxu0 %v5869_v4  ;;  %v5890_v12 = vld [vmem:[#allocation2 + $0x8] ss:$12 sps:$4 sm:$0xff]   ;;  %v5891_v14 = vld [vmem:[#allocation2 + $0x20] ss:$12 sps:$4 sm:$0xff]   ;;  %v5883_v15 = vld [vmem:[#allocation2 + $0x78] ss:$12 sps:$4 sm:$0xff]  }
  0x5a   :  { %v5881_v13 = vld [vmem:[#allocation2 + $0x7c] ss:$12 sps:$4 sm:$0xff]   ;;  %5641 = vmatpush3.bf16.msra.mxu1 %v5890_v12  ;;  %v97_v16 = vld [vmem:[%s7023_s0] sm:$0xff]  ;;  %v5886_v23 = vld [vmem:[%s7024_s1 + $0x10] sm:$0xff]   ;;  %vm1118_vm4 = vcmask 1043456   ;;  %vm1114_vm6 = vcmask 850944  }
  0x5b   :  { %5642 = vmatprep.subr.bf16.mxu1 %v6612_v3  ;;  %v5892_v17 = vld [vmem:[#allocation2 + $0x38] ss:$12 sps:$4 sm:$0xff]   ;;  %v122_v18 = vpack.c.bf16 %v97_v16, %v97_v16  ;;  %v5893_v20 = vld [vmem:[#allocation2 + $0x50] ss:$12 sps:$4 sm:$0xff]   ;;  %v5885_v21 = vld [vmem:[%s7024_s1 + $0x8] sm:$0xff]   ;;  %vm1480_vm7 = vcmask 523264  }
  0x5c   :  { %243 = vmatpush1.bf16.msra.mxu0 %v5871_v5  ;;  %v5884_v19 = vld [vmem:[%s7024_s1] sm:$0xff]   ;;  %v5894_v22 = vld [vmem:[#allocation2 + $0x68] ss:$12 sps:$4 sm:$0xff]   ;;  %v5887_v25 = vld [vmem:[%s7024_s1 + $0x18] sm:$0xff]   ;;  %s5037_s22 = sld [smem:[#allocation10 + $0x1]]  ;;  %s5124_s15 = sld [smem:[#allocation10 + $0x2]] }
  0x5d   :  { %244 = vmatprep.subr.bf16.mxu0 %v5872_v6  ;;  %v5895_v24 = vld [vmem:[#allocation2 + $0x80] ss:$12 sps:$4 sm:$0xff]   ;;  %v5896_v27 = vld [vmem:[#allocation2 + $0x90] ss:$12 sps:$4 sm:$0xff]   ;;  %v5900_v30 = vld [vmem:[#allocation2 + $0xa8] ss:$12 sps:$4 sm:$0xff]  }
  0x5e   :  { %5643 = vmatpush3.bf16.msra.mxu1 %v5891_v14  ;;  %v5898_v26 = vld [vmem:[#allocation2 + $0x94] ss:$12 sps:$4 sm:$0xff]   ;;  %v5902_v28 = vld [vmem:[#allocation2 + $0xac] ss:$12 sps:$4 sm:$0xff]   ;;  %v5906_v31 = vld [vmem:[#allocation2 + $0xc4] ss:$12 sps:$4 sm:$0xff]  }
  0x5f   :  { %5644 = vmatprep.subr.bf16.mxu1 %v6612_v3  ;;  %v5888_v29 = vld [vmem:[%s7024_s1 + $0x20] sm:$0xff]   ;;  %v5889_v32 = vld [vmem:[%s7024_s1 + $0x28] sm:$0xff]   ;;  %v5903_v38 = vld [vmem:[#allocation2 + $0xb0] ss:$12 sps:$4 sm:$0xff]   ;;  %s632_s1 = sld [smem:[#allocation10]]  ;;  %s5197_s16 = sld [smem:[#allocation10 + $0x3]] }
  0x60   :  { %245 = vmatpush1.bf16.msra.mxu0 %v5874_v7  ;;  %v5904_v33 = vld [vmem:[#allocation2 + $0xc0] ss:$12 sps:$4 sm:$0xff]   ;;  %v5910_v34 = vld [vmem:[#allocation2 + $0xdc] ss:$12 sps:$4 sm:$0xff]   ;;  %v5899_v35 = vld [vmem:[#allocation2 + $0x98] ss:$12 sps:$4 sm:$0xff]  }
  0x61   :  { %246 = vmatprep.subr.bf16.mxu0 %v5875_v8  ;;  %v5908_v36 = vld [vmem:[#allocation2 + $0xd8] ss:$12 sps:$4 sm:$0xff]   ;;  %v5914_v37 = vld [vmem:[#allocation2 + $0xf4] ss:$12 sps:$4 sm:$0xff]   ;;  %v5912_v39 = vld [vmem:[#allocation2 + $0xf0] ss:$12 sps:$4 sm:$0xff]  }
  0x62   :  { %5645 = vmatpush3.bf16.msra.mxu1 %v5892_v17  ;;  %v5918_v40 = vld [vmem:[#allocation2 + $0x10c] ss:$12 sps:$4 sm:$0xff]   ;;  %v5907_v41 = vld [vmem:[#allocation2 + $0xc8] ss:$12 sps:$4 sm:$0xff]   ;;  %v5919_v45 = vld [vmem:[#allocation2 + $0x110] ss:$12 sps:$4 sm:$0xff]  }
  0x63   :  { %5646 = vmatprep.subr.bf16.mxu1 %v6612_v3  ;;  %v5916_v42 = vld [vmem:[#allocation2 + $0x108] ss:$12 sps:$4 sm:$0xff]   ;;  %v5911_v43 = vld [vmem:[#allocation2 + $0xe0] ss:$12 sps:$4 sm:$0xff]   ;;  %v5915_v44 = vld [vmem:[#allocation2 + $0xf8] ss:$12 sps:$4 sm:$0xff]  }
  0x64   :  { %247 = vmatpush1.bf16.msra.mxu0 %v5877_v9  ;;  %v5922_v46 = vld [vmem:[#allocation5 + $0x4] ss:$12 sps:$4 sm:$0xff]   ;;  %v5947_v47 = vld [vmem:[#allocation5 + $0xc8] ss:$12 sps:$4 sm:$0xff]   ;;  %v5920_v49 = vld [vmem:[#allocation5] ss:$12 sps:$4 sm:$0xff]  }
  0x65   :  { %248 = vmatprep.subr.bf16.mxu0 %v5878_v10  ;;  %v5948_v50 = vld [vmem:[#allocation5 + $0x8] ss:$12 sps:$4 sm:$0xff]   ;;  %v5952_v54 = vld [vmem:[#allocation5 + $0xe0] ss:$12 sps:$4 sm:$0xff]   ;;  %v5923_v57 = vld [vmem:[#allocation5 + $0x18] ss:$12 sps:$4 sm:$0xff]  }
  0x66   :  { %5647 = vmatpush3.bf16.msra.mxu1 %v5893_v20  ;;  %v5925_v53 = vld [vmem:[#allocation5 + $0x1c] ss:$12 sps:$4 sm:$0xff]   ;;  %v5953_v58 = vld [vmem:[#allocation5 + $0x20] ss:$12 sps:$4 sm:$0xff]   ;;  %v5957_v60 = vld [vmem:[#allocation5 + $0xf8] ss:$12 sps:$4 sm:$0xff]  }
  0x67   :  { %5648 = vmatprep.subr.bf16.mxu1 %v6612_v3  ;;  %v5928_v59 = vld [vmem:[#allocation5 + $0x34] ss:$12 sps:$4 sm:$0xff]   ;;  %v5926_v61 = vld [vmem:[#allocation5 + $0x30] ss:$12 sps:$4 sm:$0xff]   ;;  %v5958_v62 = vld [vmem:[#allocation5 + $0x38] ss:$12 sps:$4 sm:$0xff]  }
  0x68   :  { %249 = vmatpush1.bf16.msra.mxu0 %v5880_v11  ;;  %v5931_v63 = vld [vmem:[#allocation5 + $0x4c] ss:$12 sps:$4 sm:$0xff]   ;;  %v5962_v0 = vld [vmem:[#allocation5 + $0x110] ss:$12 sps:$4 sm:$0xff]   ;;  %v5929_v1 = vld [vmem:[#allocation5 + $0x48] ss:$12 sps:$4 sm:$0xff]  }
  0x69   :  { %250 = vmatprep.subr.bf16.mxu0 %v5881_v13  ;;  %v5963_v4 = vld [vmem:[#allocation5 + $0x50] ss:$12 sps:$4 sm:$0xff]   ;;  %v5967_v6 = vld [vmem:[#allocation5 + $0x128] ss:$12 sps:$4 sm:$0xff]   ;;  %v5932_v7 = vld [vmem:[#allocation5 + $0x60] ss:$12 sps:$4 sm:$0xff]  }
  0x6a   :  { %5649 = vmatpush3.bf16.msra.mxu1 %v5894_v22  ;;  %v5934_v5 = vld [vmem:[#allocation5 + $0x64] ss:$12 sps:$4 sm:$0xff]   ;;  %v5968_v8 = vld [vmem:[#allocation5 + $0x68] ss:$12 sps:$4 sm:$0xff]   ;;  %v5972_v10 = vld [vmem:[#allocation5 + $0x140] ss:$12 sps:$4 sm:$0xff]  }
  0x6b   :  { %5650 = vmatprep.subr.bf16.mxu1 %v6612_v3  ;;  %v5937_v9 = vld [vmem:[#allocation5 + $0x7c] ss:$12 sps:$4 sm:$0xff]   ;;  %v5935_v11 = vld [vmem:[#allocation5 + $0x78] ss:$12 sps:$4 sm:$0xff]   ;;  %v5973_v12 = vld [vmem:[#allocation5 + $0x80] ss:$12 sps:$4 sm:$0xff]  }
  0x6c   :  { %251 = vmatpush1.bf16.msra.mxu0 %v5883_v15  ;;  %v5940_v13 = vld [vmem:[#allocation5 + $0x94] ss:$12 sps:$4 sm:$0xff]   ;;  %v5938_v14 = vld [vmem:[#allocation5 + $0x90] ss:$12 sps:$4 sm:$0xff]   ;;  %v5943_v15 = vld [vmem:[#allocation5 + $0xac] ss:$12 sps:$4 sm:$0xff]  }
  0x6d   :  { %5656 = vmatprep.subr.bf16.mxu0 %v6612_v3  ;;  %v5941_v16 = vld [vmem:[#allocation5 + $0xa8] ss:$12 sps:$4 sm:$0xff]   ;;  %v5946_v17 = vld [vmem:[#allocation5 + $0xc4] ss:$12 sps:$4 sm:$0xff]  }
  0x6e   :  { %5651 = vmatpush3.bf16.msra.mxu1 %v5895_v24  ;;  %v5949_v20 = vld [vmem:[#allocation5 + $0xd8] ss:$12 sps:$4 sm:$0xff]   ;;  %v5954_v22 = vld [vmem:[#allocation5 + $0xf0] ss:$12 sps:$4 sm:$0xff]   ;;  %v5959_v24 = vld [vmem:[#allocation5 + $0x108] ss:$12 sps:$4 sm:$0xff]  }
  0x6f   :  { %4936 = vmatmul.mubr.msk.bf16.vlgmr.msra.gmra.mrb[0].mxu0 %vm236_vm1, %v122_v18  ;;  %551 = vmatprep.subr.bf16.mxu1 %v5898_v26  ;;  %v5964_v26 = vld [vmem:[#allocation5 + $0x120] ss:$12 sps:$4 sm:$0xff]  }
  0x70   :  { %5657 = vmatpush3.bf16.msra.mxu0 %v5884_v19  ;;  %5668 = vmatprep.mubr.msk.bf16.mxu0 %vm6613_vm0, %v6612_v3  ;;  %v5951_v19 = vld [vmem:[#allocation5 + $0xdc] ss:$12 sps:$4 sm:$0xff]  }
  0x71   :  { %5658 = vmatprep.subr.bf16.mxu0 %v6612_v3  ;;  %5653 = vmatmul.mubr.msk.bf16.vlgmr.msra.gmra.mrb[0].mxu1 %vm236_vm1, %v122_v18 }
  0x72   :  { %552 = vmatpush1.bf16.msra.mxu1 %v5896_v27  ;;  %583 = vmatprep.mubr.bf16.mxu1 %v6611_v2  ;;  %v5971_v27 = vld [vmem:[#allocation5 + $0x13c] ss:$12 sps:$4 sm:$0xff]  }
  0x73   :  { %553 = vmatprep.subr.bf16.mxu1 %v5902_v28  ;;  %v5969_v28 = vld [vmem:[#allocation5 + $0x138] ss:$12 sps:$4 sm:$0xff]  }
  0x74   :  { %5659 = vmatpush3.bf16.msra.mxu0 %v5885_v21  ;;  %v5956_v21 = vld [vmem:[#allocation5 + $0xf4] ss:$12 sps:$4 sm:$0xff]  }
  0x75   :  { %5660 = vmatprep.subr.bf16.mxu0 %v6612_v3 }
  0x76   :  { %554 = vmatpush1.bf16.msra.mxu1 %v5900_v30  ;;  %v5977_v30 = vld [vmem:[#allocation5 + $0x158] ss:$12 sps:$4 sm:$0xff]  }
  0x77   :  { %555 = vmatprep.subr.bf16.mxu1 %v5906_v31  ;;  %v5974_v31 = vld [vmem:[#allocation5 + $0x150] ss:$12 sps:$4 sm:$0xff]  }
  0x78   :  { %5661 = vmatpush3.bf16.msra.mxu0 %v5886_v23  ;;  %v5961_v23 = vld [vmem:[#allocation5 + $0x10c] ss:$12 sps:$4 sm:$0xff]  }
  0x79   :  { %5662 = vmatprep.subr.bf16.mxu0 %v6612_v3 }
  0x7a   :  { %556 = vmatpush1.bf16.msra.mxu1 %v5904_v33  ;;  %v5981_v33 = vld [vmem:[#allocation5 + $0x16c] ss:$12 sps:$4 sm:$0xff]  }
  0x7b   :  { %557 = vmatprep.subr.bf16.mxu1 %v5910_v34  ;;  %v5982_v34 = vld [vmem:[#allocation5 + $0x170] ss:$12 sps:$4 sm:$0xff]  }
  0x7c   :  { %5663 = vmatpush3.bf16.msra.mxu0 %v5887_v25  ;;  %v5966_v25 = vld [vmem:[#allocation5 + $0x124] ss:$12 sps:$4 sm:$0xff]  }
  0x7d   :  { %5664 = vmatprep.subr.bf16.mxu0 %v6612_v3 }
  0x7e   :  { %558 = vmatpush1.bf16.msra.mxu1 %v5908_v36  ;;  %v5983_v36 = vld [vmem:[#allocation5 + $0xb0] ss:$12 sps:$4 sm:$0xff]  }
  0x7f   :  { %559 = vmatprep.subr.bf16.mxu1 %v5914_v37  ;;  %v5986_v37 = vld [vmem:[#allocation5 + $0x184] ss:$12 sps:$4 sm:$0xff]  }
  0x80   :  { %5665 = vmatpush3.bf16.msra.mxu0 %v5888_v29  ;;  %v5976_v29 = vld [vmem:[#allocation5 + $0x154] ss:$12 sps:$4 sm:$0xff]  }
  0x81   :  { %5666 = vmatprep.subr.bf16.mxu0 %v6612_v3 }
  0x82   :  { %560 = vmatpush1.bf16.msra.mxu1 %v5912_v39 }
  0x83   :  { %561 = vmatprep.subr.bf16.mxu1 %v5918_v40 }
  0x84   :  { %5667 = vmatpush3.bf16.msra.mxu0 %v5889_v32  ;;  %v5978_v32 = vld [vmem:[#allocation5 + $0x98] ss:$12 sps:$4 sm:$0xff]  }
  0x85   :  { %5672 = vmatprep.subr.bf16.mxu0 %v6612_v3 }
  0x86   :  { %562 = vmatpush1.bf16.msra.mxu1 %v5916_v42 }
  0x87   :  { %5669 = vmatmul.mubr.msk.bf16.vlgmr.msra.gmra.mrb[4].mxu0 %vm236_vm1, %v122_v18  ;;  %5450 = vmatprep.subr.bf16.mxu1 %v5947_v47  ;;  %v5944_v18 = vld [vmem:[#allocation5 + $0xc0] ss:$12 sps:$4 sm:$0xff]  }
  0x88   :  { %5673 = vmatpush3.bf16.msra.mxu0 %v5899_v35  ;;  %5684 = vmatprep.mubr.msk.bf16.mxu0 %vm6613_vm0, %v6612_v3  ;;  %v5979_v35 = vld [vmem:[#allocation5 + $0x168] ss:$12 sps:$4 sm:$0xff]  }
  0x89   :  { %5674 = vmatprep.subr.bf16.mxu0 %v6612_v3 }
  0x8c   :  { %5675 = vmatpush3.bf16.msra.mxu0 %v5903_v38  ;;  %v125_v38 = vlaneseq }
  0x8d   :  { %5676 = vmatprep.subr.bf16.mxu0 %v6612_v3 }
  0x8e   :  { %v126_v39 = vshrl.u32 %v125_v38, 7 }
  0x90   :  { %5677 = vmatpush3.bf16.msra.mxu0 %v5907_v41  ;;  %v6793_v40 = vsub.s32 0, %v126_v39  ;;  %v6798_v41 = vld [vmem:[%s7025_s2] sm:$0x7]  ;;  %v6800_v42 = vsub.s32 1, %v126_v39 }
  0x91   :  { %5678 = vmatprep.subr.bf16.mxu0 %v6612_v3 }
  0x94   :  { %5679 = vmatpush3.bf16.msra.mxu0 %v5911_v43  ;;  %v440_v43 = vrot.slane %v6798_v41, %v6793_v40 }
  0x95   :  { %5680 = vmatprep.subr.bf16.mxu0 %v6612_v3 }
  0x98   :  { %5681 = vmatpush3.bf16.msra.mxu0 %v5915_v44  ;;  %v444_v44 = vrot.slane %v6798_v41, %v6800_v42 }
  0x99   :  { %5682 = vmatprep.subr.bf16.mxu0 %v6612_v3 }
  0x9c   :  { %5683 = vmatpush3.bf16.msra.mxu0 %v5919_v45 }
  0x9d   :  { %1128 = vmatprep.subr.bf16.mxu0 %v5922_v46  ;;  %v6806_v46 = vstv %s632_s1 }
 0x15a   :  { %v403_v48 = vpop.f32.mrb[4].mxu0 }
 0x15b   :  { %v434_v51 = vpack.c.bf16 %v403_v48, %v403_v48  ;;  %v5670_v52 = vpop.f32.mrb[5].mxu0 }
 0x15c   :  { %v406_v55 = vpop.f32.mrb[6].mxu0 }
 0x15d   :  { %v5671_v56 = vpop.f32.mrb[7].mxu0  ;;  %4963 = vmatmul.mubr.msk.bf16.vlgmr.msra.gmra.mrb[4].mxu1 %vm236_vm1, %v434_v51  ;;  %5685 = vmatmul.mubr.msk.bf16.vlgmr.msra.gmra.mrb[8].mxu0 %vm236_vm1, %v434_v51 }
 0x15e   :  { %1129 = vmatpush1.bf16.msra.mxu0 %v5920_v49  ;;  %5451 = vmatpush3.bf16.msra.mxu1 %v5948_v50 }
 0x15f   :  { %1130 = vmatprep.subr.bf16.mxu0 %v5925_v53  ;;  %5452 = vmatprep.subr.bf16.mxu1 %v5952_v54 }
 0x162   :  { %1131 = vmatpush1.bf16.msra.mxu0 %v5923_v57  ;;  %5453 = vmatpush3.bf16.msra.mxu1 %v5953_v58 }
 0x163   :  { %1132 = vmatprep.subr.bf16.mxu0 %v5928_v59  ;;  %5454 = vmatprep.subr.bf16.mxu1 %v5957_v60 }
 0x166   :  { %1133 = vmatpush1.bf16.msra.mxu0 %v5926_v61  ;;  %5455 = vmatpush3.bf16.msra.mxu1 %v5958_v62  ;;  %v5984_v61 = vld [vmem:[#allocation5 + $0x180] ss:$12 sps:$4 sm:$0xff]   ;;  %v5987_v62 = vld [vmem:[#allocation5 + $0x188] ss:$12 sps:$4 sm:$0xff]  }
 0x167   :  { %1134 = vmatprep.subr.bf16.mxu0 %v5931_v63  ;;  %5456 = vmatprep.subr.bf16.mxu1 %v5962_v0  ;;  %v5990_v0 = vld [vmem:[#allocation5 + $0x19c] ss:$12 sps:$4 sm:$0xff]  }
 0x16a   :  { %1135 = vmatpush1.bf16.msra.mxu0 %v5929_v1  ;;  %5457 = vmatpush3.bf16.msra.mxu1 %v5963_v4  ;;  %v5988_v1 = vld [vmem:[#allocation5 + $0x198] ss:$12 sps:$4 sm:$0xff]   ;;  %v5991_v4 = vld [vmem:[#allocation5 + $0x1a0] ss:$12 sps:$4 sm:$0xff]  }
 0x16b   :  { %1136 = vmatprep.subr.bf16.mxu0 %v5934_v5  ;;  %5458 = vmatprep.subr.bf16.mxu1 %v5967_v6  ;;  %v5994_v5 = vld [vmem:[#allocation5 + $0x1b4] ss:$12 sps:$4 sm:$0xff]   ;;  %v5992_v6 = vld [vmem:[#allocation5 + $0x1b0] ss:$12 sps:$4 sm:$0xff]  }
 0x16e   :  { %1137 = vmatpush1.bf16.msra.mxu0 %v5932_v7  ;;  %5459 = vmatpush3.bf16.msra.mxu1 %v5968_v8  ;;  %v5995_v7 = vld [vmem:[#allocation5 + $0x1b8] ss:$12 sps:$4 sm:$0xff]  }
 0x16f   :  { %1138 = vmatprep.subr.bf16.mxu0 %v5937_v9  ;;  %5460 = vmatprep.subr.bf16.mxu1 %v5972_v10  ;;  %v5998_v8 = vld [vmem:[#allocation5 + $0x1cc] ss:$12 sps:$4 sm:$0xff]   ;;  %v6815_v9 = vsub.s32 2, %v126_v39  ;;  %v5996_v10 = vld [vmem:[#allocation5 + $0x1c8] ss:$12 sps:$4 sm:$0xff]  }
 0x170   :  { %v6023_v39 = vld [vmem:[#allocation7 + $0x8] ss:$12 sps:$4 sm:$0xff]  }
 0x172   :  { %1139 = vmatpush1.bf16.msra.mxu0 %v5935_v11  ;;  %5461 = vmatpush3.bf16.msra.mxu1 %v5973_v12  ;;  %v5999_v11 = vld [vmem:[#allocation5 + $0x1d0] ss:$12 sps:$4 sm:$0xff]  }
 0x173   :  { %1140 = vmatprep.subr.bf16.mxu0 %v5940_v13  ;;  %5462 = vmatprep.subr.bf16.mxu1 %v5977_v30  ;;  %v6002_v12 = vld [vmem:[#allocation5 + $0x1e4] ss:$12 sps:$4 sm:$0xff]   ;;  %v448_v13 = vrot.slane %v6798_v41, %v6815_v9  ;;  %v6024_v41 = vld [vmem:[#allocation7 + $0x20] ss:$12 sps:$4 sm:$0xff]  }
 0x176   :  { %1141 = vmatpush1.bf16.msra.mxu0 %v5938_v14  ;;  %5463 = vmatpush3.bf16.msra.mxu1 %v5978_v32  ;;  %v6000_v14 = vld [vmem:[#allocation5 + $0x1e0] ss:$12 sps:$4 sm:$0xff]  }
 0x177   :  { %1142 = vmatprep.subr.bf16.mxu0 %v5943_v15  ;;  %5464 = vmatprep.subr.bf16.mxu1 %v5982_v34  ;;  %v6003_v15 = vld [vmem:[#allocation5 + $0x1e8] ss:$12 sps:$4 sm:$0xff]   ;;  %v6014_v32 = vld [vmem:[#allocation7 + $0x18] ss:$12 sps:$4 sm:$0xff]   ;;  %v6017_v34 = vld [vmem:[#allocation7 + $0x30] ss:$12 sps:$4 sm:$0xff]  }
 0x17a   :  { %1143 = vmatpush1.bf16.msra.mxu0 %v5941_v16  ;;  %5465 = vmatpush3.bf16.msra.mxu1 %v5983_v36  ;;  %v6006_v16 = vld [vmem:[#allocation5 + $0x1fc] ss:$12 sps:$4 sm:$0xff]  }
 0x17b   :  { %1144 = vmatprep.subr.bf16.mxu0 %v5946_v17  ;;  %5688 = vmatprep.subr.bf16.mxu1 %v6612_v3  ;;  %v6020_v36 = vld [vmem:[#allocation7 + $0x48] ss:$12 sps:$4 sm:$0xff]  }
 0x17e   :  { %1145 = vmatpush1.bf16.msra.mxu0 %v5944_v18  ;;  %v731_v18 = vld [vmem:[#allocation5 + $0x210] sm:$0xff] }
 0x17f   :  { %1146 = vmatprep.subr.bf16.mxu0 %v5951_v19  ;;  %v6004_v19 = vld [vmem:[#allocation5 + $0x1f8] ss:$12 sps:$4 sm:$0xff]  }
 0x182   :  { %1147 = vmatpush1.bf16.msra.mxu0 %v5949_v20  ;;  %v6007_v20 = vld [vmem:[#allocation5 + $0x200] ss:$12 sps:$4 sm:$0xff]  }
 0x183   :  { %1148 = vmatprep.subr.bf16.mxu0 %v5956_v21  ;;  %v5032_v21 = vcombine.high %v731_v18, %v731_v18 }
 0x186   :  { %1149 = vmatpush1.bf16.msra.mxu0 %v5954_v22  ;;  %v5031_v22 = vcombine.low %v731_v18, %v731_v18  ;;  %v6078_v18 = vld [vmem:[#allocation5 + $0x3fc] ss:$12 sps:$4 sm:$0xff]  }
 0x187   :  { %1150 = vmatprep.subr.bf16.mxu0 %v5961_v23  ;;  %v6010_v23 = vld [vmem:[#allocation5 + $0x218] ss:$0 sps:$4 sm:$0xff]  }
 0x18a   :  { %1151 = vmatpush1.bf16.msra.mxu0 %v5959_v24 }
 0x18b   :  { %1152 = vmatprep.subr.bf16.mxu0 %v5966_v25  ;;  %v1120_v25 = vsel %vm1118_vm4, %v5031_v22, 0  ;;  %v6084_v22 = vld [vmem:[#allocation5 + $0x414] ss:$12 sps:$4 sm:$0xff]  }
 0x18e   :  { %1153 = vmatpush1.bf16.msra.mxu0 %v5964_v26  ;;  %v1126_v26 = vsel %vm1118_vm4, %v6010_v23, 0  ;;  %v6081_v23 = vld [vmem:[#allocation5 + $0x354] ss:$12 sps:$4 sm:$0xff]  }
 0x18f   :  { %1154 = vmatprep.subr.bf16.mxu0 %v5971_v27  ;;  %v6013_v27 = vld [vmem:[#allocation7 + $0x4] ss:$12 sps:$4 sm:$0xff]  }
 0x192   :  { %1155 = vmatpush1.bf16.msra.mxu0 %v5969_v28 }
 0x193   :  { %1156 = vmatprep.subr.bf16.mxu0 %v5976_v29  ;;  %v6011_v29 = vld [vmem:[#allocation7] ss:$12 sps:$4 sm:$0xff]  }
 0x196   :  { %1157 = vmatpush1.bf16.msra.mxu0 %v5974_v31  ;;  %v6016_v31 = vld [vmem:[#allocation7 + $0x1c] ss:$12 sps:$4 sm:$0xff]  }
 0x197   :  { %1158 = vmatprep.subr.bf16.mxu0 %v5981_v33  ;;  %v6019_v33 = vld [vmem:[#allocation7 + $0x34] ss:$12 sps:$4 sm:$0xff]  }
 0x19a   :  { %1159 = vmatpush1.bf16.msra.mxu0 %v5979_v35  ;;  %v6022_v35 = vld [vmem:[#allocation7 + $0x4c] ss:$12 sps:$4 sm:$0xff]  }
 0x19b   :  { %1169 = vmatprep.subr.bf16.mxu0 %v5986_v37  ;;  %v1304_v37 = vld [vmem:[%s7026_s3] sm:$0xff] }
 0x19c   :  { %v1415_v38 = vpack.c.bf16 %v1304_v37, %v1304_v37 }
 0x230   :  { %v585_v45 = vpop.f32.mrb[4].mxu1  ;;  %v626_v47 = vpop.f32.mrb[8].mxu0 }
 0x231   :  { %v586_v48 = vadd.f32 %v585_v45, %v440_v43  ;;  %v587_v49 = vpop.f32.mrb[5].mxu1  ;;  %v5686_v50 = vpop.f32.mrb[9].mxu0  ;;  %v627_v17 = vadd.f32 %v626_v47, %v448_v13  ;;  %v6025_v43 = vld [vmem:[#allocation7 + $0x38] ss:$12 sps:$4 sm:$0xff]   ;;  %v6032_v47 = vld [vmem:[#allocation5 + $0x238] ss:$12 sps:$4 sm:$0xff]  }
 0x232   :  { %v588_v51 = vadd.f32 %v587_v49, %v444_v44  ;;  %v589_v52 = vpop.f32.mrb[6].mxu1  ;;  %v629_v53 = vpop.f32.mrb[10].mxu0  ;;  %v6026_v44 = vld [vmem:[#allocation7 + $0x50] ss:$12 sps:$4 sm:$0xff]   ;;  %v6029_v45 = vld [vmem:[#allocation5 + $0x220] ss:$12 sps:$4 sm:$0xff]  }
 0x233   :  { %vm633_vm2 = vcmp.ge.f32.partialorder %v586_v48, 0.0  ;;  %v637_v54 = vmul.f32 %v6806_v46, %v586_v48  ;;  %v590_v55 = vpop.f32.mrb[7].mxu1  ;;  %v5687_v56 = vpop.f32.mrb[11].mxu0  ;;  %v639_v24 = vmul.f32 %v6806_v46, %v627_v17  ;;  %vm635_vm5 = vcmp.ge.f32.partialorder %v627_v17, 0.0  ;;  %v6035_v49 = vld [vmem:[#allocation5 + $0x250] ss:$12 sps:$4 sm:$0xff]  }
 0x234   :  { %vm634_vm3 = vcmp.ge.f32.partialorder %v588_v51, 0.0  ;;  %v638_v57 = vmul.f32 %v6806_v46, %v588_v51  ;;  %v6027_v46 = vld [vmem:[#allocation5 + $0x21c] ss:$12 sps:$4 sm:$0xff]   ;;  %v6033_v50 = vld [vmem:[#allocation5 + $0x24c] ss:$12 sps:$4 sm:$0xff]  }
 0x235   :  { %v640_v58 = vsel %vm633_vm2, %v586_v48, %v637_v54  ;;  %v642_v28 = vsel %vm635_vm5, %v627_v17, %v639_v24  ;;  %v6030_v48 = vld [vmem:[#allocation5 + $0x234] ss:$12 sps:$4 sm:$0xff]   ;;  %v6036_v52 = vld [vmem:[#allocation5 + $0x264] ss:$12 sps:$4 sm:$0xff]   ;;  %v6039_v54 = vld [vmem:[#allocation5 + $0x27c] ss:$12 sps:$4 sm:$0xff]  }
 0x236   :  { %v641_v59 = vsel %vm634_vm3, %v588_v51, %v638_v57  ;;  %v733_v63 = vpack.c.bf16 %v640_v58, %v640_v58  ;;  %v735_v30 = vpack.c.bf16 %v642_v28, %v642_v28  ;;  %v6038_v51 = vld [vmem:[#allocation5 + $0x268] ss:$12 sps:$4 sm:$0xff]   ;;  %v6041_v53 = vld [vmem:[#allocation5 + $0x280] ss:$12 sps:$4 sm:$0xff]   ;;  %v6044_v55 = vld [vmem:[#allocation5 + $0x298] ss:$12 sps:$4 sm:$0xff]  }
 0x237   :  { %v734_v60 = vpack.c.bf16 %v641_v59, %v641_v59  ;;  %v6042_v56 = vld [vmem:[#allocation5 + $0x294] ss:$12 sps:$4 sm:$0xff]   ;;  %v6047_v57 = vld [vmem:[#allocation5 + $0x2b0] ss:$12 sps:$4 sm:$0xff]   ;;  %v6045_v58 = vld [vmem:[#allocation5 + $0x2ac] ss:$12 sps:$4 sm:$0xff]  }
 0x238   :  { %v6050_v59 = vld [vmem:[#allocation5 + $0x2c8] ss:$12 sps:$4 sm:$0xff]   ;;  %v6077_v17 = vld [vmem:[#allocation5 + $0x340] ss:$12 sps:$4 sm:$0xff]   ;;  %v6089_v24 = vld [vmem:[#allocation5 + $0x370] ss:$12 sps:$4 sm:$0xff]  }
 0x239   :  { %1160 = vmatprep.mubr.bf16.mxu0 %v734_v60  ;;  %1242 = vmatprep.mubr.bf16.mxu1 %v734_v60  ;;  %v6048_v60 = vld [vmem:[#allocation5 + $0x2c4] ss:$12 sps:$4 sm:$0xff]   ;;  %v6071_v13 = vld [vmem:[#allocation5 + $0x328] ss:$12 sps:$4 sm:$0xff]   ;;  %v6087_v28 = vld [vmem:[#allocation5 + $0x36c] ss:$12 sps:$4 sm:$0xff]  }
 0x23a   :  { %1161 = vmatmul.mubr.bf16.vlgmr.msra.gmra.mrb[0].mxu0 %v733_v63  ;;  %1243 = vmatmul.mubr.bf16.vlgmr.msra.gmra.mrb[8].mxu1 %v733_v63  ;;  %v6056_v63 = vld [vmem:[#allocation5 + $0x3a0] ss:$12 sps:$4 sm:$0xff]  }
 0x23b   :  { %1170 = vmatpush1.bf16.msra.mxu0 %v5984_v61  ;;  %5689 = vmatpush3.bf16.msra.mxu1 %v5987_v62  ;;  %v6053_v61 = vld [vmem:[#allocation5 + $0x2e0] ss:$12 sps:$4 sm:$0xff]   ;;  %v6054_v62 = vld [vmem:[#allocation5 + $0x39c] ss:$12 sps:$4 sm:$0xff]  }
 0x23c   :  { %1171 = vmatprep.subr.bf16.mxu0 %v5990_v0  ;;  %5690 = vmatprep.subr.bf16.mxu1 %v6612_v3  ;;  %v6051_v0 = vld [vmem:[#allocation5 + $0x2dc] ss:$12 sps:$4 sm:$0xff]  }
 0x23d   :  { %1201 = vmatprep.mubr.bf16.mxu0 %v6611_v2  ;;  %5702 = vmatprep.mubr.msk.bf16.mxu1 %vm6613_vm0, %v6612_v3 }
 0x23f   :  { %1172 = vmatpush1.bf16.msra.mxu0 %v5988_v1  ;;  %5691 = vmatpush3.bf16.msra.mxu1 %v5991_v4  ;;  %v6062_v1 = vld [vmem:[#allocation5 + $0x3b8] ss:$12 sps:$4 sm:$0xff]  }
 0x240   :  { %1173 = vmatprep.subr.bf16.mxu0 %v5994_v5  ;;  %5692 = vmatprep.subr.bf16.mxu1 %v6612_v3  ;;  %v6059_v4 = vld [vmem:[#allocation5 + $0x2f8] ss:$12 sps:$4 sm:$0xff]   ;;  %v6060_v5 = vld [vmem:[#allocation5 + $0x3b4] ss:$12 sps:$4 sm:$0xff]  }
 0x243   :  { %1174 = vmatpush1.bf16.msra.mxu0 %v5992_v6  ;;  %5693 = vmatpush3.bf16.msra.mxu1 %v5995_v7  ;;  %v6068_v6 = vld [vmem:[#allocation5 + $0x3d0] ss:$12 sps:$4 sm:$0xff]   ;;  %v6057_v7 = vld [vmem:[#allocation5 + $0x2f4] ss:$12 sps:$4 sm:$0xff]  }
 0x244   :  { %1175 = vmatprep.subr.bf16.mxu0 %v5998_v8  ;;  %5694 = vmatprep.subr.bf16.mxu1 %v6612_v3  ;;  %v6065_v8 = vld [vmem:[#allocation5 + $0x310] ss:$12 sps:$4 sm:$0xff]  }
 0x247   :  { %1176 = vmatpush1.bf16.msra.mxu0 %v5996_v10  ;;  %5695 = vmatpush3.bf16.msra.mxu1 %v5999_v11  ;;  %v6066_v10 = vld [vmem:[#allocation5 + $0x3cc] ss:$12 sps:$4 sm:$0xff]   ;;  %v6074_v11 = vld [vmem:[#allocation5 + $0x3e8] ss:$12 sps:$4 sm:$0xff]  }
 0x248   :  { %1177 = vmatprep.subr.bf16.mxu0 %v6002_v12  ;;  %5696 = vmatprep.subr.bf16.mxu1 %v6612_v3  ;;  %v6063_v12 = vld [vmem:[#allocation5 + $0x30c] ss:$12 sps:$4 sm:$0xff]  }
 0x24b   :  { %1178 = vmatpush1.bf16.msra.mxu0 %v6000_v14  ;;  %5697 = vmatpush3.bf16.msra.mxu1 %v6003_v15  ;;  %v6072_v14 = vld [vmem:[#allocation5 + $0x3e4] ss:$12 sps:$4 sm:$0xff]   ;;  %v6080_v15 = vld [vmem:[#allocation5 + $0x400] ss:$12 sps:$4 sm:$0xff]  }
 0x24c   :  { %1179 = vmatprep.subr.bf16.mxu0 %v6006_v16  ;;  %5698 = vmatprep.subr.bf16.mxu1 %v6612_v3  ;;  %v6069_v16 = vld [vmem:[#allocation5 + $0x324] ss:$12 sps:$4 sm:$0xff]  }
 0x24f   :  { %1180 = vmatpush1.bf16.msra.mxu0 %v6004_v19  ;;  %5699 = vmatpush3.bf16.msra.mxu1 %v6007_v20  ;;  %v6086_v19 = vld [vmem:[#allocation5 + $0x418] ss:$12 sps:$4 sm:$0xff]   ;;  %v6075_v20 = vld [vmem:[#allocation5 + $0x33c] ss:$12 sps:$4 sm:$0xff]  }
 0x250   :  { %5034 = vmatprep.subr.msk.bf16.mxu0 %vm1118_vm4, %v5032_v21  ;;  %5700 = vmatprep.subr.bf16.mxu1 %v6612_v3  ;;  %v6083_v21 = vld [vmem:[#allocation5 + $0x358] ss:$12 sps:$4 sm:$0xff]  }
 0x253   :  { %1182 = vmatpush1.bf16.msra.mxu0 %v1120_v25  ;;  %5701 = vmatpush3.bf16.msra.mxu1 %v1126_v26  ;;  %v1394_v25 = vld [vmem:[#allocation5 + $0x42c] sm:$0xff] }
 0x254   :  { %1484 = vmatprep.subr.bf16.mxu1 %v6013_v27  ;;  %1978 = vmatprep.subr.bf16.mxu0 %v6056_v63  ;;  %v5119_v26 = vcombine.high %v1394_v25, %v1394_v25  ;;  %v5118_v27 = vcombine.low %v1394_v25, %v1394_v25 }
 0x256   :  { %5035 = vmatmul.mubr.msk.bf16.vlgmr.msra.gmra.mrb[0].mxu0 %vm1114_vm6, %v735_v30  ;;  %5703 = vmatmul.mubr.msk.bf16.vlgmr.msra.gmra.mrb[0].mxu1 %vm1114_vm6, %v735_v30  ;;  %v6094_v30 = vld [vmem:[#allocation5 + $0x388] ss:$12 sps:$4 sm:$0xff]  }
 0x257   :  { %1485 = vmatpush1.bf16.msra.mxu1 %v6011_v29  ;;  %1516 = vmatprep.mubr.bf16.mxu1 %v6611_v2  ;;  %v1929_v29 = vsel %vm1118_vm4, %v5118_v27, 0 }
 0x258   :  { %1486 = vmatprep.subr.bf16.mxu1 %v6016_v31  ;;  %2010 = vmatprep.mubr.bf16.mxu0 %v6611_v2  ;;  %v6095_v31 = vld [vmem:[#allocation5 + $0x2e4] ss:$12 sps:$4 sm:$0xff]  }
 0x259   :  { %1979 = vmatpush1.bf16.msra.mxu0 %v6054_v62 }
 0x25a   :  { %1980 = vmatprep.subr.bf16.mxu0 %v6062_v1 }
 0x25b   :  { %1487 = vmatpush1.bf16.msra.mxu1 %v6014_v32  ;;  %v6092_v32 = vld [vmem:[#allocation5 + $0x384] ss:$12 sps:$4 sm:$0xff]  }
 0x25c   :  { %1488 = vmatprep.subr.bf16.mxu1 %v6019_v33 }
 0x25d   :  { %1981 = vmatpush1.bf16.msra.mxu0 %v6060_v5 }
 0x25e   :  { %1982 = vmatprep.subr.bf16.mxu0 %v6068_v6 }
 0x25f   :  { %1489 = vmatpush1.bf16.msra.mxu1 %v6017_v34 }
 0x260   :  { %1490 = vmatprep.subr.bf16.mxu1 %v6022_v35 }
 0x261   :  { %1983 = vmatpush1.bf16.msra.mxu0 %v6066_v10 }
 0x262   :  { %1984 = vmatprep.subr.bf16.mxu0 %v6074_v11 }
 0x263   :  { %1491 = vmatpush1.bf16.msra.mxu1 %v6020_v36 }
 0x264   :  { %5706 = vmatprep.subr.bf16.mxu1 %v6612_v3 }
 0x265   :  { %1985 = vmatpush1.bf16.msra.mxu0 %v6072_v14 }
 0x266   :  { %5050 = vmatmul.mubr.msk.bf16.vlgmr.msra.gmra.mrb[12].mxu1 %vm1480_vm7, %v1415_v38  ;;  %1986 = vmatprep.subr.bf16.mxu0 %v6080_v15  ;;  %v6099_v15 = vld [vmem:[#allocation5 + $0x23c] ss:$12 sps:$4 sm:$0xff]  }
 0x267   :  { %5707 = vmatpush3.bf16.msra.mxu1 %v6023_v39  ;;  %5714 = vmatprep.mubr.msk.bf16.mxu1 %vm6613_vm0, %v6612_v3 }
 0x268   :  { %5708 = vmatprep.subr.bf16.mxu1 %v6612_v3 }
 0x269   :  { %1987 = vmatpush1.bf16.msra.mxu0 %v6078_v18  ;;  %v6102_v18 = vld [vmem:[#allocation5 + $0x254] ss:$12 sps:$4 sm:$0xff]  }
 0x26a   :  { %1988 = vmatprep.subr.bf16.mxu0 %v6086_v19  ;;  %v6104_v19 = vld [vmem:[#allocation5 + $0x32c] ss:$12 sps:$4 sm:$0xff]  }
 0x26b   :  { %5709 = vmatpush3.bf16.msra.mxu1 %v6024_v41  ;;  %v123_v41 = vld [vmem:[#allocation8] ss:$8 sm:$0x7] }
 0x26c   :  { %5710 = vmatprep.subr.bf16.mxu1 %v6612_v3 }
 0x26d   :  { %1989 = vmatpush1.bf16.msra.mxu0 %v6084_v22  ;;  %v6105_v22 = vld [vmem:[#allocation5 + $0x26c] ss:$12 sps:$4 sm:$0xff]  }
 0x26e   :  { %5121 = vmatprep.subr.msk.bf16.mxu0 %vm1118_vm4, %v5119_v26  ;;  %v6106_v26 = vld [vmem:[#allocation5 + $0x3ec] ss:$12 sps:$4 sm:$0xff]  }
 0x26f   :  { %5711 = vmatpush3.bf16.msra.mxu1 %v6025_v43  ;;  %v128_v43 = vrot.slane %v123_v41, %v6793_v40 }
 0x270   :  { %5712 = vmatprep.subr.bf16.mxu1 %v6612_v3 }
 0x271   :  { %1991 = vmatpush1.bf16.msra.mxu0 %v1929_v29  ;;  %v6110_v29 = vld [vmem:[#allocation5 + $0x35c] ss:$12 sps:$4 sm:$0xff]  }
 0x272   :  { %5485 = vmatprep.subr.bf16.mxu0 %v6095_v31  ;;  %v6111_v31 = vld [vmem:[#allocation5 + $0x29c] ss:$12 sps:$4 sm:$0xff]  }
 0x273   :  { %5713 = vmatpush3.bf16.msra.mxu1 %v6026_v44 }
 0x274   :  { %1937 = vmatprep.subr.bf16.mxu1 %v6029_v45  ;;  %v132_v45 = vrot.slane %v123_v41, %v6800_v42 }
 0x276   :  { %5715 = vmatmul.mubr.msk.bf16.vlgmr.msra.gmra.mrb[16].mxu1 %vm1480_vm7, %v1415_v38  ;;  %v737_v38 = vld [vmem:[#allocation8 + $0x1] ss:$8 sm:$0x7] }
 0x277   :  { %1938 = vmatpush1.bf16.msra.mxu1 %v6027_v46  ;;  %v750_v39 = vrot.slane %v737_v38, %v6815_v9  ;;  %v742_v44 = vrot.slane %v737_v38, %v6793_v40  ;;  %v746_v46 = vrot.slane %v737_v38, %v6800_v42 }
 0x278   :  { %1939 = vmatprep.subr.bf16.mxu1 %v6032_v47 }
 0x27b   :  { %1940 = vmatpush1.bf16.msra.mxu1 %v6030_v48  ;;  %v136_v48 = vrot.slane %v123_v41, %v6815_v9  ;;  %v6117_v41 = vld [vmem:[#allocation5 + $0x2cc] ss:$12 sps:$4 sm:$0xff]  }
 0x27c   :  { %1941 = vmatprep.subr.bf16.mxu1 %v6035_v49  ;;  %v5820_v49 = vadd.f32 %v742_v44, %v128_v43 }
 0x27f   :  { %1942 = vmatpush1.bf16.msra.mxu1 %v6033_v50  ;;  %v5822_v50 = vadd.f32 %v746_v46, %v132_v45  ;;  %v6120_v45 = vld [vmem:[#allocation5 + $0x43c] ss:$12 sps:$4 sm:$0xff]  }
 0x280   :  { %1943 = vmatprep.subr.bf16.mxu1 %v6038_v51 }
 0x283   :  { %1944 = vmatpush1.bf16.msra.mxu1 %v6036_v52 }
 0x284   :  { %1945 = vmatprep.subr.bf16.mxu1 %v6041_v53  ;;  %v1297_v53 = vstv %s5037_s22 }
 0x287   :  { %1946 = vmatpush1.bf16.msra.mxu1 %v6039_v54 }
 0x288   :  { %1947 = vmatprep.subr.bf16.mxu1 %v6044_v55 }
 0x28b   :  { %1948 = vmatpush1.bf16.msra.mxu1 %v6042_v56 }
 0x28c   :  { %1949 = vmatprep.subr.bf16.mxu1 %v6047_v57 }
 0x28f   :  { %1950 = vmatpush1.bf16.msra.mxu1 %v6045_v58 }
 0x290   :  { %1951 = vmatprep.subr.bf16.mxu1 %v6050_v59 }
 0x293   :  { %1952 = vmatpush1.bf16.msra.mxu1 %v6048_v60 }
 0x294   :  { %1953 = vmatprep.subr.bf16.mxu1 %v6053_v61 }
 0x297   :  { %1954 = vmatpush1.bf16.msra.mxu1 %v6051_v0 }
 0x298   :  { %1955 = vmatprep.subr.bf16.mxu1 %v6059_v4 }
 0x29b   :  { %1956 = vmatpush1.bf16.msra.mxu1 %v6057_v7  ;;  %v6096_v7 = vld [vmem:[#allocation5 + $0x224] ss:$12 sps:$4 sm:$0xff]  }
 0x29c   :  { %1957 = vmatprep.subr.bf16.mxu1 %v6065_v8 }
 0x29f   :  { %1958 = vmatpush1.bf16.msra.mxu1 %v6063_v12  ;;  %v6097_v12 = vld [vmem:[#allocation5 + $0x3a4] ss:$12 sps:$4 sm:$0xff]  }
 0x2a0   :  { %1959 = vmatprep.subr.bf16.mxu1 %v6071_v13  ;;  %v6098_v13 = vld [vmem:[#allocation5 + $0x2fc] ss:$12 sps:$4 sm:$0xff]  }
 0x2a3   :  { %1960 = vmatpush1.bf16.msra.mxu1 %v6069_v16  ;;  %v6101_v16 = vld [vmem:[#allocation5 + $0x314] ss:$12 sps:$4 sm:$0xff]  }
 0x2a4   :  { %1961 = vmatprep.subr.bf16.mxu1 %v6077_v17  ;;  %v6100_v17 = vld [vmem:[#allocation5 + $0x3bc] ss:$12 sps:$4 sm:$0xff]  }
 0x2a7   :  { %1962 = vmatpush1.bf16.msra.mxu1 %v6075_v20  ;;  %v6103_v20 = vld [vmem:[#allocation5 + $0x3d4] ss:$12 sps:$4 sm:$0xff]  }
 0x2a8   :  { %1963 = vmatprep.subr.bf16.mxu1 %v6083_v21 }
 0x2ab   :  { %1964 = vmatpush1.bf16.msra.mxu1 %v6081_v23 }
 0x2ac   :  { %1965 = vmatprep.subr.bf16.mxu1 %v6089_v24  ;;  %v6107_v24 = vld [vmem:[#allocation5 + $0x344] ss:$12 sps:$4 sm:$0xff]  }
 0x2af   :  { %1966 = vmatpush1.bf16.msra.mxu1 %v6087_v28  ;;  %v6108_v28 = vld [vmem:[#allocation5 + $0x284] ss:$12 sps:$4 sm:$0xff]  }
 0x2b0   :  { %1967 = vmatprep.subr.bf16.mxu1 %v6094_v30  ;;  %v6109_v30 = vld [vmem:[#allocation5 + $0x404] ss:$12 sps:$4 sm:$0xff]  }
 0x2b3   :  { %1968 = vmatpush1.bf16.msra.mxu1 %v6092_v32  ;;  %v6113_v32 = vld [vmem:[#allocation5 + $0x374] ss:$12 sps:$4 sm:$0xff]  }
 0x2b4   :  { %5718 = vmatprep.subr.bf16.mxu1 %v6612_v3 }
 0x30d   :  { %v5466_v33 = vpop.f32.mrb[8].mxu1 }
 0x30e   :  { %v5467_v34 = vpop.f32.mrb[9].mxu1 }
 0x30f   :  { %v5468_v35 = vadd.f32 %v5467_v34, %v5466_v33  ;;  %v5469_v36 = vpop.f32.mrb[10].mxu1  ;;  %v6112_v33 = vld [vmem:[#allocation5 + $0x41c] ss:$12 sps:$4 sm:$0xff]   ;;  %v6115_v34 = vld [vmem:[#allocation5 + $0x434] ss:$0 sps:$4 sm:$0xff]  }
 0x310   :  { %v5470_v37 = vpop.f32.mrb[11].mxu1  ;;  %v6116_v36 = vld [vmem:[#allocation5 + $0x38c] ss:$12 sps:$4 sm:$0xff]  }
 0x311   :  { %v1245_v47 = vadd.f32 %v5468_v35, %v750_v39  ;;  %v6114_v35 = vld [vmem:[#allocation5 + $0x2b4] ss:$12 sps:$4 sm:$0xff]   ;;  %v1935_v37 = vsel %vm1118_vm4, %v6115_v34, 0  ;;  %v6184_v34 = vld [vmem:[#allocation5 + $0x5bc] ss:$12 sps:$4 sm:$0xff]  }
 0x312   :  { %v6145_v39 = vld [vmem:[#allocation5 + $0x500] ss:$12 sps:$4 sm:$0xff]  }
 0x313   :  { %v5824_v51 = vadd.f32 %v1245_v47, %v136_v48  ;;  %v6146_v47 = vld [vmem:[#allocation5 + $0x440] ss:$12 sps:$4 sm:$0xff]   ;;  %v6150_v48 = vld [vmem:[#allocation5 + $0x518] ss:$12 sps:$4 sm:$0xff]  }
 0x329   :  { %v1203_v52 = vpop.f32.mrb[0].mxu0  ;;  %v1284_v54 = vpop.f32.mrb[0].mxu1 }
 0x32a   :  { %v5821_v55 = vadd.f32 %v5820_v49, %v1203_v52  ;;  %v5825_v56 = vadd.f32 %v5824_v51, %v1284_v54  ;;  %v1205_v57 = vpop.f32.mrb[1].mxu0  ;;  %v5704_v58 = vpop.f32.mrb[1].mxu1  ;;  %v6118_v49 = vld [vmem:[#allocation5 + $0x438] ss:$12 sps:$4 sm:$0xff]   ;;  %v6155_v52 = vld [vmem:[#allocation5 + $0x530] ss:$12 sps:$4 sm:$0xff]  }
 0x32b   :  { %v5823_v59 = vadd.f32 %v5822_v50, %v1205_v57  ;;  %v1207_v60 = vpop.f32.mrb[2].mxu0  ;;  %v1287_v61 = vpop.f32.mrb[2].mxu1  ;;  %v6123_v50 = vld [vmem:[#allocation5 + $0x454] ss:$12 sps:$4 sm:$0xff]   ;;  %v6151_v51 = vld [vmem:[#allocation5 + $0x458] ss:$12 sps:$4 sm:$0xff]  }
 0x32c   :  { %vm1294_vm8 = vcmp.ge.f32.partialorder %v5821_v55, 0.0  ;;  %v1298_v62 = vmul.f32 %v5821_v55, %v1297_v53  ;;  %vm1296_vm9 = vcmp.ge.f32.partialorder %v5825_v56, 0.0  ;;  %v1300_v63 = vmul.f32 %v5825_v56, %v1297_v53  ;;  %v1208_v0 = vpop.f32.mrb[3].mxu0  ;;  %v5705_v1 = vpop.f32.mrb[3].mxu1  ;;  %v6126_v54 = vld [vmem:[#allocation5 + $0x46c] ss:$12 sps:$4 sm:$0xff]  }
 0x32d   :  { %vm1295_vm10 = vcmp.ge.f32.partialorder %v5823_v59, 0.0  ;;  %v1299_v4 = vmul.f32 %v5823_v59, %v1297_v53  ;;  %v6121_v53 = vld [vmem:[#allocation5 + $0x450] ss:$12 sps:$4 sm:$0xff]   ;;  %v6124_v57 = vld [vmem:[#allocation5 + $0x468] ss:$12 sps:$4 sm:$0xff]  }
 0x32e   :  { %v1301_v5 = vsel %vm1294_vm8, %v5821_v55, %v1298_v62  ;;  %v1303_v6 = vsel %vm1296_vm9, %v5825_v56, %v1300_v63  ;;  %v6156_v55 = vld [vmem:[#allocation5 + $0x470] ss:$12 sps:$4 sm:$0xff]   ;;  %v6160_v56 = vld [vmem:[#allocation5 + $0x548] ss:$12 sps:$4 sm:$0xff]   ;;  %v6127_v60 = vld [vmem:[#allocation5 + $0x480] ss:$12 sps:$4 sm:$0xff]  }
 0x32f   :  { %v6851_v8 = vpack.c.bf16 %v1303_v6, %v1303_v6  ;;  %v1302_v10 = vsel %vm1295_vm10, %v5823_v59, %v1299_v4  ;;  %v6853_v14 = vpack.c.bf16 %v1301_v5, %v1301_v5  ;;  %v6129_v58 = vld [vmem:[#allocation5 + $0x484] ss:$12 sps:$4 sm:$0xff]   ;;  %v6161_v59 = vld [vmem:[#allocation5 + $0x488] ss:$12 sps:$4 sm:$0xff]   ;;  %v6138_v1 = vld [vmem:[#allocation5 + $0x4cc] ss:$12 sps:$4 sm:$0xff]  }
 0x330   :  { %v1397_v11 = vpack.c.bf16 %v1302_v10, %v1302_v10  ;;  %v6132_v61 = vld [vmem:[#allocation5 + $0x49c] ss:$12 sps:$4 sm:$0xff]   ;;  %v6130_v62 = vld [vmem:[#allocation5 + $0x498] ss:$12 sps:$4 sm:$0xff]   ;;  %v6135_v63 = vld [vmem:[#allocation5 + $0x4b4] ss:$12 sps:$4 sm:$0xff]  }
 0x331   :  { %5122 = vmatmul.mubr.msk.bf16.vlgmr.msra.gmra.mrb[12].mxu0 %vm1114_vm6, %v6851_v8  ;;  %v6133_v0 = vld [vmem:[#allocation5 + $0x4b0] ss:$12 sps:$4 sm:$0xff]   ;;  %v6136_v4 = vld [vmem:[#allocation5 + $0x4c8] ss:$12 sps:$4 sm:$0xff]   ;;  %v6139_v6 = vld [vmem:[#allocation5 + $0x4e0] ss:$12 sps:$4 sm:$0xff]  }
 0x332   :  { %5486 = vmatpush3.bf16.msra.mxu0 %v6096_v7  ;;  %1969 = vmatprep.mubr.bf16.mxu1 %v1397_v11  ;;  %v6141_v5 = vld [vmem:[#allocation5 + $0x4e4] ss:$12 sps:$4 sm:$0xff]   ;;  %v6144_v7 = vld [vmem:[#allocation5 + $0x4fc] ss:$12 sps:$4 sm:$0xff]   ;;  %v6149_v10 = vld [vmem:[#allocation5 + $0x514] ss:$12 sps:$4 sm:$0xff]  }
 0x333   :  { %2051 = vmatprep.mubr.bf16.mxu0 %v1397_v11  ;;  %1970 = vmatmul.mubr.bf16.vlgmr.msra.gmra.mrb[20].mxu1 %v6853_v14  ;;  %v6147_v11 = vld [vmem:[#allocation5 + $0x510] ss:$12 sps:$4 sm:$0xff]  }
 0x334   :  { %5719 = vmatpush3.bf16.msra.mxu1 %v6097_v12  ;;  %5487 = vmatprep.subr.bf16.mxu0 %v6098_v13  ;;  %v6154_v12 = vld [vmem:[#allocation5 + $0x52c] ss:$12 sps:$4 sm:$0xff]   ;;  %v6152_v13 = vld [vmem:[#allocation5 + $0x528] ss:$12 sps:$4 sm:$0xff]  }
 0x335   :  { %5720 = vmatprep.subr.bf16.mxu1 %v6612_v3  ;;  %5732 = vmatprep.mubr.msk.bf16.mxu1 %vm6613_vm0, %v6612_v3 }
 0x336   :  { %5488 = vmatpush3.bf16.msra.mxu0 %v6099_v15  ;;  %v6157_v15 = vld [vmem:[#allocation5 + $0x540] ss:$12 sps:$4 sm:$0xff]  }
 0x337   :  { %5489 = vmatprep.subr.bf16.mxu0 %v6101_v16  ;;  %v6164_v16 = vld [vmem:[#allocation5 + $0x55c] ss:$12 sps:$4 sm:$0xff]  }
 0x338   :  { %5721 = vmatpush3.bf16.msra.mxu1 %v6100_v17  ;;  %v6165_v17 = vld [vmem:[#allocation5 + $0x560] ss:$12 sps:$4 sm:$0xff]  }
 0x339   :  { %5722 = vmatprep.subr.bf16.mxu1 %v6612_v3  ;;  %v6862_v21 = vpop.f32.mrb[12].mxu1 }
 0x33a   :  { %5490 = vmatpush3.bf16.msra.mxu0 %v6102_v18  ;;  %v6864_v23 = vpop.f32.mrb[13].mxu1  ;;  %v6162_v18 = vld [vmem:[#allocation5 + $0x558] ss:$12 sps:$4 sm:$0xff]  }
 0x33b   :  { %5491 = vmatprep.subr.bf16.mxu0 %v6104_v19  ;;  %v1522_v25 = vpop.f32.mrb[14].mxu1  ;;  %v6166_v19 = vld [vmem:[#allocation5 + $0x4a0] ss:$12 sps:$4 sm:$0xff]  }
 0x33c   :  { %5723 = vmatpush3.bf16.msra.mxu1 %v6103_v20  ;;  %v1523_v27 = vpop.f32.mrb[15].mxu1  ;;  %v6169_v20 = vld [vmem:[#allocation5 + $0x574] ss:$12 sps:$4 sm:$0xff]   ;;  %v6171_v25 = vld [vmem:[#allocation5 + $0x4b8] ss:$12 sps:$4 sm:$0xff]  }
 0x33d   :  { %5724 = vmatprep.subr.bf16.mxu1 %v6612_v3  ;;  %v6175_v27 = vld [vmem:[#allocation5 + $0x590] ss:$12 sps:$4 sm:$0xff]  }
 0x33e   :  { %5492 = vmatpush3.bf16.msra.mxu0 %v6105_v22  ;;  %v6170_v22 = vld [vmem:[#allocation5 + $0x578] ss:$12 sps:$4 sm:$0xff]  }
 0x33f   :  { %5493 = vmatprep.subr.bf16.mxu0 %v6107_v24  ;;  %v6167_v24 = vld [vmem:[#allocation5 + $0x570] ss:$12 sps:$4 sm:$0xff]  }
 0x340   :  { %5725 = vmatpush3.bf16.msra.mxu1 %v6106_v26  ;;  %v6174_v26 = vld [vmem:[#allocation5 + $0x58c] ss:$12 sps:$4 sm:$0xff]  }
 0x341   :  { %5726 = vmatprep.subr.bf16.mxu1 %v6612_v3 }
 0x342   :  { %5494 = vmatpush3.bf16.msra.mxu0 %v6108_v28  ;;  %v6172_v28 = vld [vmem:[#allocation5 + $0x588] ss:$12 sps:$4 sm:$0xff]  }
 0x343   :  { %5495 = vmatprep.subr.bf16.mxu0 %v6110_v29  ;;  %v6176_v29 = vld [vmem:[#allocation5 + $0x4d0] ss:$12 sps:$4 sm:$0xff]  }
 0x344   :  { %5727 = vmatpush3.bf16.msra.mxu1 %v6109_v30  ;;  %v6179_v30 = vld [vmem:[#allocation5 + $0x5a4] ss:$12 sps:$4 sm:$0xff]  }
 0x345   :  { %5728 = vmatprep.subr.bf16.mxu1 %v6612_v3 }
 0x346   :  { %5496 = vmatpush3.bf16.msra.mxu0 %v6111_v31  ;;  %v6180_v31 = vld [vmem:[#allocation5 + $0x5a8] ss:$12 sps:$4 sm:$0xff]  }
 0x347   :  { %5497 = vmatprep.subr.bf16.mxu0 %v6113_v32  ;;  %v6177_v32 = vld [vmem:[#allocation5 + $0x5a0] ss:$12 sps:$4 sm:$0xff]  }
 0x348   :  { %5729 = vmatpush3.bf16.msra.mxu1 %v6112_v33  ;;  %v6181_v33 = vld [vmem:[#allocation5 + $0x4e8] ss:$12 sps:$4 sm:$0xff]  }
 0x349   :  { %5730 = vmatprep.subr.bf16.mxu1 %v6612_v3  ;;  %v6871_v38 = vpop.f32.mrb[16].mxu1 }
 0x34a   :  { %5498 = vmatpush3.bf16.msra.mxu0 %v6114_v35  ;;  %v5716_v43 = vpop.f32.mrb[17].mxu1 }
 0x34b   :  { %5499 = vmatprep.subr.bf16.mxu0 %v6116_v36  ;;  %v1562_v44 = vpop.f32.mrb[18].mxu1  ;;  %v6877_v36 = vld [vmem:[#allocation8 + $0x2] ss:$8 sm:$0x7] }
 0x34c   :  { %5731 = vmatpush3.bf16.msra.mxu1 %v1935_v37  ;;  %v5717_v46 = vpop.f32.mrb[19].mxu1  ;;  %v2105_v44 = vrot.slane %v6877_v36, %v6793_v40 }
 0x34d   :  { %5515 = vmatprep.subr.bf16.mxu1 %v6145_v39 }
 0x34e   :  { %5500 = vmatpush3.bf16.msra.mxu0 %v6117_v41 }
 0x34f   :  { %5733 = vmatmul.mubr.msk.bf16.vlgmr.msra.gmra.mrb[24].mxu1 %vm1114_vm6, %v6851_v8  ;;  %2615 = vmatprep.subr.bf16.mxu0 %v6120_v45  ;;  %v6142_v8 = vld [vmem:[#allocation5 + $0x4f8] ss:$12 sps:$4 sm:$0xff]  }
 0x350   :  { %5516 = vmatpush3.bf16.msra.mxu1 %v6146_v47 }
 0x351   :  { %2052 = vmatmul.mubr.bf16.vlgmr.msra.gmra.mrb[16].mxu0 %v6853_v14  ;;  %5517 = vmatprep.subr.bf16.mxu1 %v6150_v48  ;;  %v6159_v14 = vld [vmem:[#allocation5 + $0x544] ss:$12 sps:$4 sm:$0xff]   ;;  %v2109_v48 = vrot.slane %v6877_v36, %v6800_v42 }
 0x352   :  { %2616 = vmatpush1.bf16.msra.mxu0 %v6118_v49 }
 0x353   :  { %2617 = vmatprep.subr.bf16.mxu0 %v6123_v50 }
 0x354   :  { %5518 = vmatpush3.bf16.msra.mxu1 %v6151_v51 }
 0x355   :  { %5519 = vmatprep.subr.bf16.mxu1 %v6155_v52  ;;  %v6885_v52 = vstv %s5124_s15 }
 0x356   :  { %2618 = vmatpush1.bf16.msra.mxu0 %v6121_v53 }
 0x357   :  { %2619 = vmatprep.subr.bf16.mxu0 %v6126_v54 }
 0x358   :  { %5520 = vmatpush3.bf16.msra.mxu1 %v6156_v55 }
 0x359   :  { %5521 = vmatprep.subr.bf16.mxu1 %v6160_v56 }
 0x35a   :  { %2620 = vmatpush1.bf16.msra.mxu0 %v6124_v57 }
 0x35b   :  { %2621 = vmatprep.subr.bf16.mxu0 %v6129_v58 }
 0x35c   :  { %5522 = vmatpush3.bf16.msra.mxu1 %v6161_v59  ;;  %v6182_v59 = vld [vmem:[#allocation5 + $0x5b8] ss:$12 sps:$4 sm:$0xff]  }
 0x35d   :  { %5523 = vmatprep.subr.bf16.mxu1 %v6165_v17 }
 0x35e   :  { %2622 = vmatpush1.bf16.msra.mxu0 %v6127_v60  ;;  %v6185_v60 = vld [vmem:[#allocation5 + $0x5c0] ss:$12 sps:$4 sm:$0xff]  }
 0x35f   :  { %2623 = vmatprep.subr.bf16.mxu0 %v6132_v61 }
 0x360   :  { %5524 = vmatpush3.bf16.msra.mxu1 %v6166_v19 }
 0x361   :  { %5525 = vmatprep.subr.bf16.mxu1 %v6170_v22  ;;  %v6202_v22 = vld [vmem:[#allocation5 + $0x630] ss:$12 sps:$4 sm:$0xff]  }
 0x362   :  { %2624 = vmatpush1.bf16.msra.mxu0 %v6130_v62  ;;  %v6188_v62 = vld [vmem:[#allocation5 + $0x5d4] ss:$12 sps:$4 sm:$0xff]  }
 0x363   :  { %2625 = vmatprep.subr.bf16.mxu0 %v6135_v63  ;;  %v6186_v63 = vld [vmem:[#allocation5 + $0x5d0] ss:$12 sps:$4 sm:$0xff]  }
 0x364   :  { %5526 = vmatpush3.bf16.msra.mxu1 %v6171_v25 }
 0x365   :  { %5527 = vmatprep.subr.bf16.mxu1 %v6175_v27 }
 0x366   :  { %2626 = vmatpush1.bf16.msra.mxu0 %v6133_v0  ;;  %v6189_v0 = vld [vmem:[#allocation5 + $0x5d8] ss:$12 sps:$4 sm:$0xff]  }
 0x367   :  { %2627 = vmatprep.subr.bf16.mxu0 %v6138_v1  ;;  %v6192_v1 = vld [vmem:[#allocation5 + $0x5ec] ss:$12 sps:$4 sm:$0xff]  }
 0x368   :  { %5528 = vmatpush3.bf16.msra.mxu1 %v6176_v29  ;;  %v6208_v29 = vld [vmem:[#allocation5 + $0x650] ss:$0 sps:$4 sm:$0xff]  }
 0x369   :  { %5529 = vmatprep.subr.bf16.mxu1 %v6180_v31 }
 0x36a   :  { %2628 = vmatpush1.bf16.msra.mxu0 %v6136_v4  ;;  %v6190_v4 = vld [vmem:[#allocation5 + $0x5e8] ss:$12 sps:$4 sm:$0xff]  }
 0x36b   :  { %2629 = vmatprep.subr.bf16.mxu0 %v6141_v5  ;;  %v6193_v5 = vld [vmem:[#allocation5 + $0x5f0] ss:$12 sps:$4 sm:$0xff]  }
 0x36c   :  { %5530 = vmatpush3.bf16.msra.mxu1 %v6181_v33 }
 0x36d   :  { %5736 = vmatprep.subr.bf16.mxu1 %v6612_v3 }
 0x36e   :  { %2630 = vmatpush1.bf16.msra.mxu0 %v6139_v6  ;;  %v6196_v6 = vld [vmem:[#allocation5 + $0x604] ss:$12 sps:$4 sm:$0xff]  }
 0x36f   :  { %2631 = vmatprep.subr.bf16.mxu0 %v6144_v7  ;;  %v6194_v7 = vld [vmem:[#allocation5 + $0x600] ss:$12 sps:$4 sm:$0xff]  }
 0x372   :  { %2632 = vmatpush1.bf16.msra.mxu0 %v6142_v8  ;;  %v6197_v8 = vld [vmem:[#allocation5 + $0x608] ss:$12 sps:$4 sm:$0xff]  }
 0x373   :  { %2633 = vmatprep.subr.bf16.mxu0 %v6149_v10  ;;  %v6200_v10 = vld [vmem:[#allocation5 + $0x61c] ss:$12 sps:$4 sm:$0xff]  }
 0x376   :  { %2634 = vmatpush1.bf16.msra.mxu0 %v6147_v11  ;;  %v6198_v11 = vld [vmem:[#allocation5 + $0x618] ss:$12 sps:$4 sm:$0xff]  }
 0x377   :  { %2635 = vmatprep.subr.bf16.mxu0 %v6154_v12  ;;  %v6201_v12 = vld [vmem:[#allocation5 + $0x620] ss:$12 sps:$4 sm:$0xff]  }
 0x37a   :  { %2636 = vmatpush1.bf16.msra.mxu0 %v6152_v13 }
 0x37b   :  { %2637 = vmatprep.subr.bf16.mxu0 %v6159_v14  ;;  %v6204_v14 = vld [vmem:[#allocation5 + $0x634] ss:$12 sps:$4 sm:$0xff]  }
 0x37e   :  { %2638 = vmatpush1.bf16.msra.mxu0 %v6157_v15 }
 0x37f   :  { %2639 = vmatprep.subr.bf16.mxu0 %v6164_v16  ;;  %v2220_v16 = vld [vmem:[#allocation5 + $0x648] sm:$0xff] }
 0x380   :  { %v5192_v27 = vcombine.high %v2220_v16, %v2220_v16 }
 0x382   :  { %2640 = vmatpush1.bf16.msra.mxu0 %v6162_v18 }
 0x383   :  { %2641 = vmatprep.subr.bf16.mxu0 %v6169_v20 }
 0x386   :  { %2642 = vmatpush1.bf16.msra.mxu0 %v6167_v24  ;;  %v6205_v24 = vld [vmem:[#allocation5 + $0x638] ss:$12 sps:$4 sm:$0xff]  }
 0x387   :  { %2643 = vmatprep.subr.bf16.mxu0 %v6174_v26 }
 0x38a   :  { %2644 = vmatpush1.bf16.msra.mxu0 %v6172_v28  ;;  %v5191_v28 = vcombine.low %v2220_v16, %v2220_v16  ;;  %v6260_v16 = vld [vmem:[#allocation5 + $0x790] ss:$12 sps:$4 sm:$0xff]  }
 0x38b   :  { %2645 = vmatprep.subr.bf16.mxu0 %v6179_v30 }
 0x38e   :  { %2646 = vmatpush1.bf16.msra.mxu0 %v6177_v32  ;;  %v2113_v32 = vrot.slane %v6877_v36, %v6815_v9 }
 0x38f   :  { %2656 = vmatprep.subr.bf16.mxu0 %v6184_v34  ;;  %v2607_v34 = vsel %vm1118_vm4, %v5191_v28, 0  ;;  %v6272_v28 = vld [vmem:[#allocation5 + $0x704] ss:$12 sps:$4 sm:$0xff]  }
 0x404   :  { %v2012_v35 = vpop.f32.mrb[12].mxu0 }
 0x405   :  { %v2014_v37 = vpop.f32.mrb[13].mxu0 }
 0x406   :  { %v1971_v39 = vpop.f32.mrb[20].mxu1  ;;  %v2016_v41 = vpop.f32.mrb[14].mxu0 }
 0x407   :  { %v1972_v43 = vadd.f32 %v1971_v39, %v6862_v21  ;;  %v1973_v45 = vpop.f32.mrb[21].mxu1  ;;  %v2017_v46 = vpop.f32.mrb[15].mxu0  ;;  %v6209_v41 = vld [vmem:[#allocation5 + $0x654] ss:$12 sps:$4 sm:$0xff]  }
 0x408   :  { %v1974_v47 = vadd.f32 %v1973_v45, %v6864_v23  ;;  %v1975_v49 = vpop.f32.mrb[22].mxu1  ;;  %v6212_v45 = vld [vmem:[#allocation5 + $0x66c] ss:$12 sps:$4 sm:$0xff]   ;;  %v6217_v46 = vld [vmem:[#allocation5 + $0x688] ss:$12 sps:$4 sm:$0xff]  }
 0x409   :  { %v2013_v50 = vadd.f32 %v2012_v35, %v1972_v43  ;;  %v1976_v51 = vpop.f32.mrb[23].mxu1  ;;  %v2613_v35 = vsel %vm1118_vm4, %v6208_v29, 0  ;;  %v6218_v49 = vld [vmem:[#allocation5 + $0x69c] ss:$12 sps:$4 sm:$0xff]   ;;  %v6275_v29 = vld [vmem:[#allocation5 + $0x7d8] ss:$12 sps:$4 sm:$0xff]  }
 0x40a   :  { %v2015_v53 = vadd.f32 %v2014_v37, %v1974_v47  ;;  %v6211_v37 = vld [vmem:[#allocation5 + $0x658] ss:$12 sps:$4 sm:$0xff]   ;;  %v6221_v51 = vld [vmem:[#allocation5 + $0x6b4] ss:$12 sps:$4 sm:$0xff]  }
 0x40b   :  { %v2117_v54 = vadd.f32 %v2105_v44, %v2013_v50  ;;  %v6214_v44 = vld [vmem:[#allocation5 + $0x670] ss:$12 sps:$4 sm:$0xff]   ;;  %v6223_v50 = vld [vmem:[#allocation5 + $0x6b8] ss:$12 sps:$4 sm:$0xff]  }
 0x40c   :  { %v2118_v55 = vadd.f32 %v2109_v48, %v2015_v53  ;;  %v6215_v47 = vld [vmem:[#allocation5 + $0x684] ss:$12 sps:$4 sm:$0xff]   ;;  %v6220_v48 = vld [vmem:[#allocation5 + $0x6a0] ss:$12 sps:$4 sm:$0xff]  }
 0x40d   :  { %vm2121_vm11 = vcmp.ge.f32.partialorder %v2117_v54, 0.0  ;;  %v2125_v21 = vmul.f32 %v6885_v52, %v2117_v54  ;;  %v6224_v53 = vld [vmem:[#allocation5 + $0x6cc] ss:$12 sps:$4 sm:$0xff]  }
 0x40e   :  { %vm2122_vm12 = vcmp.ge.f32.partialorder %v2118_v55, 0.0  ;;  %v2126_v56 = vmul.f32 %v6885_v52, %v2118_v55 }
 0x40f   :  { %v2128_v57 = vsel %vm2121_vm11, %v2117_v54, %v2125_v21  ;;  %v6229_v54 = vld [vmem:[#allocation5 + $0x6e8] ss:$12 sps:$4 sm:$0xff]   ;;  %v6232_v21 = vld [vmem:[#allocation5 + $0x700] ss:$12 sps:$4 sm:$0xff]  }
 0x410   :  { %v2129_v58 = vsel %vm2122_vm12, %v2118_v55, %v2126_v56  ;;  %v2222_v61 = vpack.c.bf16 %v2128_v57, %v2128_v57  ;;  %v6227_v55 = vld [vmem:[#allocation5 + $0x6e4] ss:$12 sps:$4 sm:$0xff]   ;;  %v6230_v56 = vld [vmem:[#allocation5 + $0x6fc] ss:$12 sps:$4 sm:$0xff]  }
 0x411   :  { %v2223_v23 = vpack.c.bf16 %v2129_v58, %v2129_v58  ;;  %v6235_v57 = vld [vmem:[#allocation5 + $0x718] ss:$12 sps:$4 sm:$0xff]   ;;  %v6236_v58 = vld [vmem:[#allocation5 + $0x71c] ss:$12 sps:$4 sm:$0xff]  }
 0x413   :  { %2647 = vmatprep.mubr.bf16.mxu0 %v2223_v23  ;;  %2729 = vmatprep.mubr.bf16.mxu1 %v2223_v23  ;;  %v6237_v23 = vld [vmem:[#allocation5 + $0x65c] ss:$12 sps:$4 sm:$0xff]  }
 0x414   :  { %2648 = vmatmul.mubr.bf16.vlgmr.msra.gmra.mrb[20].mxu0 %v2222_v61  ;;  %2730 = vmatmul.mubr.bf16.vlgmr.msra.gmra.mrb[28].mxu1 %v2222_v61  ;;  %v6240_v61 = vld [vmem:[#allocation5 + $0x730] ss:$12 sps:$4 sm:$0xff]  }
 0x415   :  { %2657 = vmatpush1.bf16.msra.mxu0 %v6182_v59  ;;  %5737 = vmatpush3.bf16.msra.mxu1 %v6185_v60  ;;  %v6233_v59 = vld [vmem:[#allocation5 + $0x714] ss:$12 sps:$4 sm:$0xff]  }
 0x416   :  { %2658 = vmatprep.subr.bf16.mxu0 %v6188_v62  ;;  %5738 = vmatprep.subr.bf16.mxu1 %v6612_v3  ;;  %v6241_v60 = vld [vmem:[#allocation5 + $0x734] ss:$12 sps:$4 sm:$0xff]  }
 0x417   :  { %2688 = vmatprep.mubr.bf16.mxu0 %v6611_v2  ;;  %5750 = vmatprep.mubr.msk.bf16.mxu1 %vm6613_vm0, %v6612_v3  ;;  %v6242_v62 = vld [vmem:[#allocation5 + $0x674] ss:$12 sps:$4 sm:$0xff]  }
 0x419   :  { %2659 = vmatpush1.bf16.msra.mxu0 %v6186_v63  ;;  %5739 = vmatpush3.bf16.msra.mxu1 %v6189_v0  ;;  %v6246_v63 = vld [vmem:[#allocation5 + $0x74c] ss:$12 sps:$4 sm:$0xff]  }
 0x41a   :  { %2660 = vmatprep.subr.bf16.mxu0 %v6192_v1  ;;  %5740 = vmatprep.subr.bf16.mxu1 %v6612_v3  ;;  %v6238_v0 = vld [vmem:[#allocation5 + $0x72c] ss:$12 sps:$4 sm:$0xff]   ;;  %v6245_v1 = vld [vmem:[#allocation5 + $0x748] ss:$12 sps:$4 sm:$0xff]  }
 0x41d   :  { %2661 = vmatpush1.bf16.msra.mxu0 %v6190_v4  ;;  %5741 = vmatpush3.bf16.msra.mxu1 %v6193_v5  ;;  %v6247_v4 = vld [vmem:[#allocation5 + $0x68c] ss:$12 sps:$4 sm:$0xff]   ;;  %v6251_v5 = vld [vmem:[#allocation5 + $0x764] ss:$12 sps:$4 sm:$0xff]  }
 0x41e   :  { %2662 = vmatprep.subr.bf16.mxu0 %v6196_v6  ;;  %5742 = vmatprep.subr.bf16.mxu1 %v6612_v3  ;;  %v6243_v6 = vld [vmem:[#allocation5 + $0x744] ss:$12 sps:$4 sm:$0xff]  }
 0x421   :  { %2663 = vmatpush1.bf16.msra.mxu0 %v6194_v7  ;;  %5743 = vmatpush3.bf16.msra.mxu1 %v6197_v8  ;;  %v6250_v7 = vld [vmem:[#allocation5 + $0x760] ss:$12 sps:$4 sm:$0xff]   ;;  %v6252_v8 = vld [vmem:[#allocation5 + $0x6a4] ss:$12 sps:$4 sm:$0xff]  }
 0x422   :  { %v2093_v13 = vpop.f32.mrb[24].mxu1  ;;  %2664 = vmatprep.subr.bf16.mxu0 %v6200_v10  ;;  %5744 = vmatprep.subr.bf16.mxu1 %v6612_v3  ;;  %v6256_v10 = vld [vmem:[#allocation5 + $0x77c] ss:$12 sps:$4 sm:$0xff]  }
 0x423   :  { %v5734_v15 = vpop.f32.mrb[25].mxu1 }
 0x424   :  { %v5501_v17 = vpop.f32.mrb[16].mxu0  ;;  %v2096_v18 = vpop.f32.mrb[26].mxu1  ;;  %v6253_v15 = vld [vmem:[#allocation5 + $0x774] ss:$12 sps:$4 sm:$0xff]  }
 0x425   :  { %v5502_v19 = vpop.f32.mrb[17].mxu0  ;;  %v5735_v20 = vpop.f32.mrb[27].mxu1  ;;  %2665 = vmatpush1.bf16.msra.mxu0 %v6198_v11  ;;  %5745 = vmatpush3.bf16.msra.mxu1 %v6201_v12  ;;  %v6248_v11 = vld [vmem:[#allocation5 + $0x75c] ss:$12 sps:$4 sm:$0xff]   ;;  %v6255_v12 = vld [vmem:[#allocation5 + $0x778] ss:$12 sps:$4 sm:$0xff]  }
 0x426   :  { %v5503_v25 = vadd.f32 %v5502_v19, %v5501_v17  ;;  %v5504_v26 = vpop.f32.mrb[18].mxu0  ;;  %2666 = vmatprep.subr.bf16.mxu0 %v6204_v14  ;;  %5746 = vmatprep.subr.bf16.mxu1 %v6612_v3  ;;  %v6261_v14 = vld [vmem:[#allocation5 + $0x794] ss:$12 sps:$4 sm:$0xff]   ;;  %v6258_v18 = vld [vmem:[#allocation5 + $0x78c] ss:$12 sps:$4 sm:$0xff]  }
 0x427   :  { %v5505_v30 = vpop.f32.mrb[19].mxu0  ;;  %v6262_v17 = vld [vmem:[#allocation5 + $0x6d4] ss:$12 sps:$4 sm:$0xff]   ;;  %v6266_v20 = vld [vmem:[#allocation5 + $0x7ac] ss:$12 sps:$4 sm:$0xff]  }
 0x428   :  { %v2054_v31 = vadd.f32 %v5503_v25, %v6871_v38  ;;  %v6265_v19 = vld [vmem:[#allocation5 + $0x7a8] ss:$12 sps:$4 sm:$0xff]   ;;  %v6270_v25 = vld [vmem:[#allocation5 + $0x7c0] ss:$12 sps:$4 sm:$0xff]   ;;  %v6271_v26 = vld [vmem:[#allocation5 + $0x7c4] ss:$12 sps:$4 sm:$0xff]  }
 0x429   :  { %2667 = vmatpush1.bf16.msra.mxu0 %v6202_v22  ;;  %5747 = vmatpush3.bf16.msra.mxu1 %v6205_v24  ;;  %v6263_v22 = vld [vmem:[#allocation5 + $0x7a4] ss:$12 sps:$4 sm:$0xff]   ;;  %v6267_v24 = vld [vmem:[#allocation5 + $0x6ec] ss:$12 sps:$4 sm:$0xff]  }
 0x42a   :  { %v2094_v33 = vadd.f32 %v2093_v13, %v2054_v31  ;;  %5194 = vmatprep.subr.msk.bf16.mxu0 %vm1118_vm4, %v5192_v27  ;;  %5748 = vmatprep.subr.bf16.mxu1 %v6612_v3  ;;  %v6257_v13 = vld [vmem:[#allocation5 + $0x6bc] ss:$12 sps:$4 sm:$0xff]  }
 0x42b   :  { %v6268_v27 = vld [vmem:[#allocation5 + $0x7bc] ss:$12 sps:$4 sm:$0xff]  }
 0x42c   :  { %v2119_v39 = vadd.f32 %v2113_v32, %v2094_v33 }
 0x42d   :  { %2669 = vmatpush1.bf16.msra.mxu0 %v2607_v34  ;;  %5749 = vmatpush3.bf16.msra.mxu1 %v2613_v35  ;;  %v2226_v35 = vld [vmem:[#allocation8 + $0x3] ss:$8 sm:$0x7] }
 0x42e   :  { %vm2123_vm13 = vcmp.ge.f32.partialorder %v2119_v39, 0.0  ;;  %v2127_v38 = vmul.f32 %v6885_v52, %v2119_v39  ;;  %3272 = vmatprep.subr.bf16.mxu1 %v6211_v37  ;;  %v6226_v52 = vld [vmem:[#allocation5 + $0x6d0] ss:$12 sps:$4 sm:$0xff]   ;;  %5545 = vmatprep.subr.bf16.mxu0 %v6236_v58  ;;  %v2239_v37 = vrot.slane %v2226_v35, %v6815_v9  ;;  %v6273_v58 = vld [vmem:[#allocation5 + $0x7d4] ss:$12 sps:$4 sm:$0xff]  }
 0x430   :  { %v2130_v36 = vsel %vm2123_vm13, %v2119_v39, %v2127_v38  ;;  %v2231_v39 = vrot.slane %v2226_v35, %v6793_v40  ;;  %v2235_v38 = vrot.slane %v2226_v35, %v6800_v42  ;;  %v6309_v35 = vld [vmem:[#allocation7 + $0xa8] ss:$12 sps:$4 sm:$0xff]  }
 0x431   :  { %v2224_v43 = vpack.c.bf16 %v2130_v36, %v2130_v36 }
 0x433   :  { %5195 = vmatmul.mubr.msk.bf16.vlgmr.msra.gmra.mrb[20].mxu0 %vm1114_vm6, %v2224_v43  ;;  %5751 = vmatmul.mubr.msk.bf16.vlgmr.msra.gmra.mrb[32].mxu1 %vm1114_vm6, %v2224_v43  ;;  %v6911_v43 = vstv %s5197_s16 }
 0x434   :  { %3273 = vmatpush1.bf16.msra.mxu1 %v6209_v41  ;;  %5546 = vmatpush3.bf16.msra.mxu0 %v6237_v23  ;;  %v6276_v23 = vld [vmem:[#allocation5 + $0x7dc] ss:$12 sps:$4 sm:$0xff]  }
 0x435   :  { %3274 = vmatprep.subr.bf16.mxu1 %v6214_v44  ;;  %5547 = vmatprep.subr.bf16.mxu0 %v6241_v60  ;;  %v6279_v60 = vld [vmem:[#allocation5 + $0x7f0] ss:$12 sps:$4 sm:$0xff]  }
 0x438   :  { %3275 = vmatpush1.bf16.msra.mxu1 %v6212_v45  ;;  %5548 = vmatpush3.bf16.msra.mxu0 %v6242_v62  ;;  %v6280_v62 = vld [vmem:[#allocation5 + $0x7f4] ss:$12 sps:$4 sm:$0xff]  }
 0x439   :  { %3276 = vmatprep.subr.bf16.mxu1 %v6217_v46  ;;  %5549 = vmatprep.subr.bf16.mxu0 %v6246_v63  ;;  %v6283_v63 = vld [vmem:[#allocation5 + $0x808] ss:$12 sps:$4 sm:$0xff]  }
 0x43c   :  { %3277 = vmatpush1.bf16.msra.mxu1 %v6215_v47  ;;  %5550 = vmatpush3.bf16.msra.mxu0 %v6247_v4  ;;  %v6287_v4 = vld [vmem:[#allocation5 + $0x820] ss:$12 sps:$4 sm:$0xff]  }
 0x43d   :  { %3278 = vmatprep.subr.bf16.mxu1 %v6220_v48  ;;  %5551 = vmatprep.subr.bf16.mxu0 %v6251_v5  ;;  %v6285_v5 = vld [vmem:[#allocation5 + $0x81c] ss:$12 sps:$4 sm:$0xff]  }
 0x440   :  { %3279 = vmatpush1.bf16.msra.mxu1 %v6218_v49  ;;  %5552 = vmatpush3.bf16.msra.mxu0 %v6252_v8  ;;  %v6289_v8 = vld [vmem:[#allocation5 + $0x834] ss:$12 sps:$4 sm:$0xff]  }
 0x441   :  { %3280 = vmatprep.subr.bf16.mxu1 %v6223_v50  ;;  %5553 = vmatprep.subr.bf16.mxu0 %v6256_v10  ;;  %v6292_v10 = vld [vmem:[#allocation5 + $0x83c] ss:$12 sps:$4 sm:$0xff]  }
 0x444   :  { %3281 = vmatpush1.bf16.msra.mxu1 %v6221_v51  ;;  %5554 = vmatpush3.bf16.msra.mxu0 %v6257_v13  ;;  %v6293_v13 = vld [vmem:[#allocation5 + $0x84c] ss:$12 sps:$4 sm:$0xff]  }
 0x445   :  { %3282 = vmatprep.subr.bf16.mxu1 %v6226_v52  ;;  %5555 = vmatprep.subr.bf16.mxu0 %v6261_v14  ;;  %v6296_v14 = vld [vmem:[#allocation5 + $0x854] ss:$12 sps:$4 sm:$0xff]  }
 0x448   :  { %3283 = vmatpush1.bf16.msra.mxu1 %v6224_v53  ;;  %5556 = vmatpush3.bf16.msra.mxu0 %v6262_v17  ;;  %v6299_v17 = vld [vmem:[#allocation5 + $0x86c] ss:$0 sps:$4 sm:$0xff]  }
 0x449   :  { %3284 = vmatprep.subr.bf16.mxu1 %v6229_v54  ;;  %5557 = vmatprep.subr.bf16.mxu0 %v6266_v20  ;;  %v3270_v20 = vsel %vm1118_vm4, %v6299_v17, 0  ;;  %v6378_v17 = vld [vmem:[#allocation5 + $0x9c4] ss:$12 sps:$4 sm:$0xff]  }
 0x44c   :  { %3285 = vmatpush1.bf16.msra.mxu1 %v6227_v55  ;;  %5558 = vmatpush3.bf16.msra.mxu0 %v6267_v24 }
 0x44d   :  { %3286 = vmatprep.subr.bf16.mxu1 %v6232_v21  ;;  %5559 = vmatprep.subr.bf16.mxu0 %v6271_v26 }
 0x450   :  { %3287 = vmatpush1.bf16.msra.mxu1 %v6230_v56  ;;  %5560 = vmatpush3.bf16.msra.mxu0 %v6272_v28  ;;  %v6327_v28 = vld [vmem:[#allocation7 + $0x68] ss:$12 sps:$4 sm:$0xff]  }
 0x451   :  { %3288 = vmatprep.subr.bf16.mxu1 %v6235_v57  ;;  %5754 = vmatprep.subr.bf16.mxu0 %v6612_v3 }
 0x454   :  { %3289 = vmatpush1.bf16.msra.mxu1 %v6233_v59 }
 0x455   :  { %3290 = vmatprep.subr.bf16.mxu1 %v6240_v61  ;;  %v6277_v61 = vld [vmem:[#allocation5 + $0x7ec] ss:$12 sps:$4 sm:$0xff]  }
 0x458   :  { %3291 = vmatpush1.bf16.msra.mxu1 %v6238_v0  ;;  %v6281_v0 = vld [vmem:[#allocation5 + $0x804] ss:$12 sps:$4 sm:$0xff]  }
 0x459   :  { %3292 = vmatprep.subr.bf16.mxu1 %v6245_v1  ;;  %v6284_v1 = vld [vmem:[#allocation5 + $0x80c] ss:$12 sps:$4 sm:$0xff]  }
 0x45c   :  { %3293 = vmatpush1.bf16.msra.mxu1 %v6243_v6  ;;  %v6288_v6 = vld [vmem:[#allocation5 + $0x824] ss:$12 sps:$4 sm:$0xff]  }
 0x45d   :  { %3294 = vmatprep.subr.bf16.mxu1 %v6250_v7  ;;  %v6291_v7 = vld [vmem:[#allocation5 + $0x838] ss:$12 sps:$4 sm:$0xff]  }
 0x460   :  { %3295 = vmatpush1.bf16.msra.mxu1 %v6248_v11  ;;  %v6295_v11 = vld [vmem:[#allocation5 + $0x850] ss:$12 sps:$4 sm:$0xff]  }
 0x461   :  { %3296 = vmatprep.subr.bf16.mxu1 %v6255_v12  ;;  %v2877_v12 = vld [vmem:[#allocation5 + $0x864] sm:$0xff] }
 0x464   :  { %3297 = vmatpush1.bf16.msra.mxu1 %v6253_v15  ;;  %v5265_v15 = vcombine.high %v2877_v12, %v2877_v12 }
 0x465   :  { %3298 = vmatprep.subr.bf16.mxu1 %v6260_v16  ;;  %v5264_v16 = vcombine.low %v2877_v12, %v2877_v12  ;;  %v6364_v12 = vld [vmem:[#allocation5 + $0x990] ss:$12 sps:$4 sm:$0xff]  }
 0x468   :  { %3299 = vmatpush1.bf16.msra.mxu1 %v6258_v18 }
 0x469   :  { %3300 = vmatprep.subr.bf16.mxu1 %v6265_v19  ;;  %v3264_v19 = vsel %vm1118_vm4, %v5264_v16, 0  ;;  %v6370_v16 = vld [vmem:[#allocation5 + $0x9a8] ss:$12 sps:$4 sm:$0xff]  }
 0x46c   :  { %3301 = vmatpush1.bf16.msra.mxu1 %v6263_v22  ;;  %v6302_v22 = vld [vmem:[#allocation7 + $0x64] ss:$12 sps:$4 sm:$0xff]  }
 0x46d   :  { %3302 = vmatprep.subr.bf16.mxu1 %v6270_v25  ;;  %v6300_v25 = vld [vmem:[#allocation7 + $0x60] ss:$12 sps:$4 sm:$0xff]  }
 0x470   :  { %3303 = vmatpush1.bf16.msra.mxu1 %v6268_v27  ;;  %v6305_v27 = vld [vmem:[#allocation7 + $0x7c] ss:$12 sps:$4 sm:$0xff]  }
 0x471   :  { %3313 = vmatprep.subr.bf16.mxu1 %v6275_v29  ;;  %v6303_v29 = vld [vmem:[#allocation7 + $0x78] ss:$12 sps:$4 sm:$0xff]  }
 0x4e7   :  { %v5531_v30 = vpop.f32.mrb[28].mxu1 }
 0x4e8   :  { %v5532_v31 = vpop.f32.mrb[29].mxu1 }
 0x4e9   :  { %v5533_v32 = vadd.f32 %v5532_v31, %v5531_v30  ;;  %v5534_v33 = vpop.f32.mrb[30].mxu1  ;;  %v6308_v30 = vld [vmem:[#allocation7 + $0x94] ss:$12 sps:$4 sm:$0xff]  }
 0x4ea   :  { %v5535_v34 = vpop.f32.mrb[31].mxu1  ;;  %v6331_v31 = vld [vmem:[#allocation7 + $0x80] ss:$12 sps:$4 sm:$0xff]  }
 0x4eb   :  { %v2732_v36 = vadd.f32 %v5533_v32, %v2239_v37  ;;  %v6306_v32 = vld [vmem:[#allocation7 + $0x90] ss:$12 sps:$4 sm:$0xff]   ;;  %v6311_v33 = vld [vmem:[#allocation7 + $0xac] ss:$12 sps:$4 sm:$0xff]   ;;  %v3434_v37 = vld [vmem:[%s7026_s3 + $0x8] sm:$0xff]  ;;  %s5356_s3 = sld [smem:[#allocation10 + $0x4]] }
 0x4ec   :  { %v6335_v34 = vld [vmem:[#allocation7 + $0x98] ss:$12 sps:$4 sm:$0xff]  }
 0x506   :  { %v2690_v41 = vpop.f32.mrb[20].mxu0  ;;  %v2771_v44 = vpop.f32.mrb[32].mxu1 }
 0x507   :  { %v5826_v45 = vadd.f32 %v2690_v41, %v2231_v39  ;;  %v6913_v46 = vadd.f32 %v2771_v44, %v2732_v36  ;;  %v2692_v47 = vpop.f32.mrb[21].mxu0  ;;  %v5752_v48 = vpop.f32.mrb[33].mxu1  ;;  %v6314_v39 = vld [vmem:[#allocation5 + $0x874] ss:$12 sps:$4 sm:$0xff]   ;;  %v3546_v36 = vpack.c.bf16 %v3434_v37, %v3434_v37  ;;  %v6312_v41 = vld [vmem:[#allocation5 + $0x870] ss:$12 sps:$4 sm:$0xff]  }
 0x508   :  { %v5827_v49 = vadd.f32 %v2692_v47, %v2235_v38  ;;  %v2694_v50 = vpop.f32.mrb[22].mxu0  ;;  %v2774_v51 = vpop.f32.mrb[34].mxu1  ;;  %v6339_v38 = vld [vmem:[#allocation7 + $0xb0] ss:$12 sps:$4 sm:$0xff]   ;;  %v6315_v44 = vld [vmem:[#allocation5 + $0x888] ss:$12 sps:$4 sm:$0xff]  }
 0x509   :  { %vm2778_vm14 = vcmp.ge.f32.partialorder %v5826_v45, 0.0  ;;  %v2782_v52 = vmul.f32 %v5826_v45, %v6911_v43  ;;  %v2695_v53 = vpop.f32.mrb[23].mxu0  ;;  %v5753_v54 = vpop.f32.mrb[35].mxu1  ;;  %v2784_v18 = vmul.f32 %v6911_v43, %v6913_v46  ;;  %vm2780_vm1 = vcmp.ge.f32.partialorder %v6913_v46, 0.0  ;;  %v6323_v47 = vld [vmem:[#allocation5 + $0x8bc] ss:$12 sps:$4 sm:$0xff]  }
 0x50a   :  { %vm2779_vm15 = vcmp.ge.f32.partialorder %v5827_v49, 0.0  ;;  %v2783_v55 = vmul.f32 %v5827_v49, %v6911_v43  ;;  %v6317_v43 = vld [vmem:[#allocation5 + $0x88c] ss:$12 sps:$4 sm:$0xff]   ;;  %v6324_v50 = vld [vmem:[#allocation5 + $0x8d0] ss:$12 sps:$4 sm:$0xff]  }
 0x50b   :  { %v2785_v21 = vsel %vm2778_vm14, %v5826_v45, %v2782_v52  ;;  %v2787_v24 = vsel %vm2780_vm1, %v6913_v46, %v2784_v18  ;;  %v6320_v45 = vld [vmem:[#allocation5 + $0x8a4] ss:$12 sps:$4 sm:$0xff]   ;;  %v6318_v46 = vld [vmem:[#allocation5 + $0x8a0] ss:$12 sps:$4 sm:$0xff]   ;;  %v6328_v52 = vld [vmem:[#allocation5 + $0x8e8] ss:$12 sps:$4 sm:$0xff]  }
 0x50c   :  { %v2786_v56 = vsel %vm2779_vm15, %v5827_v49, %v2783_v55  ;;  %v2879_v59 = vpack.c.bf16 %v2785_v21, %v2785_v21  ;;  %v2881_v26 = vpack.c.bf16 %v2787_v24, %v2787_v24  ;;  %v6321_v48 = vld [vmem:[#allocation5 + $0x8b8] ss:$12 sps:$4 sm:$0xff]   ;;  %v6326_v49 = vld [vmem:[#allocation5 + $0x8d4] ss:$12 sps:$4 sm:$0xff]   ;;  %v6338_v55 = vld [vmem:[#allocation5 + $0x91c] ss:$12 sps:$4 sm:$0xff]  }
 0x50d   :  { %v2880_v57 = vpack.c.bf16 %v2786_v56, %v2786_v56  ;;  %v6330_v51 = vld [vmem:[#allocation5 + $0x8ec] ss:$12 sps:$4 sm:$0xff]   ;;  %v6334_v53 = vld [vmem:[#allocation5 + $0x904] ss:$12 sps:$4 sm:$0xff]   ;;  %v6342_v56 = vld [vmem:[#allocation5 + $0x934] ss:$12 sps:$4 sm:$0xff]  }
 0x50e   :  { %v6332_v54 = vld [vmem:[#allocation5 + $0x900] ss:$12 sps:$4 sm:$0xff]   ;;  %v6336_v21 = vld [vmem:[#allocation5 + $0x918] ss:$12 sps:$4 sm:$0xff]   ;;  %v6373_v18 = vld [vmem:[#allocation5 + $0xa68] ss:$12 sps:$4 sm:$0xff]  }
 0x50f   :  { %3304 = vmatprep.mubr.bf16.mxu1 %v2880_v57  ;;  %3386 = vmatprep.mubr.bf16.mxu0 %v2880_v57  ;;  %v6340_v57 = vld [vmem:[#allocation5 + $0x930] ss:$12 sps:$4 sm:$0xff]  }
 0x510   :  { %3305 = vmatmul.mubr.bf16.vlgmr.msra.gmra.mrb[36].mxu1 %v2879_v59  ;;  %3387 = vmatmul.mubr.bf16.vlgmr.msra.gmra.mrb[24].mxu0 %v2879_v59  ;;  %v6346_v59 = vld [vmem:[#allocation5 + $0x948] ss:$12 sps:$4 sm:$0xff]  }
 0x511   :  { %3314 = vmatpush1.bf16.msra.mxu1 %v6273_v58  ;;  %5755 = vmatpush3.bf16.msra.mxu0 %v6276_v23  ;;  %v6345_v58 = vld [vmem:[#allocation5 + $0x9f4] ss:$12 sps:$4 sm:$0xff]   ;;  %v6343_v23 = vld [vmem:[#allocation5 + $0x9f0] ss:$12 sps:$4 sm:$0xff]  }
 0x512   :  { %3315 = vmatprep.subr.bf16.mxu1 %v6279_v60  ;;  %5756 = vmatprep.subr.bf16.mxu0 %v6612_v3  ;;  %v6348_v60 = vld [vmem:[#allocation5 + $0x94c] ss:$12 sps:$4 sm:$0xff]  }
 0x513   :  { %3345 = vmatprep.mubr.bf16.mxu1 %v6611_v2  ;;  %5768 = vmatprep.mubr.msk.bf16.mxu0 %vm6613_vm0, %v6612_v3 }
 0x515   :  { %3316 = vmatpush1.bf16.msra.mxu1 %v6277_v61  ;;  %5757 = vmatpush3.bf16.msra.mxu0 %v6280_v62  ;;  %v6351_v61 = vld [vmem:[#allocation5 + $0xa0c] ss:$12 sps:$4 sm:$0xff]   ;;  %v6349_v62 = vld [vmem:[#allocation5 + $0xa08] ss:$12 sps:$4 sm:$0xff]  }
 0x516   :  { %3317 = vmatprep.subr.bf16.mxu1 %v6283_v63  ;;  %5758 = vmatprep.subr.bf16.mxu0 %v6612_v3  ;;  %v6354_v63 = vld [vmem:[#allocation5 + $0x964] ss:$12 sps:$4 sm:$0xff]  }
 0x519   :  { %3318 = vmatpush1.bf16.msra.mxu1 %v6281_v0  ;;  %5759 = vmatpush3.bf16.msra.mxu0 %v6284_v1  ;;  %v6357_v0 = vld [vmem:[#allocation5 + $0xa24] ss:$12 sps:$4 sm:$0xff]   ;;  %v6352_v1 = vld [vmem:[#allocation5 + $0x960] ss:$12 sps:$4 sm:$0xff]  }
 0x51a   :  { %3319 = vmatprep.subr.bf16.mxu1 %v6287_v4  ;;  %5760 = vmatprep.subr.bf16.mxu0 %v6612_v3  ;;  %v6360_v4 = vld [vmem:[#allocation5 + $0x97c] ss:$12 sps:$4 sm:$0xff]  }
 0x51d   :  { %3320 = vmatpush1.bf16.msra.mxu1 %v6285_v5  ;;  %5761 = vmatpush3.bf16.msra.mxu0 %v6288_v6  ;;  %v6355_v5 = vld [vmem:[#allocation5 + $0xa20] ss:$12 sps:$4 sm:$0xff]   ;;  %v6363_v6 = vld [vmem:[#allocation5 + $0xa3c] ss:$12 sps:$4 sm:$0xff]  }
 0x51e   :  { %3321 = vmatprep.subr.bf16.mxu1 %v6291_v7  ;;  %5762 = vmatprep.subr.bf16.mxu0 %v6612_v3  ;;  %v6358_v7 = vld [vmem:[#allocation5 + $0x978] ss:$12 sps:$4 sm:$0xff]  }
 0x521   :  { %3322 = vmatpush1.bf16.msra.mxu1 %v6289_v8  ;;  %5763 = vmatpush3.bf16.msra.mxu0 %v6292_v10  ;;  %v6366_v8 = vld [vmem:[#allocation5 + $0x994] ss:$12 sps:$4 sm:$0xff]   ;;  %v6361_v10 = vld [vmem:[#allocation5 + $0xa38] ss:$12 sps:$4 sm:$0xff]  }
 0x522   :  { %3323 = vmatprep.subr.bf16.mxu1 %v6295_v11  ;;  %5764 = vmatprep.subr.bf16.mxu0 %v6612_v3  ;;  %v6369_v11 = vld [vmem:[#allocation5 + $0xa54] ss:$12 sps:$4 sm:$0xff]  }
 0x525   :  { %3324 = vmatpush1.bf16.msra.mxu1 %v6293_v13  ;;  %5765 = vmatpush3.bf16.msra.mxu0 %v6296_v14  ;;  %v6372_v13 = vld [vmem:[#allocation5 + $0x9ac] ss:$12 sps:$4 sm:$0xff]   ;;  %v6367_v14 = vld [vmem:[#allocation5 + $0xa50] ss:$12 sps:$4 sm:$0xff]  }
 0x526   :  { %5267 = vmatprep.subr.msk.bf16.mxu1 %vm1118_vm4, %v5265_v15  ;;  %5766 = vmatprep.subr.bf16.mxu0 %v6612_v3  ;;  %v6375_v15 = vld [vmem:[#allocation5 + $0xa6c] ss:$12 sps:$4 sm:$0xff]  }
 0x529   :  { %3326 = vmatpush1.bf16.msra.mxu1 %v3264_v19  ;;  %5767 = vmatpush3.bf16.msra.mxu0 %v3270_v20  ;;  %v6376_v19 = vld [vmem:[#allocation5 + $0x9c0] ss:$12 sps:$4 sm:$0xff]  }
 0x52a   :  { %3614 = vmatprep.subr.bf16.mxu0 %v6302_v22  ;;  %5772 = vmatprep.subr.bf16.mxu1 %v6612_v3  ;;  %v3524_v20 = vld [vmem:[#allocation5 + $0xa80] sm:$0xff] }
 0x52b   :  { %v5351_v22 = vcombine.high %v3524_v20, %v3524_v20  ;;  %v5350_v24 = vcombine.low %v3524_v20, %v3524_v20  ;;  %v6405_v20 = vld [vmem:[#allocation5 + $0x9e0] ss:$12 sps:$4 sm:$0xff]  }
 0x52c   :  { %5268 = vmatmul.mubr.msk.bf16.vlgmr.msra.gmra.mrb[36].mxu1 %vm1114_vm6, %v2881_v26  ;;  %5769 = vmatmul.mubr.msk.bf16.vlgmr.msra.gmra.mrb[28].mxu0 %vm1114_vm6, %v2881_v26  ;;  %v6383_v26 = vld [vmem:[#allocation5 + $0x9dc] ss:$12 sps:$4 sm:$0xff]  }
 0x52d   :  { %3615 = vmatpush1.bf16.msra.mxu0 %v6300_v25  ;;  %3646 = vmatprep.mubr.bf16.mxu0 %v6611_v2  ;;  %v4059_v25 = vsel %vm1118_vm4, %v5350_v24, 0  ;;  %v6434_v24 = vld [vmem:[#allocation5 + $0xb54] ss:$12 sps:$4 sm:$0xff]  }
 0x52e   :  { %3616 = vmatprep.subr.bf16.mxu0 %v6305_v27  ;;  %5773 = vmatpush3.bf16.msra.mxu1 %v6327_v28  ;;  %v6381_v27 = vld [vmem:[#allocation5 + $0x9d8] ss:$12 sps:$4 sm:$0xff]  }
 0x52f   :  { %5774 = vmatprep.subr.bf16.mxu1 %v6612_v3  ;;  %5780 = vmatprep.mubr.msk.bf16.mxu1 %vm6613_vm0, %v6612_v3  ;;  %v6384_v28 = vld [vmem:[#allocation5 + $0x938] ss:$12 sps:$4 sm:$0xff]  }
 0x531   :  { %3617 = vmatpush1.bf16.msra.mxu0 %v6303_v29 }
 0x532   :  { %3618 = vmatprep.subr.bf16.mxu0 %v6308_v30  ;;  %5775 = vmatpush3.bf16.msra.mxu1 %v6331_v31 }
 0x533   :  { %5776 = vmatprep.subr.bf16.mxu1 %v6612_v3 }
 0x535   :  { %3619 = vmatpush1.bf16.msra.mxu0 %v6306_v32 }
 0x536   :  { %3620 = vmatprep.subr.bf16.mxu0 %v6311_v33  ;;  %5777 = vmatpush3.bf16.msra.mxu1 %v6335_v34  ;;  %v2883_v34 = vld [vmem:[#allocation8 + $0x4] ss:$8 sm:$0x7] }
 0x537   :  { %5778 = vmatprep.subr.bf16.mxu1 %v6612_v3  ;;  %v2888_v37 = vrot.slane %v2883_v34, %v6793_v40 }
 0x539   :  { %3621 = vmatpush1.bf16.msra.mxu0 %v6309_v35  ;;  %v2896_v35 = vrot.slane %v2883_v34, %v6815_v9 }
 0x53a   :  { %4067 = vmatprep.subr.bf16.mxu0 %v6314_v39  ;;  %5779 = vmatpush3.bf16.msra.mxu1 %v6339_v38  ;;  %v2892_v39 = vrot.slane %v2883_v34, %v6800_v42  ;;  %v6415_v34 = vld [vmem:[#allocation5 + $0xac0] ss:$12 sps:$4 sm:$0xff]  }
 0x53b   :  { %4108 = vmatprep.subr.bf16.mxu1 %v6345_v58  ;;  %v6390_v58 = vld [vmem:[#allocation5 + $0x968] ss:$12 sps:$4 sm:$0xff]  }
 0x53c   :  { %5282 = vmatmul.mubr.msk.bf16.vlgmr.msra.gmra.mrb[32].mxu0 %vm1480_vm7, %v3546_v36 }
 0x53d   :  { %4068 = vmatpush1.bf16.msra.mxu0 %v6312_v41  ;;  %5781 = vmatmul.mubr.msk.bf16.vlgmr.msra.gmra.mrb[40].mxu1 %vm1480_vm7, %v3546_v36 }
 0x53e   :  { %4069 = vmatprep.subr.bf16.mxu0 %v6317_v43  ;;  %4140 = vmatprep.mubr.bf16.mxu1 %v6611_v2 }
 0x53f   :  { %4109 = vmatpush1.bf16.msra.mxu1 %v6343_v23  ;;  %v6389_v23 = vld [vmem:[#allocation5 + $0xa10] ss:$12 sps:$4 sm:$0xff]  }
 0x540   :  { %4110 = vmatprep.subr.bf16.mxu1 %v6351_v61  ;;  %v6392_v61 = vld [vmem:[#allocation5 + $0xa28] ss:$12 sps:$4 sm:$0xff]  }
 0x541   :  { %4070 = vmatpush1.bf16.msra.mxu0 %v6315_v44 }
 0x542   :  { %4071 = vmatprep.subr.bf16.mxu0 %v6320_v45 }
 0x543   :  { %4111 = vmatpush1.bf16.msra.mxu1 %v6349_v62  ;;  %v6394_v62 = vld [vmem:[#allocation5 + $0x8c0] ss:$12 sps:$4 sm:$0xff]  }
 0x544   :  { %4112 = vmatprep.subr.bf16.mxu1 %v6357_v0  ;;  %v6395_v0 = vld [vmem:[#allocation5 + $0xa40] ss:$12 sps:$4 sm:$0xff]  }
 0x545   :  { %4072 = vmatpush1.bf16.msra.mxu0 %v6318_v46 }
 0x546   :  { %4073 = vmatprep.subr.bf16.mxu0 %v6323_v47 }
 0x547   :  { %4113 = vmatpush1.bf16.msra.mxu1 %v6355_v5 }
 0x548   :  { %4114 = vmatprep.subr.bf16.mxu1 %v6363_v6  ;;  %v6397_v6 = vld [vmem:[#allocation5 + $0x8d8] ss:$12 sps:$4 sm:$0xff]  }
 0x549   :  { %4074 = vmatpush1.bf16.msra.mxu0 %v6321_v48 }
 0x54a   :  { %4075 = vmatprep.subr.bf16.mxu0 %v6326_v49 }
 0x54b   :  { %4115 = vmatpush1.bf16.msra.mxu1 %v6361_v10  ;;  %v6399_v10 = vld [vmem:[#allocation5 + $0x9b0] ss:$12 sps:$4 sm:$0xff]  }
 0x54c   :  { %4116 = vmatprep.subr.bf16.mxu1 %v6369_v11 }
 0x54d   :  { %4076 = vmatpush1.bf16.msra.mxu0 %v6324_v50  ;;  %v6385_v50 = vld [vmem:[#allocation5 + $0x878] ss:$12 sps:$4 sm:$0xff]  }
 0x54e   :  { %4077 = vmatprep.subr.bf16.mxu0 %v6330_v51 }
 0x54f   :  { %4117 = vmatpush1.bf16.msra.mxu1 %v6367_v14 }
 0x550   :  { %4118 = vmatprep.subr.bf16.mxu1 %v6375_v15  ;;  %v6400_v15 = vld [vmem:[#allocation5 + $0x8f0] ss:$12 sps:$4 sm:$0xff]  }
 0x551   :  { %4078 = vmatpush1.bf16.msra.mxu0 %v6328_v52 }
 0x552   :  { %4079 = vmatprep.subr.bf16.mxu0 %v6334_v53 }
 0x553   :  { %4119 = vmatpush1.bf16.msra.mxu1 %v6373_v18  ;;  %v6404_v18 = vld [vmem:[#allocation5 + $0xa88] ss:$0 sps:$4 sm:$0xff]  }
 0x554   :  { %5353 = vmatprep.subr.msk.bf16.mxu1 %vm1118_vm4, %v5351_v22  ;;  %v4065_v22 = vsel %vm1118_vm4, %v6404_v18, 0 }
 0x555   :  { %4080 = vmatpush1.bf16.msra.mxu0 %v6332_v54 }
 0x556   :  { %4081 = vmatprep.subr.bf16.mxu0 %v6338_v55  ;;  %v6386_v55 = vld [vmem:[#allocation5 + $0x9f8] ss:$12 sps:$4 sm:$0xff]  }
 0x557   :  { %4121 = vmatpush1.bf16.msra.mxu1 %v4059_v25  ;;  %v6406_v25 = vld [vmem:[#allocation5 + $0x920] ss:$12 sps:$4 sm:$0xff]  }
 0x558   :  { %5580 = vmatprep.subr.bf16.mxu1 %v6384_v28  ;;  %v6439_v28 = vld [vmem:[#allocation5 + $0xb6c] ss:$12 sps:$4 sm:$0xff]  }
 0x559   :  { %4082 = vmatpush1.bf16.msra.mxu0 %v6336_v21  ;;  %v6387_v21 = vld [vmem:[#allocation5 + $0x950] ss:$12 sps:$4 sm:$0xff]  }
 0x55a   :  { %4083 = vmatprep.subr.bf16.mxu0 %v6342_v56 }
 0x55d   :  { %4084 = vmatpush1.bf16.msra.mxu0 %v6340_v57  ;;  %v6388_v57 = vld [vmem:[#allocation5 + $0x890] ss:$12 sps:$4 sm:$0xff]  }
 0x55e   :  { %4085 = vmatprep.subr.bf16.mxu0 %v6348_v60  ;;  %v6393_v60 = vld [vmem:[#allocation5 + $0x980] ss:$12 sps:$4 sm:$0xff]  }
 0x561   :  { %4086 = vmatpush1.bf16.msra.mxu0 %v6346_v59  ;;  %v6391_v59 = vld [vmem:[#allocation5 + $0x8a8] ss:$12 sps:$4 sm:$0xff]  }
 0x562   :  { %4087 = vmatprep.subr.bf16.mxu0 %v6354_v63  ;;  %v6396_v63 = vld [vmem:[#allocation5 + $0x998] ss:$12 sps:$4 sm:$0xff]  }
 0x565   :  { %4088 = vmatpush1.bf16.msra.mxu0 %v6352_v1 }
 0x566   :  { %4089 = vmatprep.subr.bf16.mxu0 %v6360_v4 }
 0x569   :  { %4090 = vmatpush1.bf16.msra.mxu0 %v6358_v7 }
 0x56a   :  { %4091 = vmatprep.subr.bf16.mxu0 %v6366_v8 }
 0x56d   :  { %4092 = vmatpush1.bf16.msra.mxu0 %v6364_v12 }
 0x56e   :  { %4093 = vmatprep.subr.bf16.mxu0 %v6372_v13  ;;  %v6398_v13 = vld [vmem:[#allocation5 + $0xa58] ss:$12 sps:$4 sm:$0xff]  }
 0x571   :  { %4094 = vmatpush1.bf16.msra.mxu0 %v6370_v16  ;;  %v6402_v16 = vld [vmem:[#allocation5 + $0x9c8] ss:$12 sps:$4 sm:$0xff]  }
 0x572   :  { %4095 = vmatprep.subr.bf16.mxu0 %v6378_v17  ;;  %v6401_v17 = vld [vmem:[#allocation5 + $0xa70] ss:$12 sps:$4 sm:$0xff]  }
 0x575   :  { %4096 = vmatpush1.bf16.msra.mxu0 %v6376_v19  ;;  %v6403_v19 = vld [vmem:[#allocation5 + $0x908] ss:$12 sps:$4 sm:$0xff]  }
 0x576   :  { %4097 = vmatprep.subr.bf16.mxu0 %v6383_v26  ;;  %v6409_v26 = vld [vmem:[#allocation5 + $0xa90] ss:$12 sps:$4 sm:$0xff]  }
 0x579   :  { %4098 = vmatpush1.bf16.msra.mxu0 %v6381_v27  ;;  %v6435_v27 = vld [vmem:[#allocation5 + $0xa94] ss:$12 sps:$4 sm:$0xff]  }
 0x57a   :  { %5784 = vmatprep.subr.bf16.mxu0 %v6612_v3 }
 0x5e3   :  { %v5561_v29 = vpop.f32.mrb[24].mxu0 }
 0x5e4   :  { %v5562_v30 = vpop.f32.mrb[25].mxu0 }
 0x5e5   :  { %v5563_v31 = vadd.f32 %v5562_v30, %v5561_v29  ;;  %v5564_v32 = vpop.f32.mrb[26].mxu0  ;;  %v6407_v29 = vld [vmem:[#allocation5 + $0xa8c] ss:$12 sps:$4 sm:$0xff]   ;;  %v6412_v30 = vld [vmem:[#allocation5 + $0xaa8] ss:$12 sps:$4 sm:$0xff]  }
 0x5e6   :  { %v5565_v33 = vpop.f32.mrb[27].mxu0  ;;  %v6444_v32 = vld [vmem:[#allocation5 + $0xb84] ss:$12 sps:$4 sm:$0xff]  }
 0x5e7   :  { %v3389_v38 = vadd.f32 %v5563_v31, %v2896_v35  ;;  %v6440_v31 = vld [vmem:[#allocation5 + $0xaac] ss:$12 sps:$4 sm:$0xff]   ;;  %v6410_v33 = vld [vmem:[#allocation5 + $0xaa4] ss:$12 sps:$4 sm:$0xff]  }
 0x5e8   :  { %v6445_v35 = vld [vmem:[#allocation5 + $0xac4] ss:$12 sps:$4 sm:$0xff]  }
 0x5ff   :  { %v3347_v36 = vpop.f32.mrb[36].mxu1  ;;  %v3428_v41 = vpop.f32.mrb[28].mxu0 }
 0x600   :  { %v5828_v43 = vadd.f32 %v3347_v36, %v2888_v37  ;;  %v3429_v44 = vadd.f32 %v3428_v41, %v3389_v38  ;;  %v3349_v45 = vpop.f32.mrb[37].mxu1  ;;  %v5770_v46 = vpop.f32.mrb[29].mxu0  ;;  %v6449_v37 = vld [vmem:[#allocation5 + $0xb9c] ss:$12 sps:$4 sm:$0xff]   ;;  %v6418_v38 = vld [vmem:[#allocation5 + $0xad8] ss:$12 sps:$4 sm:$0xff]  }
 0x601   :  { %v5829_v47 = vadd.f32 %v3349_v45, %v2892_v39  ;;  %v3351_v48 = vpop.f32.mrb[38].mxu1  ;;  %v3431_v49 = vpop.f32.mrb[30].mxu0  ;;  %v6413_v39 = vld [vmem:[#allocation5 + $0xabc] ss:$12 sps:$4 sm:$0xff]   ;;  %v6416_v41 = vld [vmem:[#allocation5 + $0xad4] ss:$12 sps:$4 sm:$0xff]  }
 0x602   :  { %v6954_v51 = vpack.c.bf16 %v3429_v44, %v3429_v44  ;;  %v3352_v52 = vpop.f32.mrb[39].mxu1  ;;  %v5771_v53 = vpop.f32.mrb[31].mxu0  ;;  %v6956_v56 = vpack.c.bf16 %v5828_v43, %v5828_v43  ;;  %v6450_v36 = vld [vmem:[#allocation5 + $0xadc] ss:$12 sps:$4 sm:$0xff]   ;;  %v6419_v44 = vld [vmem:[#allocation5 + $0xaec] ss:$12 sps:$4 sm:$0xff]  }
 0x603   :  { %v3527_v54 = vpack.c.bf16 %v5829_v47, %v5829_v47  ;;  %v6421_v43 = vld [vmem:[#allocation5 + $0xaf0] ss:$12 sps:$4 sm:$0xff]   ;;  %v6424_v45 = vld [vmem:[#allocation5 + $0xb08] ss:$12 sps:$4 sm:$0xff]   ;;  %v6427_v47 = vld [vmem:[#allocation5 + $0xb20] ss:$12 sps:$4 sm:$0xff]  }
 0x604   :  { %5354 = vmatmul.mubr.msk.bf16.vlgmr.msra.gmra.mrb[44].mxu1 %vm1114_vm6, %v6954_v51  ;;  %v6422_v46 = vld [vmem:[#allocation5 + $0xb04] ss:$12 sps:$4 sm:$0xff]   ;;  %v6425_v48 = vld [vmem:[#allocation5 + $0xb1c] ss:$12 sps:$4 sm:$0xff]   ;;  %v6431_v52 = vld [vmem:[#allocation5 + $0xb4c] ss:$12 sps:$4 sm:$0xff]  }
 0x605   :  { %5581 = vmatpush3.bf16.msra.mxu1 %v6385_v50  ;;  %4099 = vmatprep.mubr.bf16.mxu0 %v3527_v54  ;;  %v6430_v49 = vld [vmem:[#allocation5 + $0xb38] ss:$12 sps:$4 sm:$0xff]   ;;  %v6428_v50 = vld [vmem:[#allocation5 + $0xb34] ss:$12 sps:$4 sm:$0xff]  }
 0x606   :  { %4181 = vmatprep.mubr.bf16.mxu1 %v3527_v54  ;;  %4100 = vmatmul.mubr.bf16.vlgmr.msra.gmra.mrb[36].mxu0 %v6956_v56  ;;  %v6438_v53 = vld [vmem:[#allocation5 + $0xb68] ss:$12 sps:$4 sm:$0xff]   ;;  %v6436_v54 = vld [vmem:[#allocation5 + $0xb64] ss:$12 sps:$4 sm:$0xff]  }
 0x607   :  { %5785 = vmatpush3.bf16.msra.mxu0 %v6386_v55  ;;  %5582 = vmatprep.subr.bf16.mxu1 %v6387_v21  ;;  %v6443_v55 = vld [vmem:[#allocation5 + $0xb80] ss:$12 sps:$4 sm:$0xff]   ;;  %v6441_v21 = vld [vmem:[#allocation5 + $0xb7c] ss:$12 sps:$4 sm:$0xff]  }
 0x608   :  { %5786 = vmatprep.subr.bf16.mxu0 %v6612_v3  ;;  %5798 = vmatprep.mubr.msk.bf16.mxu0 %vm6613_vm0, %v6612_v3 }
 0x609   :  { %5583 = vmatpush3.bf16.msra.mxu1 %v6388_v57  ;;  %v6446_v57 = vld [vmem:[#allocation5 + $0xb94] ss:$12 sps:$4 sm:$0xff]  }
 0x60a   :  { %5584 = vmatprep.subr.bf16.mxu1 %v6390_v58  ;;  %v6453_v58 = vld [vmem:[#allocation5 + $0xbb0] ss:$12 sps:$4 sm:$0xff]  }
 0x60b   :  { %5787 = vmatpush3.bf16.msra.mxu0 %v6389_v23  ;;  %v6454_v23 = vld [vmem:[#allocation5 + $0xbb4] ss:$12 sps:$4 sm:$0xff]  }
 0x60c   :  { %5788 = vmatprep.subr.bf16.mxu0 %v6612_v3 }
 0x60d   :  { %5585 = vmatpush3.bf16.msra.mxu1 %v6391_v59  ;;  %v6451_v59 = vld [vmem:[#allocation5 + $0xbac] ss:$12 sps:$4 sm:$0xff]  }
 0x60e   :  { %5586 = vmatprep.subr.bf16.mxu1 %v6393_v60  ;;  %v6455_v60 = vld [vmem:[#allocation5 + $0xaf4] ss:$12 sps:$4 sm:$0xff]  }
 0x60f   :  { %5789 = vmatpush3.bf16.msra.mxu0 %v6392_v61  ;;  %v6965_v1 = vpop.f32.mrb[32].mxu0  ;;  %v6458_v61 = vld [vmem:[#allocation5 + $0xbc8] ss:$12 sps:$4 sm:$0xff]  }
 0x610   :  { %5790 = vmatprep.subr.bf16.mxu0 %v6612_v3  ;;  %v6968_v4 = vpop.f32.mrb[33].mxu0  ;;  %v6970_v5 = vpop.f32.mrb[40].mxu1 }
 0x611   :  { %5587 = vmatpush3.bf16.msra.mxu1 %v6394_v62  ;;  %v3652_v7 = vpop.f32.mrb[34].mxu0  ;;  %v5782_v8 = vpop.f32.mrb[41].mxu1  ;;  %v6459_v62 = vld [vmem:[#allocation5 + $0xbcc] ss:$12 sps:$4 sm:$0xff]  }
 0x612   :  { %5588 = vmatprep.subr.bf16.mxu1 %v6396_v63  ;;  %v3653_v11 = vpop.f32.mrb[35].mxu0  ;;  %v3692_v12 = vpop.f32.mrb[42].mxu1  ;;  %v6456_v63 = vld [vmem:[#allocation5 + $0xbc4] ss:$12 sps:$4 sm:$0xff]   ;;  %v6461_v8 = vld [vmem:[#allocation5 + $0xbdc] ss:$12 sps:$4 sm:$0xff]  }
 0x613   :  { %5791 = vmatpush3.bf16.msra.mxu0 %v6395_v0  ;;  %v5783_v14 = vpop.f32.mrb[43].mxu1  ;;  %v6460_v0 = vld [vmem:[#allocation5 + $0xb0c] ss:$12 sps:$4 sm:$0xff]   ;;  %v6464_v7 = vld [vmem:[#allocation5 + $0xbe4] ss:$12 sps:$4 sm:$0xff]  }
 0x614   :  { %5792 = vmatprep.subr.bf16.mxu0 %v6612_v3  ;;  %v6468_v11 = vld [vmem:[#allocation5 + $0xbf8] ss:$12 sps:$4 sm:$0xff]   ;;  %v6469_v12 = vld [vmem:[#allocation5 + $0xbfc] ss:$12 sps:$4 sm:$0xff]  }
 0x615   :  { %5589 = vmatpush3.bf16.msra.mxu1 %v6397_v6  ;;  %v6463_v6 = vld [vmem:[#allocation5 + $0xbe0] ss:$12 sps:$4 sm:$0xff]   ;;  %v6470_v14 = vld [vmem:[#allocation5 + $0xb3c] ss:$12 sps:$4 sm:$0xff]  }
 0x616   :  { %5590 = vmatprep.subr.bf16.mxu1 %v6399_v10  ;;  %v6465_v10 = vld [vmem:[#allocation5 + $0xb24] ss:$12 sps:$4 sm:$0xff]  }
 0x617   :  { %5793 = vmatpush3.bf16.msra.mxu0 %v6398_v13  ;;  %v6466_v13 = vld [vmem:[#allocation5 + $0xbf4] ss:$12 sps:$4 sm:$0xff]  }
 0x618   :  { %5794 = vmatprep.subr.bf16.mxu0 %v6612_v3 }
 0x619   :  { %5591 = vmatpush3.bf16.msra.mxu1 %v6400_v15  ;;  %v6473_v15 = vld [vmem:[#allocation5 + $0xc10] ss:$12 sps:$4 sm:$0xff]  }
 0x61a   :  { %5592 = vmatprep.subr.bf16.mxu1 %v6402_v16 }
 0x61b   :  { %5795 = vmatpush3.bf16.msra.mxu0 %v6401_v17  ;;  %v6980_v17 = vld [vmem:[#allocation8 + $0x5] ss:$8 sm:$0x7] }
 0x61c   :  { %5796 = vmatprep.subr.bf16.mxu0 %v6612_v3 }
 0x61d   :  { %5593 = vmatpush3.bf16.msra.mxu1 %v6403_v19 }
 0x61e   :  { %5594 = vmatprep.subr.bf16.mxu1 %v6405_v20 }
 0x61f   :  { %5797 = vmatpush3.bf16.msra.mxu0 %v4065_v22 }
 0x620   :  { %5610 = vmatprep.subr.bf16.mxu0 %v6434_v24  ;;  %v4235_v24 = vrot.slane %v6980_v17, %v6793_v40 }
 0x621   :  { %5595 = vmatpush3.bf16.msra.mxu1 %v6406_v25 }
 0x622   :  { %5799 = vmatmul.mubr.msk.bf16.vlgmr.msra.gmra.mrb[40].mxu0 %vm1114_vm6, %v6954_v51  ;;  %4745 = vmatprep.subr.bf16.mxu1 %v6409_v26  ;;  %v6433_v51 = vld [vmem:[#allocation5 + $0xb50] ss:$12 sps:$4 sm:$0xff]  }
 0x623   :  { %5611 = vmatpush3.bf16.msra.mxu0 %v6435_v27 }
 0x624   :  { %4182 = vmatmul.mubr.bf16.vlgmr.msra.gmra.mrb[48].mxu1 %v6956_v56  ;;  %5612 = vmatprep.subr.bf16.mxu0 %v6439_v28  ;;  %v6448_v56 = vld [vmem:[#allocation5 + $0xb98] ss:$12 sps:$4 sm:$0xff]   ;;  %v4239_v28 = vrot.slane %v6980_v17, %v6800_v42 }
 0x625   :  { %4746 = vmatpush1.bf16.msra.mxu1 %v6407_v29 }
 0x626   :  { %4747 = vmatprep.subr.bf16.mxu1 %v6412_v30 }
 0x627   :  { %5613 = vmatpush3.bf16.msra.mxu0 %v6440_v31 }
 0x628   :  { %5614 = vmatprep.subr.bf16.mxu0 %v6444_v32  ;;  %v6988_v32 = vstv %s5356_s3 }
 0x629   :  { %4748 = vmatpush1.bf16.msra.mxu1 %v6410_v33 }
 0x62a   :  { %4749 = vmatprep.subr.bf16.mxu1 %v6415_v34 }
 0x62b   :  { %5615 = vmatpush3.bf16.msra.mxu0 %v6445_v35 }
 0x62c   :  { %5616 = vmatprep.subr.bf16.mxu0 %v6449_v37 }
 0x62d   :  { %4750 = vmatpush1.bf16.msra.mxu1 %v6413_v39 }
 0x62e   :  { %4751 = vmatprep.subr.bf16.mxu1 %v6418_v38 }
 0x62f   :  { %5617 = vmatpush3.bf16.msra.mxu0 %v6450_v36  ;;  %v6471_v36 = vld [vmem:[#allocation5 + $0xc0c] ss:$12 sps:$4 sm:$0xff]  }
 0x630   :  { %5618 = vmatprep.subr.bf16.mxu0 %v6454_v23 }
 0x631   :  { %4752 = vmatpush1.bf16.msra.mxu1 %v6416_v41  ;;  %v6474_v41 = vld [vmem:[#allocation5 + $0xc14] ss:$12 sps:$4 sm:$0xff]  }
 0x632   :  { %4753 = vmatprep.subr.bf16.mxu1 %v6421_v43 }
 0x633   :  { %5619 = vmatpush3.bf16.msra.mxu0 %v6455_v60 }
 0x634   :  { %5620 = vmatprep.subr.bf16.mxu0 %v6459_v62  ;;  %v6494_v62 = vld [vmem:[#allocation5 + $0xc8c] ss:$12 sps:$4 sm:$0xff]  }
 0x635   :  { %4754 = vmatpush1.bf16.msra.mxu1 %v6419_v44  ;;  %v6477_v44 = vld [vmem:[#allocation5 + $0xc28] ss:$12 sps:$4 sm:$0xff]  }
 0x636   :  { %4755 = vmatprep.subr.bf16.mxu1 %v6424_v45  ;;  %v6475_v45 = vld [vmem:[#allocation5 + $0xc24] ss:$12 sps:$4 sm:$0xff]  }
 0x637   :  { %5621 = vmatpush3.bf16.msra.mxu0 %v6460_v0 }
 0x638   :  { %5622 = vmatprep.subr.bf16.mxu0 %v6464_v7 }
 0x639   :  { %4756 = vmatpush1.bf16.msra.mxu1 %v6422_v46  ;;  %v6478_v46 = vld [vmem:[#allocation5 + $0xc2c] ss:$12 sps:$4 sm:$0xff]  }
 0x63a   :  { %4757 = vmatprep.subr.bf16.mxu1 %v6427_v47  ;;  %v6481_v47 = vld [vmem:[#allocation5 + $0xc40] ss:$12 sps:$4 sm:$0xff]  }
 0x63b   :  { %5623 = vmatpush3.bf16.msra.mxu0 %v6465_v10 }
 0x63c   :  { %5624 = vmatprep.subr.bf16.mxu0 %v6469_v12  ;;  %v4243_v12 = vrot.slane %v6980_v17, %v6815_v9 }
 0x63d   :  { %4758 = vmatpush1.bf16.msra.mxu1 %v6425_v48  ;;  %v6479_v48 = vld [vmem:[#allocation5 + $0xc3c] ss:$12 sps:$4 sm:$0xff]  }
 0x63e   :  { %4759 = vmatprep.subr.bf16.mxu1 %v6430_v49  ;;  %v6482_v49 = vld [vmem:[#allocation5 + $0xc44] ss:$12 sps:$4 sm:$0xff]  }
 0x63f   :  { %5625 = vmatpush3.bf16.msra.mxu0 %v6470_v14 }
 0x640   :  { %5802 = vmatprep.subr.bf16.mxu0 %v6612_v3 }
 0x641   :  { %4760 = vmatpush1.bf16.msra.mxu1 %v6428_v50  ;;  %v6485_v50 = vld [vmem:[#allocation5 + $0xc58] ss:$12 sps:$4 sm:$0xff]  }
 0x642   :  { %4761 = vmatprep.subr.bf16.mxu1 %v6433_v51  ;;  %v6483_v51 = vld [vmem:[#allocation5 + $0xc54] ss:$12 sps:$4 sm:$0xff]  }
 0x645   :  { %4762 = vmatpush1.bf16.msra.mxu1 %v6431_v52  ;;  %v6486_v52 = vld [vmem:[#allocation5 + $0xc5c] ss:$12 sps:$4 sm:$0xff]  }
 0x646   :  { %4763 = vmatprep.subr.bf16.mxu1 %v6438_v53  ;;  %v6489_v53 = vld [vmem:[#allocation5 + $0xc70] ss:$12 sps:$4 sm:$0xff]  }
 0x649   :  { %4764 = vmatpush1.bf16.msra.mxu1 %v6436_v54  ;;  %v6490_v54 = vld [vmem:[#allocation5 + $0xc74] ss:$12 sps:$4 sm:$0xff]  }
 0x64a   :  { %4765 = vmatprep.subr.bf16.mxu1 %v6443_v55 }
 0x64d   :  { %4766 = vmatpush1.bf16.msra.mxu1 %v6441_v21  ;;  %v6493_v21 = vld [vmem:[#allocation5 + $0xc88] ss:$12 sps:$4 sm:$0xff]  }
 0x64e   :  { %4767 = vmatprep.subr.bf16.mxu1 %v6448_v56 }
 0x651   :  { %4768 = vmatpush1.bf16.msra.mxu1 %v6446_v57  ;;  %v4350_v57 = vld [vmem:[#allocation5 + $0xc9c] sm:$0xff] }
 0x652   :  { %4769 = vmatprep.subr.bf16.mxu1 %v6453_v58  ;;  %v5423_v7 = vcombine.low %v4350_v57, %v4350_v57 }
 0x654   :  { %v4737_v14 = vsel %vm1118_vm4, %v5423_v7, 0 }
 0x655   :  { %4770 = vmatpush1.bf16.msra.mxu1 %v6451_v59 }
 0x656   :  { %4771 = vmatprep.subr.bf16.mxu1 %v6458_v61  ;;  %v6491_v61 = vld [vmem:[#allocation5 + $0xc84] ss:$12 sps:$4 sm:$0xff]  }
 0x659   :  { %4772 = vmatpush1.bf16.msra.mxu1 %v6456_v63 }
 0x65a   :  { %4773 = vmatprep.subr.bf16.mxu1 %v6463_v6  ;;  %v5424_v6 = vcombine.high %v4350_v57, %v4350_v57 }
 0x65d   :  { %4774 = vmatpush1.bf16.msra.mxu1 %v6461_v8  ;;  %v6497_v8 = vld [vmem:[#allocation5 + $0xca4] ss:$0 sps:$4 sm:$0xff]  }
 0x65e   :  { %4775 = vmatprep.subr.bf16.mxu1 %v6468_v11 }
 0x661   :  { %4776 = vmatpush1.bf16.msra.mxu1 %v6466_v13 }
 0x662   :  { %4786 = vmatprep.subr.bf16.mxu1 %v6473_v15  ;;  %v4743_v15 = vsel %vm1118_vm4, %v6497_v8, 0 }
 0x6d7   :  { %v4142_v16 = vpop.f32.mrb[44].mxu1 }
 0x6d8   :  { %v4144_v18 = vpop.f32.mrb[45].mxu1 }
 0x6d9   :  { %v4101_v19 = vpop.f32.mrb[36].mxu0  ;;  %v4146_v20 = vpop.f32.mrb[46].mxu1 }
 0x6da   :  { %v4102_v22 = vadd.f32 %v4101_v19, %v6965_v1  ;;  %v4103_v25 = vpop.f32.mrb[37].mxu0  ;;  %v4147_v26 = vpop.f32.mrb[47].mxu1 }
 0x6db   :  { %v4104_v27 = vadd.f32 %v4103_v25, %v6968_v4  ;;  %v4105_v29 = vpop.f32.mrb[38].mxu0  ;;  %v4356_v25 = vld [vmem:[#allocation8 + $0x6] ss:$8 sm:$0x7] }
 0x6dc   :  { %v4143_v30 = vadd.f32 %v4142_v16, %v4102_v22  ;;  %v4106_v31 = vpop.f32.mrb[39].mxu0  ;;  %v4369_v26 = vrot.slane %v4356_v25, %v6815_v9 }
 0x6dd   :  { %v4145_v33 = vadd.f32 %v4144_v18, %v4104_v27  ;;  %v4361_v27 = vrot.slane %v4356_v25, %v6793_v40 }
 0x6de   :  { %v4247_v34 = vadd.f32 %v4235_v24, %v4143_v30 }
 0x6df   :  { %v4248_v35 = vadd.f32 %v4239_v28, %v4145_v33  ;;  %v4365_v28 = vrot.slane %v4356_v25, %v6800_v42 }
 0x6e0   :  { %vm4251_vm2 = vcmp.ge.f32.partialorder %v4247_v34, 0.0  ;;  %v4255_v1 = vmul.f32 %v6988_v32, %v4247_v34 }
 0x6e1   :  { %vm4252_vm3 = vcmp.ge.f32.partialorder %v4248_v35, 0.0  ;;  %v4256_v37 = vmul.f32 %v6988_v32, %v4248_v35 }
 0x6e2   :  { %v4258_v39 = vsel %vm4251_vm2, %v4247_v34, %v4255_v1 }
 0x6e3   :  { %v4259_v38 = vsel %vm4252_vm3, %v4248_v35, %v4256_v37  ;;  %v4352_v43 = vpack.c.bf16 %v4258_v39, %v4258_v39 }
 0x6e4   :  { %v4353_v4 = vpack.c.bf16 %v4259_v38, %v4259_v38 }
 0x6e6   :  { %4777 = vmatprep.mubr.bf16.mxu1 %v4353_v4  ;;  %4859 = vmatprep.mubr.bf16.mxu0 %v4353_v4 }
 0x6e7   :  { %4778 = vmatmul.mubr.bf16.vlgmr.msra.gmra.mrb[52].mxu1 %v4352_v43  ;;  %4860 = vmatmul.mubr.bf16.vlgmr.msra.gmra.mrb[44].mxu0 %v4352_v43 }
 0x6e8   :  { %4787 = vmatpush1.bf16.msra.mxu1 %v6471_v36  ;;  %5803 = vmatpush3.bf16.msra.mxu0 %v6474_v41 }
 0x6e9   :  { %4788 = vmatprep.subr.bf16.mxu1 %v6477_v44  ;;  %5804 = vmatprep.subr.bf16.mxu0 %v6612_v3 }
 0x6ea   :  { %4818 = vmatprep.mubr.bf16.mxu1 %v6611_v2  ;;  %5816 = vmatprep.mubr.msk.bf16.mxu0 %vm6613_vm0, %v6612_v3  ;;  %v6487_v2 = vld [vmem:[#allocation5 + $0xc6c] ss:$12 sps:$4 sm:$0xff]  }
 0x6ec   :  { %4789 = vmatpush1.bf16.msra.mxu1 %v6475_v45  ;;  %5805 = vmatpush3.bf16.msra.mxu0 %v6478_v46 }
 0x6ed   :  { %4790 = vmatprep.subr.bf16.mxu1 %v6481_v47  ;;  %5806 = vmatprep.subr.bf16.mxu0 %v6612_v3 }
 0x6f0   :  { %4791 = vmatpush1.bf16.msra.mxu1 %v6479_v48  ;;  %5807 = vmatpush3.bf16.msra.mxu0 %v6482_v49 }
 0x6f1   :  { %4792 = vmatprep.subr.bf16.mxu1 %v6485_v50  ;;  %5808 = vmatprep.subr.bf16.mxu0 %v6612_v3 }
 0x6f4   :  { %4793 = vmatpush1.bf16.msra.mxu1 %v6483_v51  ;;  %5809 = vmatpush3.bf16.msra.mxu0 %v6486_v52 }
 0x6f5   :  { %v4223_v55 = vpop.f32.mrb[40].mxu0  ;;  %4794 = vmatprep.subr.bf16.mxu1 %v6489_v53  ;;  %5810 = vmatprep.subr.bf16.mxu0 %v6612_v3 }
 0x6f6   :  { %v5800_v56 = vpop.f32.mrb[41].mxu0 }
 0x6f7   :  { %v5596_v58 = vpop.f32.mrb[48].mxu1  ;;  %v4226_v23 = vpop.f32.mrb[42].mxu0 }
 0x6f8   :  { %v5597_v59 = vpop.f32.mrb[49].mxu1  ;;  %v5801_v60 = vpop.f32.mrb[43].mxu0  ;;  %4795 = vmatpush1.bf16.msra.mxu1 %v6487_v2  ;;  %5811 = vmatpush3.bf16.msra.mxu0 %v6490_v54 }
 0x6f9   :  { %v5598_v63 = vadd.f32 %v5597_v59, %v5596_v58  ;;  %v5599_v0 = vpop.f32.mrb[50].mxu1  ;;  %4796 = vmatprep.subr.bf16.mxu1 %v6493_v21  ;;  %5812 = vmatprep.subr.bf16.mxu0 %v6612_v3 }
 0x6fa   :  { %v5600_v10 = vpop.f32.mrb[51].mxu1 }
 0x6fb   :  { %v4184_v11 = vadd.f32 %v5598_v63, %v6970_v5 }
 0x6fc   :  { %4797 = vmatpush1.bf16.msra.mxu1 %v6491_v61  ;;  %5813 = vmatpush3.bf16.msra.mxu0 %v6494_v62 }
 0x6fd   :  { %v4224_v13 = vadd.f32 %v4223_v55, %v4184_v11  ;;  %5426 = vmatprep.subr.msk.bf16.mxu1 %vm1118_vm4, %v5424_v6  ;;  %5814 = vmatprep.subr.bf16.mxu0 %v6612_v3 }
 0x6ff   :  { %v4249_v16 = vadd.f32 %v4243_v12, %v4224_v13 }
 0x700   :  { %4799 = vmatpush1.bf16.msra.mxu1 %v4737_v14  ;;  %5815 = vmatpush3.bf16.msra.mxu0 %v4743_v15 }
 0x701   :  { %vm4253_vm0 = vcmp.ge.f32.partialorder %v4249_v16, 0.0  ;;  %v4257_v5 = vmul.f32 %v6988_v32, %v4249_v16 }
 0x703   :  { %v4260_v18 = vsel %vm4253_vm0, %v4249_v16, %v4257_v5 }
 0x704   :  { %v4354_v19 = vpack.c.bf16 %v4260_v18, %v4260_v18 }
 0x706   :  { %5427 = vmatmul.mubr.msk.bf16.vlgmr.msra.gmra.mrb[52].mxu1 %vm1114_vm6, %v4354_v19  ;;  %5817 = vmatmul.mubr.msk.bf16.vlgmr.msra.gmra.mrb[48].mxu0 %vm1114_vm6, %v4354_v19 }
 0x7ba   :  { %v5626_v17 = vpop.f32.mrb[44].mxu0 }
 0x7bb   :  { %v5627_v20 = vpop.f32.mrb[45].mxu0 }
 0x7bc   :  { %v5628_v22 = vadd.f32 %v5627_v20, %v5626_v17  ;;  %v5629_v3 = vpop.f32.mrb[46].mxu0 }
 0x7bd   :  { %v5630_v24 = vpop.f32.mrb[47].mxu0 }
 0x7be   :  { %v4862_v29 = vadd.f32 %v5628_v22, %v4369_v26 }
 0x7d9   :  { %v4820_v30 = vpop.f32.mrb[52].mxu1  ;;  %v4901_v31 = vpop.f32.mrb[48].mxu0 }
 0x7da   :  { %v5830_v32 = vadd.f32 %v4820_v30, %v4361_v27  ;;  %v4902_v33 = vadd.f32 %v4901_v31, %v4862_v29  ;;  %v4822_v34 = vpop.f32.mrb[53].mxu1  ;;  %v5818_v35 = vpop.f32.mrb[49].mxu0 }
 0x7db   :  { %v5831_v1 = vadd.f32 %v4822_v34, %v4365_v28  ;;  %v4824_v37 = vpop.f32.mrb[54].mxu1  ;;  %v4904_v39 = vpop.f32.mrb[50].mxu0 }
 0x7dc   :  { %4907 = vst [vmem:[%s7032_s9] sm:$0xff] %v5830_v32  ;;  %4909 = vst.msk [vmem:[%s7032_s9 + $0x10] sm:$0xff] %vm1114_vm6, %v4902_v33  ;;  %v4825_v40 = vpop.f32.mrb[55].mxu1  ;;  %v5819_v42 = vpop.f32.mrb[51].mxu0 }
 0x7dd   :  { %4908 = vst [vmem:[%s7032_s9 + $0x8] sm:$0xff] %v5831_v1 }
 0x7de   :  { %4914 = vsyncpa [#allocation3], 1 }
 0x7df   :  { %4915 = vsyncpa [#allocation6], 1 }
 0x7e0   :  { %4916 = vsyncpa [#allocation9], 1 }
 0x7e1   :  { %4917 = vsyncpa [#allocation4], 1 }

</bundles_post_ra>
